<compile_context>
chip_gen: v7x
topology: tpu7x:2x2x1
jax: 0.10.0
libtpu: 0.0.40
codegen_flags: <defaults>
</compile_context>

<pallas_src>
import jax
import jax.numpy as jnp
from jax.experimental import pallas as pl
from jax.experimental.pallas import tpu as pltpu

_VMEM = pl.BlockSpec(memory_space=pltpu.MemorySpace.VMEM)

# Fully unroll recurrent loops up to this many steps (scheduler visibility);
# above it, fall back to pl.loop so code size / compile time stay bounded.
_UNROLL_LIMIT = 32


def _steps(n, body):
    """Run body(t) for t in [0, n): Python-unrolled for short static loops,
    pl.loop otherwise. The body is written so it is valid for both static
    Python ints and traced loop indices."""
    if n <= _UNROLL_LIMIT:
        for t in range(n):
            body(t)
    else:
        pl.loop(0, n)(body)


# ----------------------------------------------------------------------------
# Fused Seq2Seq kernel (encoder + autoregressive decoder + linear + residual)
# ----------------------------------------------------------------------------
def _make_seq2seq_kernel(num_layers):
    L = num_layers

    def kernel(*refs):
        it = iter(refs)
        x_ref = next(it)                                        # (T*B, I) time-major flat input
        loc_ref = next(it)                                      # (B, O)   last_location
        enc_w = [(next(it), next(it), next(it)) for _ in range(L)]   # (wih, whh, b)
        dec_w = [(next(it), next(it)) for _ in range(L)]             # (wcat, b)
        lin_w_ref = next(it)                                    # (H, O)
        lin_b_ref = next(it)                                    # (1, O)
        out_ref = next(it)                                      # (P, B, O) time-major output
        gx_ref = next(it)                                       # (T*B, 4H) hoisted projection
        seq_ref = next(it)                                      # (T*B, H)  layer output sequence
        di_ref = next(it)                                       # (B, O)    decoder feedback
        h_refs = [next(it) for _ in range(L)]                   # (B, H) each
        c_refs = [next(it) for _ in range(L)]                   # (B, H) each

        B, O = loc_ref.shape
        H = lin_w_ref.shape[0]
        T = x_ref.shape[0] // B
        P = out_ref.shape[0]

        def lstm_cell(gates, c):
            # lane-dense nonlinearities over the full (B, 4H) gate vector,
            # split only for the elementwise state update (gate order i,f,g,o)
            sig = jax.nn.sigmoid(gates)
            tg = jnp.tanh(gates)
            i = sig[:, 0 * H:1 * H]
            f = sig[:, 1 * H:2 * H]
            g = tg[:, 2 * H:3 * H]
            o = sig[:, 3 * H:4 * H]
            c_new = f * c + i * g
            h_new = o * jnp.tanh(c_new)
            return h_new, c_new

        # ----------------------------- encoder -----------------------------
        for l in range(L):
            h_refs[l][...] = jnp.zeros_like(h_refs[l])
            c_refs[l][...] = jnp.zeros_like(c_refs[l])

        for l in range(L):
            wih_ref, whh_ref, b_ref = enc_w[l]
            xin = x_ref[...] if l == 0 else seq_ref[...]
            # hoisted input projection + bias: one (T*B, in) @ (in, 4H) matmul
            # (fully consumes seq_ref from layer l-1 before the time loop
            #  overwrites it with layer l's outputs)
            gx_ref[...] = (jnp.dot(xin, wih_ref[...],
                                   preferred_element_type=jnp.float32)
                           + b_ref[...])
            store_seq = l < L - 1   # last layer's sequence output is unused

            def _enc_step(t, _l=l, _whh_ref=whh_ref, _store=store_seq):
                h = h_refs[_l][...]
                c = c_refs[_l][...]
                gates = (gx_ref[pl.ds(t * B, B), :]
                         + jnp.dot(h, _whh_ref[...],
                                   preferred_element_type=jnp.float32))
                h_new, c_new = lstm_cell(gates, c)
                h_refs[_l][...] = h_new
                c_refs[_l][...] = c_new
                if _store:
                    seq_ref[pl.ds(t * B, B), :] = h_new

            _steps(T, _enc_step)

        # ----------------------------- decoder -----------------------------
        di_ref[...] = loc_ref[...]

        def _dec_step(t):
            dec_in = di_ref[...]                       # (B, O)
            x_in = dec_in
            for l in range(L):
                wcat_ref, bd_ref = dec_w[l]
                h = h_refs[l][...]
                c = c_refs[l][...]
                # stacked [x ; h] @ ((in+H), 4H): one MXU dot per layer/step
                xcat = jnp.concatenate([x_in, h], axis=-1)
                gates = (jnp.dot(xcat, wcat_ref[...],
                                 preferred_element_type=jnp.float32)
                         + bd_ref[...])
                h_new, c_new = lstm_cell(gates, c)
                h_refs[l][...] = h_new
                c_refs[l][...] = c_new
                x_in = h_new
            # TODO(synk): nn.Dropout(p=0.5) is identity here (eval-mode forward).
            now = (jnp.dot(x_in, lin_w_ref[...],
                           preferred_element_type=jnp.float32)
                   + lin_b_ref[...] + dec_in)          # linear + residual
            out_ref[t] = now                           # time-major output store
            di_ref[...] = now                          # autoregressive feedback

        _steps(P, _dec_step)

    return kernel


# ----------------------------------------------------------------------------
# Wrapper
# ----------------------------------------------------------------------------
def seq2seq_forward(params, in_data, last_location, pred_length):
    B, T, I = in_data.shape
    L = len(params["enc"])
    H = params["enc"][0]["whh"].shape[0]
    O = params["lin_w"].shape[1]

    # layout plumbing outside the kernel: time-major flattened input, squeezed
    # last_location; output comes back time-major and is transposed to (B,P,O)
    x_tm = jnp.transpose(in_data, (1, 0, 2)).reshape(T * B, I)
    loc = last_location[:, 0, :]

    args = [x_tm, loc]
    for p in params["enc"]:
        args += [p["wih"], p["whh"], p["b"]]
    for p in params["dec"]:
        args += [p["wcat"], p["b"]]
    args += [params["lin_w"], params["lin_b"]]

    scratch = ([pltpu.VMEM((T * B, 4 * H), jnp.float32),   # gx: hoisted gates
                pltpu.VMEM((T * B, H), jnp.float32),       # seq: layer outputs
                pltpu.VMEM((B, O), jnp.float32)]           # decoder feedback
               + [pltpu.VMEM((B, H), jnp.float32) for _ in range(2 * L)])  # h,c

    out_tm = pl.pallas_call(
        _make_seq2seq_kernel(L),
        out_shape=jax.ShapeDtypeStruct((pred_length, B, O), jnp.float32),
        in_specs=[_VMEM] * len(args),
        out_specs=_VMEM,
        scratch_shapes=scratch,
    )(*args)
    return jnp.transpose(out_tm, (1, 0, 2))                 # (B, pred_len, O)


# ----------------------------------------------------------------------------
# Parameter construction (deterministic, PyTorch-style uniform(-k, k))
# ----------------------------------------------------------------------------
def init_params(key, input_size, hidden_size, hidden_dim, num_layers):
    k = 1.0 / jnp.sqrt(float(hidden_dim))

    def uni(key, shape):
        return jax.random.uniform(key, shape, jnp.float32, minval=-k, maxval=k)

    params = {"enc": [], "dec": []}
    # encoder: transposed weights (in, 4H)/(H, 4H), pre-summed bias (1, 4H)
    for l in range(num_layers):
        in_f = input_size if l == 0 else hidden_dim
        key, k1, k2, k3, k4 = jax.random.split(key, 5)
        w_ih = uni(k1, (4 * hidden_dim, in_f))               # PyTorch layout
        w_hh = uni(k2, (4 * hidden_dim, hidden_dim))
        b_ih = uni(k3, (4 * hidden_dim,))
        b_hh = uni(k4, (4 * hidden_dim,))
        params["enc"].append({
            "wih": jnp.transpose(w_ih),                      # (in_f, 4H)
            "whh": jnp.transpose(w_hh),                      # (H, 4H)
            "b": (b_ih + b_hh)[None, :],                     # (1, 4H)
        })
    # decoder: stacked [W_ih ; W_hh] -> ((in_f + H), 4H) for single-dot steps
    for l in range(num_layers):
        in_f = hidden_size if l == 0 else hidden_dim
        key, k1, k2, k3, k4 = jax.random.split(key, 5)
        w_ih = uni(k1, (4 * hidden_dim, in_f))
        w_hh = uni(k2, (4 * hidden_dim, hidden_dim))
        b_ih = uni(k3, (4 * hidden_dim,))
        b_hh = uni(k4, (4 * hidden_dim,))
        params["dec"].append({
            "wcat": jnp.concatenate(
                [jnp.transpose(w_ih), jnp.transpose(w_hh)], axis=0),  # (in_f+H, 4H)
            "b": (b_ih + b_hh)[None, :],                     # (1, 4H)
        })
    key, k1, k2 = jax.random.split(key, 3)
    params["lin_w"] = jnp.transpose(uni(k1, (hidden_size, hidden_dim)))  # (H, O)
    params["lin_b"] = uni(k2, (hidden_size,))[None, :]                   # (1, O)
    return params


# ----------------------------------------------------------------------------
if __name__ == "__main__":
    input_size, hidden_size, hidden_dim, num_layers = 4, 8, 32, 2
    batch, seq_len, pred_length = 2, 8, 4

    key = jax.random.PRNGKey(0)
    key, kp, kx, kl = jax.random.split(key, 4)
    params = init_params(kp, input_size, hidden_size, hidden_dim, num_layers)
    in_data = jax.random.normal(kx, (batch, seq_len, input_size), jnp.float32)
    last_location = jax.random.normal(kl, (batch, 1, hidden_size), jnp.float32)

    fwd = jax.jit(seq2seq_forward, static_argnums=3)
    out = fwd(params, in_data, last_location, pred_length)
    out = jax.block_until_ready(out)

    assert out.shape == (batch, pred_length, hidden_size)
    assert bool(jnp.all(jnp.isfinite(out)))
    print("KERNEL_OK")
</pallas_src>

<mosaic_0001>
module attributes {stable_mosaic.version = 11 : i64} {
  func.func @kernel(%arg0: memref<16x4xf32, #tpu.memory_space<vmem>>, %arg1: memref<2x8xf32, #tpu.memory_space<vmem>>, %arg2: memref<4x128xf32, #tpu.memory_space<vmem>>, %arg3: memref<32x128xf32, #tpu.memory_space<vmem>>, %arg4: memref<1x128xf32, #tpu.memory_space<vmem>>, %arg5: memref<32x128xf32, #tpu.memory_space<vmem>>, %arg6: memref<32x128xf32, #tpu.memory_space<vmem>>, %arg7: memref<1x128xf32, #tpu.memory_space<vmem>>, %arg8: memref<40x128xf32, #tpu.memory_space<vmem>>, %arg9: memref<1x128xf32, #tpu.memory_space<vmem>>, %arg10: memref<64x128xf32, #tpu.memory_space<vmem>>, %arg11: memref<1x128xf32, #tpu.memory_space<vmem>>, %arg12: memref<32x8xf32, #tpu.memory_space<vmem>>, %arg13: memref<1x8xf32, #tpu.memory_space<vmem>>, %arg14: memref<4x2x8xf32, #tpu.memory_space<vmem>>, %arg15: memref<16x128xf32, #tpu.memory_space<vmem>>, %arg16: memref<16x32xf32, #tpu.memory_space<vmem>>, %arg17: memref<2x8xf32, #tpu.memory_space<vmem>>, %arg18: memref<2x32xf32, #tpu.memory_space<vmem>>, %arg19: memref<2x32xf32, #tpu.memory_space<vmem>>, %arg20: memref<2x32xf32, #tpu.memory_space<vmem>>, %arg21: memref<2x32xf32, #tpu.memory_space<vmem>>) attributes {dimension_semantics = [], scalar_prefetch = 0 : i64, scratch_operands = 7 : i64, tpu.core_type = #tpu.core_type<tc>} {
    %cst = arith.constant 0.000000e+00 : f32
    %0 = vector.broadcast %cst : f32 to vector<2x32xf32>
    %c0 = arith.constant 0 : index
    %c0_0 = arith.constant 0 : index
    %1 = vector.load %arg18[%c0, %c0_0] : memref<2x32xf32, #tpu.memory_space<vmem>>, vector<2x32xf32>
    tpu.vector_store %arg18[%c0, %c0_0], %0 {strides = array<i32>} : memref<2x32xf32, #tpu.memory_space<vmem>>, vector<2x32xf32>,
    %cst_1 = arith.constant 0.000000e+00 : f32
    %2 = vector.broadcast %cst_1 : f32 to vector<2x32xf32>
    %c0_2 = arith.constant 0 : index
    %c0_3 = arith.constant 0 : index
    %3 = vector.load %arg20[%c0_2, %c0_3] : memref<2x32xf32, #tpu.memory_space<vmem>>, vector<2x32xf32>
    tpu.vector_store %arg20[%c0_2, %c0_3], %2 {strides = array<i32>} : memref<2x32xf32, #tpu.memory_space<vmem>>, vector<2x32xf32>,
    %cst_4 = arith.constant 0.000000e+00 : f32
    %4 = vector.broadcast %cst_4 : f32 to vector<2x32xf32>
    %c0_5 = arith.constant 0 : index
    %c0_6 = arith.constant 0 : index
    %5 = vector.load %arg19[%c0_5, %c0_6] : memref<2x32xf32, #tpu.memory_space<vmem>>, vector<2x32xf32>
    tpu.vector_store %arg19[%c0_5, %c0_6], %4 {strides = array<i32>} : memref<2x32xf32, #tpu.memory_space<vmem>>, vector<2x32xf32>,
    %cst_7 = arith.constant 0.000000e+00 : f32
    %6 = vector.broadcast %cst_7 : f32 to vector<2x32xf32>
    %c0_8 = arith.constant 0 : index
    %c0_9 = arith.constant 0 : index
    %7 = vector.load %arg21[%c0_8, %c0_9] : memref<2x32xf32, #tpu.memory_space<vmem>>, vector<2x32xf32>
    tpu.vector_store %arg21[%c0_8, %c0_9], %6 {strides = array<i32>} : memref<2x32xf32, #tpu.memory_space<vmem>>, vector<2x32xf32>,
    %c0_10 = arith.constant 0 : index
    %c0_11 = arith.constant 0 : index
    %8 = vector.load %arg0[%c0_10, %c0_11] : memref<16x4xf32, #tpu.memory_space<vmem>>, vector<16x4xf32>
    %c0_12 = arith.constant 0 : index
    %c0_13 = arith.constant 0 : index
    %9 = vector.load %arg2[%c0_12, %c0_13] : memref<4x128xf32, #tpu.memory_space<vmem>>, vector<4x128xf32>
    %cst_14 = arith.constant dense<0.000000e+00> : vector<16x128xf32>
    %10 = tpu.matmul %8, %9, %cst_14 {dimension_numbers = #tpu.dot_dimension_numbers<[1], [0], [0], [1], [0, 0, 1, 1], [], []>} : vector<16x4xf32>, vector<4x128xf32>, vector<16x128xf32> -> vector<16x128xf32>
    %c0_15 = arith.constant 0 : index
    %c0_16 = arith.constant 0 : index
    %11 = vector.load %arg4[%c0_15, %c0_16] : memref<1x128xf32, #tpu.memory_space<vmem>>, vector<1x128xf32>
    %12 = vector.broadcast %11 : vector<1x128xf32> to vector<16x128xf32>
    %13 = arith.addf %10, %12 : vector<16x128xf32>
    %c0_17 = arith.constant 0 : index
    %c0_18 = arith.constant 0 : index
    %14 = vector.load %arg15[%c0_17, %c0_18] : memref<16x128xf32, #tpu.memory_space<vmem>>, vector<16x128xf32>
    tpu.vector_store %arg15[%c0_17, %c0_18], %13 {strides = array<i32>} : memref<16x128xf32, #tpu.memory_space<vmem>>, vector<16x128xf32>,
    %c0_19 = arith.constant 0 : index
    %c0_20 = arith.constant 0 : index
    %15 = vector.load %arg18[%c0_19, %c0_20] : memref<2x32xf32, #tpu.memory_space<vmem>>, vector<2x32xf32>
    %c0_21 = arith.constant 0 : index
    %c0_22 = arith.constant 0 : index
    %16 = vector.load %arg20[%c0_21, %c0_22] : memref<2x32xf32, #tpu.memory_space<vmem>>, vector<2x32xf32>
    %c0_23 = arith.constant 0 : index
    %c0_24 = arith.constant 0 : index
    %17 = vector.load %arg15[%c0_23, %c0_24] : memref<16x128xf32, #tpu.memory_space<vmem>>, vector<2x128xf32>
    %c0_25 = arith.constant 0 : index
    %c0_26 = arith.constant 0 : index
    %18 = vector.load %arg3[%c0_25, %c0_26] : memref<32x128xf32, #tpu.memory_space<vmem>>, vector<32x128xf32>
    %cst_27 = arith.constant dense<0.000000e+00> : vector<2x128xf32>
    %19 = tpu.matmul %15, %18, %cst_27 {dimension_numbers = #tpu.dot_dimension_numbers<[1], [0], [0], [1], [0, 0, 1, 1], [], []>} : vector<2x32xf32>, vector<32x128xf32>, vector<2x128xf32> -> vector<2x128xf32>
    %20 = arith.addf %17, %19 : vector<2x128xf32>
    %21 = arith.negf %20 : vector<2x128xf32>
    %22 = math.exp %21 : vector<2x128xf32>
    %cst_28 = arith.constant 1.000000e+00 : f32
    %23 = vector.broadcast %cst_28 : f32 to vector<2x128xf32>
    %24 = arith.addf %23, %22 : vector<2x128xf32>
    %25 = arith.divf %23, %24 : vector<2x128xf32>
    %26 = math.tanh %20 : vector<2x128xf32>
    %27 = vector.extract_strided_slice %25 {offsets = [0, 0], sizes = [2, 32], strides = [1, 1]} : vector<2x128xf32> to vector<2x32xf32>
    %28 = vector.extract_strided_slice %25 {offsets = [0, 32], sizes = [2, 32], strides = [1, 1]} : vector<2x128xf32> to vector<2x32xf32>
    %29 = vector.extract_strided_slice %26 {offsets = [0, 64], sizes = [2, 32], strides = [1, 1]} : vector<2x128xf32> to vector<2x32xf32>
    %30 = vector.extract_strided_slice %25 {offsets = [0, 96], sizes = [2, 32], strides = [1, 1]} : vector<2x128xf32> to vector<2x32xf32>
    %31 = arith.mulf %28, %16 : vector<2x32xf32>
    %32 = arith.mulf %27, %29 : vector<2x32xf32>
    %33 = arith.addf %31, %32 : vector<2x32xf32>
    %34 = math.tanh %33 : vector<2x32xf32>
    %35 = arith.mulf %30, %34 : vector<2x32xf32>
    %c0_29 = arith.constant 0 : index
    %c0_30 = arith.constant 0 : index
    %36 = vector.load %arg18[%c0_29, %c0_30] : memref<2x32xf32, #tpu.memory_space<vmem>>, vector<2x32xf32>
    tpu.vector_store %arg18[%c0_29, %c0_30], %35 {strides = array<i32>} : memref<2x32xf32, #tpu.memory_space<vmem>>, vector<2x32xf32>,
    %c0_31 = arith.constant 0 : index
    %c0_32 = arith.constant 0 : index
    %37 = vector.load %arg20[%c0_31, %c0_32] : memref<2x32xf32, #tpu.memory_space<vmem>>, vector<2x32xf32>
    tpu.vector_store %arg20[%c0_31, %c0_32], %33 {strides = array<i32>} : memref<2x32xf32, #tpu.memory_space<vmem>>, vector<2x32xf32>,
    %c0_33 = arith.constant 0 : index
    %c0_34 = arith.constant 0 : index
    %38 = vector.load %arg16[%c0_33, %c0_34] : memref<16x32xf32, #tpu.memory_space<vmem>>, vector<2x32xf32>
    tpu.vector_store %arg16[%c0_33, %c0_34], %35 {strides = array<i32>} : memref<16x32xf32, #tpu.memory_space<vmem>>, vector<2x32xf32>,
    %c0_35 = arith.constant 0 : index
    %c0_36 = arith.constant 0 : index
    %39 = vector.load %arg18[%c0_35, %c0_36] : memref<2x32xf32, #tpu.memory_space<vmem>>, vector<2x32xf32>
    %c0_37 = arith.constant 0 : index
    %c0_38 = arith.constant 0 : index
    %40 = vector.load %arg20[%c0_37, %c0_38] : memref<2x32xf32, #tpu.memory_space<vmem>>, vector<2x32xf32>
    %c2 = arith.constant 2 : index
    %c0_39 = arith.constant 0 : index
    %41 = vector.load %arg15[%c2, %c0_39] : memref<16x128xf32, #tpu.memory_space<vmem>>, vector<2x128xf32>
    %c0_40 = arith.constant 0 : index
    %c0_41 = arith.constant 0 : index
    %42 = vector.load %arg3[%c0_40, %c0_41] : memref<32x128xf32, #tpu.memory_space<vmem>>, vector<32x128xf32>
    %cst_42 = arith.constant dense<0.000000e+00> : vector<2x128xf32>
    %43 = tpu.matmul %39, %42, %cst_42 {dimension_numbers = #tpu.dot_dimension_numbers<[1], [0], [0], [1], [0, 0, 1, 1], [], []>} : vector<2x32xf32>, vector<32x128xf32>, vector<2x128xf32> -> vector<2x128xf32>
    %44 = arith.addf %41, %43 : vector<2x128xf32>
    %45 = arith.negf %44 : vector<2x128xf32>
    %46 = math.exp %45 : vector<2x128xf32>
    %cst_43 = arith.constant 1.000000e+00 : f32
    %47 = vector.broadcast %cst_43 : f32 to vector<2x128xf32>
    %48 = arith.addf %47, %46 : vector<2x128xf32>
    %49 = arith.divf %47, %48 : vector<2x128xf32>
    %50 = math.tanh %44 : vector<2x128xf32>
    %51 = vector.extract_strided_slice %49 {offsets = [0, 0], sizes = [2, 32], strides = [1, 1]} : vector<2x128xf32> to vector<2x32xf32>
    %52 = vector.extract_strided_slice %49 {offsets = [0, 32], sizes = [2, 32], strides = [1, 1]} : vector<2x128xf32> to vector<2x32xf32>
    %53 = vector.extract_strided_slice %50 {offsets = [0, 64], sizes = [2, 32], strides = [1, 1]} : vector<2x128xf32> to vector<2x32xf32>
    %54 = vector.extract_strided_slice %49 {offsets = [0, 96], sizes = [2, 32], strides = [1, 1]} : vector<2x128xf32> to vector<2x32xf32>
    %55 = arith.mulf %52, %40 : vector<2x32xf32>
    %56 = arith.mulf %51, %53 : vector<2x32xf32>
    %57 = arith.addf %55, %56 : vector<2x32xf32>
    %58 = math.tanh %57 : vector<2x32xf32>
    %59 = arith.mulf %54, %58 : vector<2x32xf32>
    %c0_44 = arith.constant 0 : index
    %c0_45 = arith.constant 0 : index
    %60 = vector.load %arg18[%c0_44, %c0_45] : memref<2x32xf32, #tpu.memory_space<vmem>>, vector<2x32xf32>
    tpu.vector_store %arg18[%c0_44, %c0_45], %59 {strides = array<i32>} : memref<2x32xf32, #tpu.memory_space<vmem>>, vector<2x32xf32>,
    %c0_46 = arith.constant 0 : index
    %c0_47 = arith.constant 0 : index
    %61 = vector.load %arg20[%c0_46, %c0_47] : memref<2x32xf32, #tpu.memory_space<vmem>>, vector<2x32xf32>
    tpu.vector_store %arg20[%c0_46, %c0_47], %57 {strides = array<i32>} : memref<2x32xf32, #tpu.memory_space<vmem>>, vector<2x32xf32>,
    %c2_48 = arith.constant 2 : index
    %c0_49 = arith.constant 0 : index
    %62 = vector.load %arg16[%c2_48, %c0_49] : memref<16x32xf32, #tpu.memory_space<vmem>>, vector<2x32xf32>
    tpu.vector_store %arg16[%c2_48, %c0_49], %59 {strides = array<i32>} : memref<16x32xf32, #tpu.memory_space<vmem>>, vector<2x32xf32>,
    %c0_50 = arith.constant 0 : index
    %c0_51 = arith.constant 0 : index
    %63 = vector.load %arg18[%c0_50, %c0_51] : memref<2x32xf32, #tpu.memory_space<vmem>>, vector<2x32xf32>
    %c0_52 = arith.constant 0 : index
    %c0_53 = arith.constant 0 : index
    %64 = vector.load %arg20[%c0_52, %c0_53] : memref<2x32xf32, #tpu.memory_space<vmem>>, vector<2x32xf32>
    %c4 = arith.constant 4 : index
    %c0_54 = arith.constant 0 : index
    %65 = vector.load %arg15[%c4, %c0_54] : memref<16x128xf32, #tpu.memory_space<vmem>>, vector<2x128xf32>
    %c0_55 = arith.constant 0 : index
    %c0_56 = arith.constant 0 : index
    %66 = vector.load %arg3[%c0_55, %c0_56] : memref<32x128xf32, #tpu.memory_space<vmem>>, vector<32x128xf32>
    %cst_57 = arith.constant dense<0.000000e+00> : vector<2x128xf32>
    %67 = tpu.matmul %63, %66, %cst_57 {dimension_numbers = #tpu.dot_dimension_numbers<[1], [0], [0], [1], [0, 0, 1, 1], [], []>} : vector<2x32xf32>, vector<32x128xf32>, vector<2x128xf32> -> vector<2x128xf32>
    %68 = arith.addf %65, %67 : vector<2x128xf32>
    %69 = arith.negf %68 : vector<2x128xf32>
    %70 = math.exp %69 : vector<2x128xf32>
    %cst_58 = arith.constant 1.000000e+00 : f32
    %71 = vector.broadcast %cst_58 : f32 to vector<2x128xf32>
    %72 = arith.addf %71, %70 : vector<2x128xf32>
    %73 = arith.divf %71, %72 : vector<2x128xf32>
    %74 = math.tanh %68 : vector<2x128xf32>
    %75 = vector.extract_strided_slice %73 {offsets = [0, 0], sizes = [2, 32], strides = [1, 1]} : vector<2x128xf32> to vector<2x32xf32>
    %76 = vector.extract_strided_slice %73 {offsets = [0, 32], sizes = [2, 32], strides = [1, 1]} : vector<2x128xf32> to vector<2x32xf32>
    %77 = vector.extract_strided_slice %74 {offsets = [0, 64], sizes = [2, 32], strides = [1, 1]} : vector<2x128xf32> to vector<2x32xf32>
    %78 = vector.extract_strided_slice %73 {offsets = [0, 96], sizes = [2, 32], strides = [1, 1]} : vector<2x128xf32> to vector<2x32xf32>
    %79 = arith.mulf %76, %64 : vector<2x32xf32>
    %80 = arith.mulf %75, %77 : vector<2x32xf32>
    %81 = arith.addf %79, %80 : vector<2x32xf32>
    %82 = math.tanh %81 : vector<2x32xf32>
    %83 = arith.mulf %78, %82 : vector<2x32xf32>
    %c0_59 = arith.constant 0 : index
    %c0_60 = arith.constant 0 : index
    %84 = vector.load %arg18[%c0_59, %c0_60] : memref<2x32xf32, #tpu.memory_space<vmem>>, vector<2x32xf32>
    tpu.vector_store %arg18[%c0_59, %c0_60], %83 {strides = array<i32>} : memref<2x32xf32, #tpu.memory_space<vmem>>, vector<2x32xf32>,
    %c0_61 = arith.constant 0 : index
    %c0_62 = arith.constant 0 : index
    %85 = vector.load %arg20[%c0_61, %c0_62] : memref<2x32xf32, #tpu.memory_space<vmem>>, vector<2x32xf32>
    tpu.vector_store %arg20[%c0_61, %c0_62], %81 {strides = array<i32>} : memref<2x32xf32, #tpu.memory_space<vmem>>, vector<2x32xf32>,
    %c4_63 = arith.constant 4 : index
    %c0_64 = arith.constant 0 : index
    %86 = vector.load %arg16[%c4_63, %c0_64] : memref<16x32xf32, #tpu.memory_space<vmem>>, vector<2x32xf32>
    tpu.vector_store %arg16[%c4_63, %c0_64], %83 {strides = array<i32>} : memref<16x32xf32, #tpu.memory_space<vmem>>, vector<2x32xf32>,
    %c0_65 = arith.constant 0 : index
    %c0_66 = arith.constant 0 : index
    %87 = vector.load %arg18[%c0_65, %c0_66] : memref<2x32xf32, #tpu.memory_space<vmem>>, vector<2x32xf32>
    %c0_67 = arith.constant 0 : index
    %c0_68 = arith.constant 0 : index
    %88 = vector.load %arg20[%c0_67, %c0_68] : memref<2x32xf32, #tpu.memory_space<vmem>>, vector<2x32xf32>
    %c6 = arith.constant 6 : index
    %c0_69 = arith.constant 0 : index
    %89 = vector.load %arg15[%c6, %c0_69] : memref<16x128xf32, #tpu.memory_space<vmem>>, vector<2x128xf32>
    %c0_70 = arith.constant 0 : index
    %c0_71 = arith.constant 0 : index
    %90 = vector.load %arg3[%c0_70, %c0_71] : memref<32x128xf32, #tpu.memory_space<vmem>>, vector<32x128xf32>
    %cst_72 = arith.constant dense<0.000000e+00> : vector<2x128xf32>
    %91 = tpu.matmul %87, %90, %cst_72 {dimension_numbers = #tpu.dot_dimension_numbers<[1], [0], [0], [1], [0, 0, 1, 1], [], []>} : vector<2x32xf32>, vector<32x128xf32>, vector<2x128xf32> -> vector<2x128xf32>
    %92 = arith.addf %89, %91 : vector<2x128xf32>
    %93 = arith.negf %92 : vector<2x128xf32>
    %94 = math.exp %93 : vector<2x128xf32>
    %cst_73 = arith.constant 1.000000e+00 : f32
    %95 = vector.broadcast %cst_73 : f32 to vector<2x128xf32>
    %96 = arith.addf %95, %94 : vector<2x128xf32>
    %97 = arith.divf %95, %96 : vector<2x128xf32>
    %98 = math.tanh %92 : vector<2x128xf32>
    %99 = vector.extract_strided_slice %97 {offsets = [0, 0], sizes = [2, 32], strides = [1, 1]} : vector<2x128xf32> to vector<2x32xf32>
    %100 = vector.extract_strided_slice %97 {offsets = [0, 32], sizes = [2, 32], strides = [1, 1]} : vector<2x128xf32> to vector<2x32xf32>
    %101 = vector.extract_strided_slice %98 {offsets = [0, 64], sizes = [2, 32], strides = [1, 1]} : vector<2x128xf32> to vector<2x32xf32>
    %102 = vector.extract_strided_slice %97 {offsets = [0, 96], sizes = [2, 32], strides = [1, 1]} : vector<2x128xf32> to vector<2x32xf32>
    %103 = arith.mulf %100, %88 : vector<2x32xf32>
    %104 = arith.mulf %99, %101 : vector<2x32xf32>
    %105 = arith.addf %103, %104 : vector<2x32xf32>
    %106 = math.tanh %105 : vector<2x32xf32>
    %107 = arith.mulf %102, %106 : vector<2x32xf32>
    %c0_74 = arith.constant 0 : index
    %c0_75 = arith.constant 0 : index
    %108 = vector.load %arg18[%c0_74, %c0_75] : memref<2x32xf32, #tpu.memory_space<vmem>>, vector<2x32xf32>
    tpu.vector_store %arg18[%c0_74, %c0_75], %107 {strides = array<i32>} : memref<2x32xf32, #tpu.memory_space<vmem>>, vector<2x32xf32>,
    %c0_76 = arith.constant 0 : index
    %c0_77 = arith.constant 0 : index
    %109 = vector.load %arg20[%c0_76, %c0_77] : memref<2x32xf32, #tpu.memory_space<vmem>>, vector<2x32xf32>
    tpu.vector_store %arg20[%c0_76, %c0_77], %105 {strides = array<i32>} : memref<2x32xf32, #tpu.memory_space<vmem>>, vector<2x32xf32>,
    %c6_78 = arith.constant 6 : index
    %c0_79 = arith.constant 0 : index
    %110 = vector.load %arg16[%c6_78, %c0_79] : memref<16x32xf32, #tpu.memory_space<vmem>>, vector<2x32xf32>
    tpu.vector_store %arg16[%c6_78, %c0_79], %107 {strides = array<i32>} : memref<16x32xf32, #tpu.memory_space<vmem>>, vector<2x32xf32>,
    %c0_80 = arith.constant 0 : index
    %c0_81 = arith.constant 0 : index
    %111 = vector.load %arg18[%c0_80, %c0_81] : memref<2x32xf32, #tpu.memory_space<vmem>>, vector<2x32xf32>
    %c0_82 = arith.constant 0 : index
    %c0_83 = arith.constant 0 : index
    %112 = vector.load %arg20[%c0_82, %c0_83] : memref<2x32xf32, #tpu.memory_space<vmem>>, vector<2x32xf32>
    %c8 = arith.constant 8 : index
    %c0_84 = arith.constant 0 : index
    %113 = vector.load %arg15[%c8, %c0_84] : memref<16x128xf32, #tpu.memory_space<vmem>>, vector<2x128xf32>
    %c0_85 = arith.constant 0 : index
    %c0_86 = arith.constant 0 : index
    %114 = vector.load %arg3[%c0_85, %c0_86] : memref<32x128xf32, #tpu.memory_space<vmem>>, vector<32x128xf32>
    %cst_87 = arith.constant dense<0.000000e+00> : vector<2x128xf32>
    %115 = tpu.matmul %111, %114, %cst_87 {dimension_numbers = #tpu.dot_dimension_numbers<[1], [0], [0], [1], [0, 0, 1, 1], [], []>} : vector<2x32xf32>, vector<32x128xf32>, vector<2x128xf32> -> vector<2x128xf32>
    %116 = arith.addf %113, %115 : vector<2x128xf32>
    %117 = arith.negf %116 : vector<2x128xf32>
    %118 = math.exp %117 : vector<2x128xf32>
    %cst_88 = arith.constant 1.000000e+00 : f32
    %119 = vector.broadcast %cst_88 : f32 to vector<2x128xf32>
    %120 = arith.addf %119, %118 : vector<2x128xf32>
    %121 = arith.divf %119, %120 : vector<2x128xf32>
    %122 = math.tanh %116 : vector<2x128xf32>
    %123 = vector.extract_strided_slice %121 {offsets = [0, 0], sizes = [2, 32], strides = [1, 1]} : vector<2x128xf32> to vector<2x32xf32>
    %124 = vector.extract_strided_slice %121 {offsets = [0, 32], sizes = [2, 32], strides = [1, 1]} : vector<2x128xf32> to vector<2x32xf32>
    %125 = vector.extract_strided_slice %122 {offsets = [0, 64], sizes = [2, 32], strides = [1, 1]} : vector<2x128xf32> to vector<2x32xf32>
    %126 = vector.extract_strided_slice %121 {offsets = [0, 96], sizes = [2, 32], strides = [1, 1]} : vector<2x128xf32> to vector<2x32xf32>
    %127 = arith.mulf %124, %112 : vector<2x32xf32>
    %128 = arith.mulf %123, %125 : vector<2x32xf32>
    %129 = arith.addf %127, %128 : vector<2x32xf32>
    %130 = math.tanh %129 : vector<2x32xf32>
    %131 = arith.mulf %126, %130 : vector<2x32xf32>
    %c0_89 = arith.constant 0 : index
    %c0_90 = arith.constant 0 : index
    %132 = vector.load %arg18[%c0_89, %c0_90] : memref<2x32xf32, #tpu.memory_space<vmem>>, vector<2x32xf32>
    tpu.vector_store %arg18[%c0_89, %c0_90], %131 {strides = array<i32>} : memref<2x32xf32, #tpu.memory_space<vmem>>, vector<2x32xf32>,
    %c0_91 = arith.constant 0 : index
    %c0_92 = arith.constant 0 : index
    %133 = vector.load %arg20[%c0_91, %c0_92] : memref<2x32xf32, #tpu.memory_space<vmem>>, vector<2x32xf32>
    tpu.vector_store %arg20[%c0_91, %c0_92], %129 {strides = array<i32>} : memref<2x32xf32, #tpu.memory_space<vmem>>, vector<2x32xf32>,
    %c8_93 = arith.constant 8 : index
    %c0_94 = arith.constant 0 : index
    %134 = vector.load %arg16[%c8_93, %c0_94] : memref<16x32xf32, #tpu.memory_space<vmem>>, vector<2x32xf32>
    tpu.vector_store %arg16[%c8_93, %c0_94], %131 {strides = array<i32>} : memref<16x32xf32, #tpu.memory_space<vmem>>, vector<2x32xf32>,
    %c0_95 = arith.constant 0 : index
    %c0_96 = arith.constant 0 : index
    %135 = vector.load %arg18[%c0_95, %c0_96] : memref<2x32xf32, #tpu.memory_space<vmem>>, vector<2x32xf32>
    %c0_97 = arith.constant 0 : index
    %c0_98 = arith.constant 0 : index
    %136 = vector.load %arg20[%c0_97, %c0_98] : memref<2x32xf32, #tpu.memory_space<vmem>>, vector<2x32xf32>
    %c10 = arith.constant 10 : index
    %c0_99 = arith.constant 0 : index
    %137 = vector.load %arg15[%c10, %c0_99] : memref<16x128xf32, #tpu.memory_space<vmem>>, vector<2x128xf32>
    %c0_100 = arith.constant 0 : index
    %c0_101 = arith.constant 0 : index
    %138 = vector.load %arg3[%c0_100, %c0_101] : memref<32x128xf32, #tpu.memory_space<vmem>>, vector<32x128xf32>
    %cst_102 = arith.constant dense<0.000000e+00> : vector<2x128xf32>
    %139 = tpu.matmul %135, %138, %cst_102 {dimension_numbers = #tpu.dot_dimension_numbers<[1], [0], [0], [1], [0, 0, 1, 1], [], []>} : vector<2x32xf32>, vector<32x128xf32>, vector<2x128xf32> -> vector<2x128xf32>
    %140 = arith.addf %137, %139 : vector<2x128xf32>
    %141 = arith.negf %140 : vector<2x128xf32>
    %142 = math.exp %141 : vector<2x128xf32>
    %cst_103 = arith.constant 1.000000e+00 : f32
    %143 = vector.broadcast %cst_103 : f32 to vector<2x128xf32>
    %144 = arith.addf %143, %142 : vector<2x128xf32>
    %145 = arith.divf %143, %144 : vector<2x128xf32>
    %146 = math.tanh %140 : vector<2x128xf32>
    %147 = vector.extract_strided_slice %145 {offsets = [0, 0], sizes = [2, 32], strides = [1, 1]} : vector<2x128xf32> to vector<2x32xf32>
    %148 = vector.extract_strided_slice %145 {offsets = [0, 32], sizes = [2, 32], strides = [1, 1]} : vector<2x128xf32> to vector<2x32xf32>
    %149 = vector.extract_strided_slice %146 {offsets = [0, 64], sizes = [2, 32], strides = [1, 1]} : vector<2x128xf32> to vector<2x32xf32>
    %150 = vector.extract_strided_slice %145 {offsets = [0, 96], sizes = [2, 32], strides = [1, 1]} : vector<2x128xf32> to vector<2x32xf32>
    %151 = arith.mulf %148, %136 : vector<2x32xf32>
    %152 = arith.mulf %147, %149 : vector<2x32xf32>
    %153 = arith.addf %151, %152 : vector<2x32xf32>
    %154 = math.tanh %153 : vector<2x32xf32>
    %155 = arith.mulf %150, %154 : vector<2x32xf32>
    %c0_104 = arith.constant 0 : index
    %c0_105 = arith.constant 0 : index
    %156 = vector.load %arg18[%c0_104, %c0_105] : memref<2x32xf32, #tpu.memory_space<vmem>>, vector<2x32xf32>
    tpu.vector_store %arg18[%c0_104, %c0_105], %155 {strides = array<i32>} : memref<2x32xf32, #tpu.memory_space<vmem>>, vector<2x32xf32>,
    %c0_106 = arith.constant 0 : index
    %c0_107 = arith.constant 0 : index
    %157 = vector.load %arg20[%c0_106, %c0_107] : memref<2x32xf32, #tpu.memory_space<vmem>>, vector<2x32xf32>
    tpu.vector_store %arg20[%c0_106, %c0_107], %153 {strides = array<i32>} : memref<2x32xf32, #tpu.memory_space<vmem>>, vector<2x32xf32>,
    %c10_108 = arith.constant 10 : index
    %c0_109 = arith.constant 0 : index
    %158 = vector.load %arg16[%c10_108, %c0_109] : memref<16x32xf32, #tpu.memory_space<vmem>>, vector<2x32xf32>
    tpu.vector_store %arg16[%c10_108, %c0_109], %155 {strides = array<i32>} : memref<16x32xf32, #tpu.memory_space<vmem>>, vector<2x32xf32>,
    %c0_110 = arith.constant 0 : index
    %c0_111 = arith.constant 0 : index
    %159 = vector.load %arg18[%c0_110, %c0_111] : memref<2x32xf32, #tpu.memory_space<vmem>>, vector<2x32xf32>
    %c0_112 = arith.constant 0 : index
    %c0_113 = arith.constant 0 : index
    %160 = vector.load %arg20[%c0_112, %c0_113] : memref<2x32xf32, #tpu.memory_space<vmem>>, vector<2x32xf32>
    %c12 = arith.constant 12 : index
    %c0_114 = arith.constant 0 : index
    %161 = vector.load %arg15[%c12, %c0_114] : memref<16x128xf32, #tpu.memory_space<vmem>>, vector<2x128xf32>
    %c0_115 = arith.constant 0 : index
    %c0_116 = arith.constant 0 : index
    %162 = vector.load %arg3[%c0_115, %c0_116] : memref<32x128xf32, #tpu.memory_space<vmem>>, vector<32x128xf32>
    %cst_117 = arith.constant dense<0.000000e+00> : vector<2x128xf32>
    %163 = tpu.matmul %159, %162, %cst_117 {dimension_numbers = #tpu.dot_dimension_numbers<[1], [0], [0], [1], [0, 0, 1, 1], [], []>} : vector<2x32xf32>, vector<32x128xf32>, vector<2x128xf32> -> vector<2x128xf32>
    %164 = arith.addf %161, %163 : vector<2x128xf32>
    %165 = arith.negf %164 : vector<2x128xf32>
    %166 = math.exp %165 : vector<2x128xf32>
    %cst_118 = arith.constant 1.000000e+00 : f32
    %167 = vector.broadcast %cst_118 : f32 to vector<2x128xf32>
    %168 = arith.addf %167, %166 : vector<2x128xf32>
    %169 = arith.divf %167, %168 : vector<2x128xf32>
    %170 = math.tanh %164 : vector<2x128xf32>
    %171 = vector.extract_strided_slice %169 {offsets = [0, 0], sizes = [2, 32], strides = [1, 1]} : vector<2x128xf32> to vector<2x32xf32>
    %172 = vector.extract_strided_slice %169 {offsets = [0, 32], sizes = [2, 32], strides = [1, 1]} : vector<2x128xf32> to vector<2x32xf32>
    %173 = vector.extract_strided_slice %170 {offsets = [0, 64], sizes = [2, 32], strides = [1, 1]} : vector<2x128xf32> to vector<2x32xf32>
    %174 = vector.extract_strided_slice %169 {offsets = [0, 96], sizes = [2, 32], strides = [1, 1]} : vector<2x128xf32> to vector<2x32xf32>
    %175 = arith.mulf %172, %160 : vector<2x32xf32>
    %176 = arith.mulf %171, %173 : vector<2x32xf32>
    %177 = arith.addf %175, %176 : vector<2x32xf32>
    %178 = math.tanh %177 : vector<2x32xf32>
    %179 = arith.mulf %174, %178 : vector<2x32xf32>
    %c0_119 = arith.constant 0 : index
    %c0_120 = arith.constant 0 : index
    %180 = vector.load %arg18[%c0_119, %c0_120] : memref<2x32xf32, #tpu.memory_space<vmem>>, vector<2x32xf32>
    tpu.vector_store %arg18[%c0_119, %c0_120], %179 {strides = array<i32>} : memref<2x32xf32, #tpu.memory_space<vmem>>, vector<2x32xf32>,
    %c0_121 = arith.constant 0 : index
    %c0_122 = arith.constant 0 : index
    %181 = vector.load %arg20[%c0_121, %c0_122] : memref<2x32xf32, #tpu.memory_space<vmem>>, vector<2x32xf32>
    tpu.vector_store %arg20[%c0_121, %c0_122], %177 {strides = array<i32>} : memref<2x32xf32, #tpu.memory_space<vmem>>, vector<2x32xf32>,
    %c12_123 = arith.constant 12 : index
    %c0_124 = arith.constant 0 : index
    %182 = vector.load %arg16[%c12_123, %c0_124] : memref<16x32xf32, #tpu.memory_space<vmem>>, vector<2x32xf32>
    tpu.vector_store %arg16[%c12_123, %c0_124], %179 {strides = array<i32>} : memref<16x32xf32, #tpu.memory_space<vmem>>, vector<2x32xf32>,
    %c0_125 = arith.constant 0 : index
    %c0_126 = arith.constant 0 : index
    %183 = vector.load %arg18[%c0_125, %c0_126] : memref<2x32xf32, #tpu.memory_space<vmem>>, vector<2x32xf32>
    %c0_127 = arith.constant 0 : index
    %c0_128 = arith.constant 0 : index
    %184 = vector.load %arg20[%c0_127, %c0_128] : memref<2x32xf32, #tpu.memory_space<vmem>>, vector<2x32xf32>
    %c14 = arith.constant 14 : index
    %c0_129 = arith.constant 0 : index
    %185 = vector.load %arg15[%c14, %c0_129] : memref<16x128xf32, #tpu.memory_space<vmem>>, vector<2x128xf32>
    %c0_130 = arith.constant 0 : index
    %c0_131 = arith.constant 0 : index
    %186 = vector.load %arg3[%c0_130, %c0_131] : memref<32x128xf32, #tpu.memory_space<vmem>>, vector<32x128xf32>
    %cst_132 = arith.constant dense<0.000000e+00> : vector<2x128xf32>
    %187 = tpu.matmul %183, %186, %cst_132 {dimension_numbers = #tpu.dot_dimension_numbers<[1], [0], [0], [1], [0, 0, 1, 1], [], []>} : vector<2x32xf32>, vector<32x128xf32>, vector<2x128xf32> -> vector<2x128xf32>
    %188 = arith.addf %185, %187 : vector<2x128xf32>
    %189 = arith.negf %188 : vector<2x128xf32>
    %190 = math.exp %189 : vector<2x128xf32>
    %cst_133 = arith.constant 1.000000e+00 : f32
    %191 = vector.broadcast %cst_133 : f32 to vector<2x128xf32>
    %192 = arith.addf %191, %190 : vector<2x128xf32>
    %193 = arith.divf %191, %192 : vector<2x128xf32>
    %194 = math.tanh %188 : vector<2x128xf32>
    %195 = vector.extract_strided_slice %193 {offsets = [0, 0], sizes = [2, 32], strides = [1, 1]} : vector<2x128xf32> to vector<2x32xf32>
    %196 = vector.extract_strided_slice %193 {offsets = [0, 32], sizes = [2, 32], strides = [1, 1]} : vector<2x128xf32> to vector<2x32xf32>
    %197 = vector.extract_strided_slice %194 {offsets = [0, 64], sizes = [2, 32], strides = [1, 1]} : vector<2x128xf32> to vector<2x32xf32>
    %198 = vector.extract_strided_slice %193 {offsets = [0, 96], sizes = [2, 32], strides = [1, 1]} : vector<2x128xf32> to vector<2x32xf32>
    %199 = arith.mulf %196, %184 : vector<2x32xf32>
    %200 = arith.mulf %195, %197 : vector<2x32xf32>
    %201 = arith.addf %199, %200 : vector<2x32xf32>
    %202 = math.tanh %201 : vector<2x32xf32>
    %203 = arith.mulf %198, %202 : vector<2x32xf32>
    %c0_134 = arith.constant 0 : index
    %c0_135 = arith.constant 0 : index
    %204 = vector.load %arg18[%c0_134, %c0_135] : memref<2x32xf32, #tpu.memory_space<vmem>>, vector<2x32xf32>
    tpu.vector_store %arg18[%c0_134, %c0_135], %203 {strides = array<i32>} : memref<2x32xf32, #tpu.memory_space<vmem>>, vector<2x32xf32>,
    %c0_136 = arith.constant 0 : index
    %c0_137 = arith.constant 0 : index
    %205 = vector.load %arg20[%c0_136, %c0_137] : memref<2x32xf32, #tpu.memory_space<vmem>>, vector<2x32xf32>
    tpu.vector_store %arg20[%c0_136, %c0_137], %201 {strides = array<i32>} : memref<2x32xf32, #tpu.memory_space<vmem>>, vector<2x32xf32>,
    %c14_138 = arith.constant 14 : index
    %c0_139 = arith.constant 0 : index
    %206 = vector.load %arg16[%c14_138, %c0_139] : memref<16x32xf32, #tpu.memory_space<vmem>>, vector<2x32xf32>
    tpu.vector_store %arg16[%c14_138, %c0_139], %203 {strides = array<i32>} : memref<16x32xf32, #tpu.memory_space<vmem>>, vector<2x32xf32>,
    %c0_140 = arith.constant 0 : index
    %c0_141 = arith.constant 0 : index
    %207 = vector.load %arg16[%c0_140, %c0_141] : memref<16x32xf32, #tpu.memory_space<vmem>>, vector<16x32xf32>
    %c0_142 = arith.constant 0 : index
    %c0_143 = arith.constant 0 : index
    %208 = vector.load %arg5[%c0_142, %c0_143] : memref<32x128xf32, #tpu.memory_space<vmem>>, vector<32x128xf32>
    %cst_144 = arith.constant dense<0.000000e+00> : vector<16x128xf32>
    %209 = tpu.matmul %207, %208, %cst_144 {dimension_numbers = #tpu.dot_dimension_numbers<[1], [0], [0], [1], [0, 0, 1, 1], [], []>} : vector<16x32xf32>, vector<32x128xf32>, vector<16x128xf32> -> vector<16x128xf32>
    %c0_145 = arith.constant 0 : index
    %c0_146 = arith.constant 0 : index
    %210 = vector.load %arg7[%c0_145, %c0_146] : memref<1x128xf32, #tpu.memory_space<vmem>>, vector<1x128xf32>
    %211 = vector.broadcast %210 : vector<1x128xf32> to vector<16x128xf32>
    %212 = arith.addf %209, %211 : vector<16x128xf32>
    %c0_147 = arith.constant 0 : index
    %c0_148 = arith.constant 0 : index
    %213 = vector.load %arg15[%c0_147, %c0_148] : memref<16x128xf32, #tpu.memory_space<vmem>>, vector<16x128xf32>
    tpu.vector_store %arg15[%c0_147, %c0_148], %212 {strides = array<i32>} : memref<16x128xf32, #tpu.memory_space<vmem>>, vector<16x128xf32>,
    %c0_149 = arith.constant 0 : index
    %c0_150 = arith.constant 0 : index
    %214 = vector.load %arg19[%c0_149, %c0_150] : memref<2x32xf32, #tpu.memory_space<vmem>>, vector<2x32xf32>
    %c0_151 = arith.constant 0 : index
    %c0_152 = arith.constant 0 : index
    %215 = vector.load %arg21[%c0_151, %c0_152] : memref<2x32xf32, #tpu.memory_space<vmem>>, vector<2x32xf32>
    %c0_153 = arith.constant 0 : index
    %c0_154 = arith.constant 0 : index
    %216 = vector.load %arg15[%c0_153, %c0_154] : memref<16x128xf32, #tpu.memory_space<vmem>>, vector<2x128xf32>
    %c0_155 = arith.constant 0 : index
    %c0_156 = arith.constant 0 : index
    %217 = vector.load %arg6[%c0_155, %c0_156] : memref<32x128xf32, #tpu.memory_space<vmem>>, vector<32x128xf32>
    %cst_157 = arith.constant dense<0.000000e+00> : vector<2x128xf32>
    %218 = tpu.matmul %214, %217, %cst_157 {dimension_numbers = #tpu.dot_dimension_numbers<[1], [0], [0], [1], [0, 0, 1, 1], [], []>} : vector<2x32xf32>, vector<32x128xf32>, vector<2x128xf32> -> vector<2x128xf32>
    %219 = arith.addf %216, %218 : vector<2x128xf32>
    %220 = arith.negf %219 : vector<2x128xf32>
    %221 = math.exp %220 : vector<2x128xf32>
    %cst_158 = arith.constant 1.000000e+00 : f32
    %222 = vector.broadcast %cst_158 : f32 to vector<2x128xf32>
    %223 = arith.addf %222, %221 : vector<2x128xf32>
    %224 = arith.divf %222, %223 : vector<2x128xf32>
    %225 = math.tanh %219 : vector<2x128xf32>
    %226 = vector.extract_strided_slice %224 {offsets = [0, 0], sizes = [2, 32], strides = [1, 1]} : vector<2x128xf32> to vector<2x32xf32>
    %227 = vector.extract_strided_slice %224 {offsets = [0, 32], sizes = [2, 32], strides = [1, 1]} : vector<2x128xf32> to vector<2x32xf32>
    %228 = vector.extract_strided_slice %225 {offsets = [0, 64], sizes = [2, 32], strides = [1, 1]} : vector<2x128xf32> to vector<2x32xf32>
    %229 = vector.extract_strided_slice %224 {offsets = [0, 96], sizes = [2, 32], strides = [1, 1]} : vector<2x128xf32> to vector<2x32xf32>
    %230 = arith.mulf %227, %215 : vector<2x32xf32>
    %231 = arith.mulf %226, %228 : vector<2x32xf32>
    %232 = arith.addf %230, %231 : vector<2x32xf32>
    %233 = math.tanh %232 : vector<2x32xf32>
    %234 = arith.mulf %229, %233 : vector<2x32xf32>
    %c0_159 = arith.constant 0 : index
    %c0_160 = arith.constant 0 : index
    %235 = vector.load %arg19[%c0_159, %c0_160] : memref<2x32xf32, #tpu.memory_space<vmem>>, vector<2x32xf32>
    tpu.vector_store %arg19[%c0_159, %c0_160], %234 {strides = array<i32>} : memref<2x32xf32, #tpu.memory_space<vmem>>, vector<2x32xf32>,
    %c0_161 = arith.constant 0 : index
    %c0_162 = arith.constant 0 : index
    %236 = vector.load %arg21[%c0_161, %c0_162] : memref<2x32xf32, #tpu.memory_space<vmem>>, vector<2x32xf32>
    tpu.vector_store %arg21[%c0_161, %c0_162], %232 {strides = array<i32>} : memref<2x32xf32, #tpu.memory_space<vmem>>, vector<2x32xf32>,
    %c0_163 = arith.constant 0 : index
    %c0_164 = arith.constant 0 : index
    %237 = vector.load %arg19[%c0_163, %c0_164] : memref<2x32xf32, #tpu.memory_space<vmem>>, vector<2x32xf32>
    %c0_165 = arith.constant 0 : index
    %c0_166 = arith.constant 0 : index
    %238 = vector.load %arg21[%c0_165, %c0_166] : memref<2x32xf32, #tpu.memory_space<vmem>>, vector<2x32xf32>
    %c2_167 = arith.constant 2 : index
    %c0_168 = arith.constant 0 : index
    %239 = vector.load %arg15[%c2_167, %c0_168] : memref<16x128xf32, #tpu.memory_space<vmem>>, vector<2x128xf32>
    %c0_169 = arith.constant 0 : index
    %c0_170 = arith.constant 0 : index
    %240 = vector.load %arg6[%c0_169, %c0_170] : memref<32x128xf32, #tpu.memory_space<vmem>>, vector<32x128xf32>
    %cst_171 = arith.constant dense<0.000000e+00> : vector<2x128xf32>
    %241 = tpu.matmul %237, %240, %cst_171 {dimension_numbers = #tpu.dot_dimension_numbers<[1], [0], [0], [1], [0, 0, 1, 1], [], []>} : vector<2x32xf32>, vector<32x128xf32>, vector<2x128xf32> -> vector<2x128xf32>
    %242 = arith.addf %239, %241 : vector<2x128xf32>
    %243 = arith.negf %242 : vector<2x128xf32>
    %244 = math.exp %243 : vector<2x128xf32>
    %cst_172 = arith.constant 1.000000e+00 : f32
    %245 = vector.broadcast %cst_172 : f32 to vector<2x128xf32>
    %246 = arith.addf %245, %244 : vector<2x128xf32>
    %247 = arith.divf %245, %246 : vector<2x128xf32>
    %248 = math.tanh %242 : vector<2x128xf32>
    %249 = vector.extract_strided_slice %247 {offsets = [0, 0], sizes = [2, 32], strides = [1, 1]} : vector<2x128xf32> to vector<2x32xf32>
    %250 = vector.extract_strided_slice %247 {offsets = [0, 32], sizes = [2, 32], strides = [1, 1]} : vector<2x128xf32> to vector<2x32xf32>
    %251 = vector.extract_strided_slice %248 {offsets = [0, 64], sizes = [2, 32], strides = [1, 1]} : vector<2x128xf32> to vector<2x32xf32>
    %252 = vector.extract_strided_slice %247 {offsets = [0, 96], sizes = [2, 32], strides = [1, 1]} : vector<2x128xf32> to vector<2x32xf32>
    %253 = arith.mulf %250, %238 : vector<2x32xf32>
    %254 = arith.mulf %249, %251 : vector<2x32xf32>
    %255 = arith.addf %253, %254 : vector<2x32xf32>
    %256 = math.tanh %255 : vector<2x32xf32>
    %257 = arith.mulf %252, %256 : vector<2x32xf32>
    %c0_173 = arith.constant 0 : index
    %c0_174 = arith.constant 0 : index
    %258 = vector.load %arg19[%c0_173, %c0_174] : memref<2x32xf32, #tpu.memory_space<vmem>>, vector<2x32xf32>
    tpu.vector_store %arg19[%c0_173, %c0_174], %257 {strides = array<i32>} : memref<2x32xf32, #tpu.memory_space<vmem>>, vector<2x32xf32>,
    %c0_175 = arith.constant 0 : index
    %c0_176 = arith.constant 0 : index
    %259 = vector.load %arg21[%c0_175, %c0_176] : memref<2x32xf32, #tpu.memory_space<vmem>>, vector<2x32xf32>
    tpu.vector_store %arg21[%c0_175, %c0_176], %255 {strides = array<i32>} : memref<2x32xf32, #tpu.memory_space<vmem>>, vector<2x32xf32>,
    %c0_177 = arith.constant 0 : index
    %c0_178 = arith.constant 0 : index
    %260 = vector.load %arg19[%c0_177, %c0_178] : memref<2x32xf32, #tpu.memory_space<vmem>>, vector<2x32xf32>
    %c0_179 = arith.constant 0 : index
    %c0_180 = arith.constant 0 : index
    %261 = vector.load %arg21[%c0_179, %c0_180] : memref<2x32xf32, #tpu.memory_space<vmem>>, vector<2x32xf32>
    %c4_181 = arith.constant 4 : index
    %c0_182 = arith.constant 0 : index
    %262 = vector.load %arg15[%c4_181, %c0_182] : memref<16x128xf32, #tpu.memory_space<vmem>>, vector<2x128xf32>
    %c0_183 = arith.constant 0 : index
    %c0_184 = arith.constant 0 : index
    %263 = vector.load %arg6[%c0_183, %c0_184] : memref<32x128xf32, #tpu.memory_space<vmem>>, vector<32x128xf32>
    %cst_185 = arith.constant dense<0.000000e+00> : vector<2x128xf32>
    %264 = tpu.matmul %260, %263, %cst_185 {dimension_numbers = #tpu.dot_dimension_numbers<[1], [0], [0], [1], [0, 0, 1, 1], [], []>} : vector<2x32xf32>, vector<32x128xf32>, vector<2x128xf32> -> vector<2x128xf32>
    %265 = arith.addf %262, %264 : vector<2x128xf32>
    %266 = arith.negf %265 : vector<2x128xf32>
    %267 = math.exp %266 : vector<2x128xf32>
    %cst_186 = arith.constant 1.000000e+00 : f32
    %268 = vector.broadcast %cst_186 : f32 to vector<2x128xf32>
    %269 = arith.addf %268, %267 : vector<2x128xf32>
    %270 = arith.divf %268, %269 : vector<2x128xf32>
    %271 = math.tanh %265 : vector<2x128xf32>
    %272 = vector.extract_strided_slice %270 {offsets = [0, 0], sizes = [2, 32], strides = [1, 1]} : vector<2x128xf32> to vector<2x32xf32>
    %273 = vector.extract_strided_slice %270 {offsets = [0, 32], sizes = [2, 32], strides = [1, 1]} : vector<2x128xf32> to vector<2x32xf32>
    %274 = vector.extract_strided_slice %271 {offsets = [0, 64], sizes = [2, 32], strides = [1, 1]} : vector<2x128xf32> to vector<2x32xf32>
    %275 = vector.extract_strided_slice %270 {offsets = [0, 96], sizes = [2, 32], strides = [1, 1]} : vector<2x128xf32> to vector<2x32xf32>
    %276 = arith.mulf %273, %261 : vector<2x32xf32>
    %277 = arith.mulf %272, %274 : vector<2x32xf32>
    %278 = arith.addf %276, %277 : vector<2x32xf32>
    %279 = math.tanh %278 : vector<2x32xf32>
    %280 = arith.mulf %275, %279 : vector<2x32xf32>
    %c0_187 = arith.constant 0 : index
    %c0_188 = arith.constant 0 : index
    %281 = vector.load %arg19[%c0_187, %c0_188] : memref<2x32xf32, #tpu.memory_space<vmem>>, vector<2x32xf32>
    tpu.vector_store %arg19[%c0_187, %c0_188], %280 {strides = array<i32>} : memref<2x32xf32, #tpu.memory_space<vmem>>, vector<2x32xf32>,
    %c0_189 = arith.constant 0 : index
    %c0_190 = arith.constant 0 : index
    %282 = vector.load %arg21[%c0_189, %c0_190] : memref<2x32xf32, #tpu.memory_space<vmem>>, vector<2x32xf32>
    tpu.vector_store %arg21[%c0_189, %c0_190], %278 {strides = array<i32>} : memref<2x32xf32, #tpu.memory_space<vmem>>, vector<2x32xf32>,
    %c0_191 = arith.constant 0 : index
    %c0_192 = arith.constant 0 : index
    %283 = vector.load %arg19[%c0_191, %c0_192] : memref<2x32xf32, #tpu.memory_space<vmem>>, vector<2x32xf32>
    %c0_193 = arith.constant 0 : index
    %c0_194 = arith.constant 0 : index
    %284 = vector.load %arg21[%c0_193, %c0_194] : memref<2x32xf32, #tpu.memory_space<vmem>>, vector<2x32xf32>
    %c6_195 = arith.constant 6 : index
    %c0_196 = arith.constant 0 : index
    %285 = vector.load %arg15[%c6_195, %c0_196] : memref<16x128xf32, #tpu.memory_space<vmem>>, vector<2x128xf32>
    %c0_197 = arith.constant 0 : index
    %c0_198 = arith.constant 0 : index
    %286 = vector.load %arg6[%c0_197, %c0_198] : memref<32x128xf32, #tpu.memory_space<vmem>>, vector<32x128xf32>
    %cst_199 = arith.constant dense<0.000000e+00> : vector<2x128xf32>
    %287 = tpu.matmul %283, %286, %cst_199 {dimension_numbers = #tpu.dot_dimension_numbers<[1], [0], [0], [1], [0, 0, 1, 1], [], []>} : vector<2x32xf32>, vector<32x128xf32>, vector<2x128xf32> -> vector<2x128xf32>
    %288 = arith.addf %285, %287 : vector<2x128xf32>
    %289 = arith.negf %288 : vector<2x128xf32>
    %290 = math.exp %289 : vector<2x128xf32>
    %cst_200 = arith.constant 1.000000e+00 : f32
    %291 = vector.broadcast %cst_200 : f32 to vector<2x128xf32>
    %292 = arith.addf %291, %290 : vector<2x128xf32>
    %293 = arith.divf %291, %292 : vector<2x128xf32>
    %294 = math.tanh %288 : vector<2x128xf32>
    %295 = vector.extract_strided_slice %293 {offsets = [0, 0], sizes = [2, 32], strides = [1, 1]} : vector<2x128xf32> to vector<2x32xf32>
    %296 = vector.extract_strided_slice %293 {offsets = [0, 32], sizes = [2, 32], strides = [1, 1]} : vector<2x128xf32> to vector<2x32xf32>
    %297 = vector.extract_strided_slice %294 {offsets = [0, 64], sizes = [2, 32], strides = [1, 1]} : vector<2x128xf32> to vector<2x32xf32>
    %298 = vector.extract_strided_slice %293 {offsets = [0, 96], sizes = [2, 32], strides = [1, 1]} : vector<2x128xf32> to vector<2x32xf32>
    %299 = arith.mulf %296, %284 : vector<2x32xf32>
    %300 = arith.mulf %295, %297 : vector<2x32xf32>
    %301 = arith.addf %299, %300 : vector<2x32xf32>
    %302 = math.tanh %301 : vector<2x32xf32>
    %303 = arith.mulf %298, %302 : vector<2x32xf32>
    %c0_201 = arith.constant 0 : index
    %c0_202 = arith.constant 0 : index
    %304 = vector.load %arg19[%c0_201, %c0_202] : memref<2x32xf32, #tpu.memory_space<vmem>>, vector<2x32xf32>
    tpu.vector_store %arg19[%c0_201, %c0_202], %303 {strides = array<i32>} : memref<2x32xf32, #tpu.memory_space<vmem>>, vector<2x32xf32>,
    %c0_203 = arith.constant 0 : index
    %c0_204 = arith.constant 0 : index
    %305 = vector.load %arg21[%c0_203, %c0_204] : memref<2x32xf32, #tpu.memory_space<vmem>>, vector<2x32xf32>
    tpu.vector_store %arg21[%c0_203, %c0_204], %301 {strides = array<i32>} : memref<2x32xf32, #tpu.memory_space<vmem>>, vector<2x32xf32>,
    %c0_205 = arith.constant 0 : index
    %c0_206 = arith.constant 0 : index
    %306 = vector.load %arg19[%c0_205, %c0_206] : memref<2x32xf32, #tpu.memory_space<vmem>>, vector<2x32xf32>
    %c0_207 = arith.constant 0 : index
    %c0_208 = arith.constant 0 : index
    %307 = vector.load %arg21[%c0_207, %c0_208] : memref<2x32xf32, #tpu.memory_space<vmem>>, vector<2x32xf32>
    %c8_209 = arith.constant 8 : index
    %c0_210 = arith.constant 0 : index
    %308 = vector.load %arg15[%c8_209, %c0_210] : memref<16x128xf32, #tpu.memory_space<vmem>>, vector<2x128xf32>
    %c0_211 = arith.constant 0 : index
    %c0_212 = arith.constant 0 : index
    %309 = vector.load %arg6[%c0_211, %c0_212] : memref<32x128xf32, #tpu.memory_space<vmem>>, vector<32x128xf32>
    %cst_213 = arith.constant dense<0.000000e+00> : vector<2x128xf32>
    %310 = tpu.matmul %306, %309, %cst_213 {dimension_numbers = #tpu.dot_dimension_numbers<[1], [0], [0], [1], [0, 0, 1, 1], [], []>} : vector<2x32xf32>, vector<32x128xf32>, vector<2x128xf32> -> vector<2x128xf32>
    %311 = arith.addf %308, %310 : vector<2x128xf32>
    %312 = arith.negf %311 : vector<2x128xf32>
    %313 = math.exp %312 : vector<2x128xf32>
    %cst_214 = arith.constant 1.000000e+00 : f32
    %314 = vector.broadcast %cst_214 : f32 to vector<2x128xf32>
    %315 = arith.addf %314, %313 : vector<2x128xf32>
    %316 = arith.divf %314, %315 : vector<2x128xf32>
    %317 = math.tanh %311 : vector<2x128xf32>
    %318 = vector.extract_strided_slice %316 {offsets = [0, 0], sizes = [2, 32], strides = [1, 1]} : vector<2x128xf32> to vector<2x32xf32>
    %319 = vector.extract_strided_slice %316 {offsets = [0, 32], sizes = [2, 32], strides = [1, 1]} : vector<2x128xf32> to vector<2x32xf32>
    %320 = vector.extract_strided_slice %317 {offsets = [0, 64], sizes = [2, 32], strides = [1, 1]} : vector<2x128xf32> to vector<2x32xf32>
    %321 = vector.extract_strided_slice %316 {offsets = [0, 96], sizes = [2, 32], strides = [1, 1]} : vector<2x128xf32> to vector<2x32xf32>
    %322 = arith.mulf %319, %307 : vector<2x32xf32>
    %323 = arith.mulf %318, %320 : vector<2x32xf32>
    %324 = arith.addf %322, %323 : vector<2x32xf32>
    %325 = math.tanh %324 : vector<2x32xf32>
    %326 = arith.mulf %321, %325 : vector<2x32xf32>
    %c0_215 = arith.constant 0 : index
    %c0_216 = arith.constant 0 : index
    %327 = vector.load %arg19[%c0_215, %c0_216] : memref<2x32xf32, #tpu.memory_space<vmem>>, vector<2x32xf32>
    tpu.vector_store %arg19[%c0_215, %c0_216], %326 {strides = array<i32>} : memref<2x32xf32, #tpu.memory_space<vmem>>, vector<2x32xf32>,
    %c0_217 = arith.constant 0 : index
    %c0_218 = arith.constant 0 : index
    %328 = vector.load %arg21[%c0_217, %c0_218] : memref<2x32xf32, #tpu.memory_space<vmem>>, vector<2x32xf32>
    tpu.vector_store %arg21[%c0_217, %c0_218], %324 {strides = array<i32>} : memref<2x32xf32, #tpu.memory_space<vmem>>, vector<2x32xf32>,
    %c0_219 = arith.constant 0 : index
    %c0_220 = arith.constant 0 : index
    %329 = vector.load %arg19[%c0_219, %c0_220] : memref<2x32xf32, #tpu.memory_space<vmem>>, vector<2x32xf32>
    %c0_221 = arith.constant 0 : index
    %c0_222 = arith.constant 0 : index
    %330 = vector.load %arg21[%c0_221, %c0_222] : memref<2x32xf32, #tpu.memory_space<vmem>>, vector<2x32xf32>
    %c10_223 = arith.constant 10 : index
    %c0_224 = arith.constant 0 : index
    %331 = vector.load %arg15[%c10_223, %c0_224] : memref<16x128xf32, #tpu.memory_space<vmem>>, vector<2x128xf32>
    %c0_225 = arith.constant 0 : index
    %c0_226 = arith.constant 0 : index
    %332 = vector.load %arg6[%c0_225, %c0_226] : memref<32x128xf32, #tpu.memory_space<vmem>>, vector<32x128xf32>
    %cst_227 = arith.constant dense<0.000000e+00> : vector<2x128xf32>
    %333 = tpu.matmul %329, %332, %cst_227 {dimension_numbers = #tpu.dot_dimension_numbers<[1], [0], [0], [1], [0, 0, 1, 1], [], []>} : vector<2x32xf32>, vector<32x128xf32>, vector<2x128xf32> -> vector<2x128xf32>
    %334 = arith.addf %331, %333 : vector<2x128xf32>
    %335 = arith.negf %334 : vector<2x128xf32>
    %336 = math.exp %335 : vector<2x128xf32>
    %cst_228 = arith.constant 1.000000e+00 : f32
    %337 = vector.broadcast %cst_228 : f32 to vector<2x128xf32>
    %338 = arith.addf %337, %336 : vector<2x128xf32>
    %339 = arith.divf %337, %338 : vector<2x128xf32>
    %340 = math.tanh %334 : vector<2x128xf32>
    %341 = vector.extract_strided_slice %339 {offsets = [0, 0], sizes = [2, 32], strides = [1, 1]} : vector<2x128xf32> to vector<2x32xf32>
    %342 = vector.extract_strided_slice %339 {offsets = [0, 32], sizes = [2, 32], strides = [1, 1]} : vector<2x128xf32> to vector<2x32xf32>
    %343 = vector.extract_strided_slice %340 {offsets = [0, 64], sizes = [2, 32], strides = [1, 1]} : vector<2x128xf32> to vector<2x32xf32>
    %344 = vector.extract_strided_slice %339 {offsets = [0, 96], sizes = [2, 32], strides = [1, 1]} : vector<2x128xf32> to vector<2x32xf32>
    %345 = arith.mulf %342, %330 : vector<2x32xf32>
    %346 = arith.mulf %341, %343 : vector<2x32xf32>
    %347 = arith.addf %345, %346 : vector<2x32xf32>
    %348 = math.tanh %347 : vector<2x32xf32>
    %349 = arith.mulf %344, %348 : vector<2x32xf32>
    %c0_229 = arith.constant 0 : index
    %c0_230 = arith.constant 0 : index
    %350 = vector.load %arg19[%c0_229, %c0_230] : memref<2x32xf32, #tpu.memory_space<vmem>>, vector<2x32xf32>
    tpu.vector_store %arg19[%c0_229, %c0_230], %349 {strides = array<i32>} : memref<2x32xf32, #tpu.memory_space<vmem>>, vector<2x32xf32>,
    %c0_231 = arith.constant 0 : index
    %c0_232 = arith.constant 0 : index
    %351 = vector.load %arg21[%c0_231, %c0_232] : memref<2x32xf32, #tpu.memory_space<vmem>>, vector<2x32xf32>
    tpu.vector_store %arg21[%c0_231, %c0_232], %347 {strides = array<i32>} : memref<2x32xf32, #tpu.memory_space<vmem>>, vector<2x32xf32>,
    %c0_233 = arith.constant 0 : index
    %c0_234 = arith.constant 0 : index
    %352 = vector.load %arg19[%c0_233, %c0_234] : memref<2x32xf32, #tpu.memory_space<vmem>>, vector<2x32xf32>
    %c0_235 = arith.constant 0 : index
    %c0_236 = arith.constant 0 : index
    %353 = vector.load %arg21[%c0_235, %c0_236] : memref<2x32xf32, #tpu.memory_space<vmem>>, vector<2x32xf32>
    %c12_237 = arith.constant 12 : index
    %c0_238 = arith.constant 0 : index
    %354 = vector.load %arg15[%c12_237, %c0_238] : memref<16x128xf32, #tpu.memory_space<vmem>>, vector<2x128xf32>
    %c0_239 = arith.constant 0 : index
    %c0_240 = arith.constant 0 : index
    %355 = vector.load %arg6[%c0_239, %c0_240] : memref<32x128xf32, #tpu.memory_space<vmem>>, vector<32x128xf32>
    %cst_241 = arith.constant dense<0.000000e+00> : vector<2x128xf32>
    %356 = tpu.matmul %352, %355, %cst_241 {dimension_numbers = #tpu.dot_dimension_numbers<[1], [0], [0], [1], [0, 0, 1, 1], [], []>} : vector<2x32xf32>, vector<32x128xf32>, vector<2x128xf32> -> vector<2x128xf32>
    %357 = arith.addf %354, %356 : vector<2x128xf32>
    %358 = arith.negf %357 : vector<2x128xf32>
    %359 = math.exp %358 : vector<2x128xf32>
    %cst_242 = arith.constant 1.000000e+00 : f32
    %360 = vector.broadcast %cst_242 : f32 to vector<2x128xf32>
    %361 = arith.addf %360, %359 : vector<2x128xf32>
    %362 = arith.divf %360, %361 : vector<2x128xf32>
    %363 = math.tanh %357 : vector<2x128xf32>
    %364 = vector.extract_strided_slice %362 {offsets = [0, 0], sizes = [2, 32], strides = [1, 1]} : vector<2x128xf32> to vector<2x32xf32>
    %365 = vector.extract_strided_slice %362 {offsets = [0, 32], sizes = [2, 32], strides = [1, 1]} : vector<2x128xf32> to vector<2x32xf32>
    %366 = vector.extract_strided_slice %363 {offsets = [0, 64], sizes = [2, 32], strides = [1, 1]} : vector<2x128xf32> to vector<2x32xf32>
    %367 = vector.extract_strided_slice %362 {offsets = [0, 96], sizes = [2, 32], strides = [1, 1]} : vector<2x128xf32> to vector<2x32xf32>
    %368 = arith.mulf %365, %353 : vector<2x32xf32>
    %369 = arith.mulf %364, %366 : vector<2x32xf32>
    %370 = arith.addf %368, %369 : vector<2x32xf32>
    %371 = math.tanh %370 : vector<2x32xf32>
    %372 = arith.mulf %367, %371 : vector<2x32xf32>
    %c0_243 = arith.constant 0 : index
    %c0_244 = arith.constant 0 : index
    %373 = vector.load %arg19[%c0_243, %c0_244] : memref<2x32xf32, #tpu.memory_space<vmem>>, vector<2x32xf32>
    tpu.vector_store %arg19[%c0_243, %c0_244], %372 {strides = array<i32>} : memref<2x32xf32, #tpu.memory_space<vmem>>, vector<2x32xf32>,
    %c0_245 = arith.constant 0 : index
    %c0_246 = arith.constant 0 : index
    %374 = vector.load %arg21[%c0_245, %c0_246] : memref<2x32xf32, #tpu.memory_space<vmem>>, vector<2x32xf32>
    tpu.vector_store %arg21[%c0_245, %c0_246], %370 {strides = array<i32>} : memref<2x32xf32, #tpu.memory_space<vmem>>, vector<2x32xf32>,
    %c0_247 = arith.constant 0 : index
    %c0_248 = arith.constant 0 : index
    %375 = vector.load %arg19[%c0_247, %c0_248] : memref<2x32xf32, #tpu.memory_space<vmem>>, vector<2x32xf32>
    %c0_249 = arith.constant 0 : index
    %c0_250 = arith.constant 0 : index
    %376 = vector.load %arg21[%c0_249, %c0_250] : memref<2x32xf32, #tpu.memory_space<vmem>>, vector<2x32xf32>
    %c14_251 = arith.constant 14 : index
    %c0_252 = arith.constant 0 : index
    %377 = vector.load %arg15[%c14_251, %c0_252] : memref<16x128xf32, #tpu.memory_space<vmem>>, vector<2x128xf32>
    %c0_253 = arith.constant 0 : index
    %c0_254 = arith.constant 0 : index
    %378 = vector.load %arg6[%c0_253, %c0_254] : memref<32x128xf32, #tpu.memory_space<vmem>>, vector<32x128xf32>
    %cst_255 = arith.constant dense<0.000000e+00> : vector<2x128xf32>
    %379 = tpu.matmul %375, %378, %cst_255 {dimension_numbers = #tpu.dot_dimension_numbers<[1], [0], [0], [1], [0, 0, 1, 1], [], []>} : vector<2x32xf32>, vector<32x128xf32>, vector<2x128xf32> -> vector<2x128xf32>
    %380 = arith.addf %377, %379 : vector<2x128xf32>
    %381 = arith.negf %380 : vector<2x128xf32>
    %382 = math.exp %381 : vector<2x128xf32>
    %cst_256 = arith.constant 1.000000e+00 : f32
    %383 = vector.broadcast %cst_256 : f32 to vector<2x128xf32>
    %384 = arith.addf %383, %382 : vector<2x128xf32>
    %385 = arith.divf %383, %384 : vector<2x128xf32>
    %386 = math.tanh %380 : vector<2x128xf32>
    %387 = vector.extract_strided_slice %385 {offsets = [0, 0], sizes = [2, 32], strides = [1, 1]} : vector<2x128xf32> to vector<2x32xf32>
    %388 = vector.extract_strided_slice %385 {offsets = [0, 32], sizes = [2, 32], strides = [1, 1]} : vector<2x128xf32> to vector<2x32xf32>
    %389 = vector.extract_strided_slice %386 {offsets = [0, 64], sizes = [2, 32], strides = [1, 1]} : vector<2x128xf32> to vector<2x32xf32>
    %390 = vector.extract_strided_slice %385 {offsets = [0, 96], sizes = [2, 32], strides = [1, 1]} : vector<2x128xf32> to vector<2x32xf32>
    %391 = arith.mulf %388, %376 : vector<2x32xf32>
    %392 = arith.mulf %387, %389 : vector<2x32xf32>
    %393 = arith.addf %391, %392 : vector<2x32xf32>
    %394 = math.tanh %393 : vector<2x32xf32>
    %395 = arith.mulf %390, %394 : vector<2x32xf32>
    %c0_257 = arith.constant 0 : index
    %c0_258 = arith.constant 0 : index
    %396 = vector.load %arg19[%c0_257, %c0_258] : memref<2x32xf32, #tpu.memory_space<vmem>>, vector<2x32xf32>
    tpu.vector_store %arg19[%c0_257, %c0_258], %395 {strides = array<i32>} : memref<2x32xf32, #tpu.memory_space<vmem>>, vector<2x32xf32>,
    %c0_259 = arith.constant 0 : index
    %c0_260 = arith.constant 0 : index
    %397 = vector.load %arg21[%c0_259, %c0_260] : memref<2x32xf32, #tpu.memory_space<vmem>>, vector<2x32xf32>
    tpu.vector_store %arg21[%c0_259, %c0_260], %393 {strides = array<i32>} : memref<2x32xf32, #tpu.memory_space<vmem>>, vector<2x32xf32>,
    %c0_261 = arith.constant 0 : index
    %c0_262 = arith.constant 0 : index
    %398 = vector.load %arg1[%c0_261, %c0_262] : memref<2x8xf32, #tpu.memory_space<vmem>>, vector<2x8xf32>
    %c0_263 = arith.constant 0 : index
    %c0_264 = arith.constant 0 : index
    %399 = vector.load %arg17[%c0_263, %c0_264] : memref<2x8xf32, #tpu.memory_space<vmem>>, vector<2x8xf32>
    tpu.vector_store %arg17[%c0_263, %c0_264], %398 {strides = array<i32>} : memref<2x8xf32, #tpu.memory_space<vmem>>, vector<2x8xf32>,
    %c0_265 = arith.constant 0 : index
    %c0_266 = arith.constant 0 : index
    %400 = vector.load %arg17[%c0_265, %c0_266] : memref<2x8xf32, #tpu.memory_space<vmem>>, vector<2x8xf32>
    %c0_267 = arith.constant 0 : index
    %c0_268 = arith.constant 0 : index
    %401 = vector.load %arg18[%c0_267, %c0_268] : memref<2x32xf32, #tpu.memory_space<vmem>>, vector<2x32xf32>
    %c0_269 = arith.constant 0 : index
    %c0_270 = arith.constant 0 : index
    %402 = vector.load %arg20[%c0_269, %c0_270] : memref<2x32xf32, #tpu.memory_space<vmem>>, vector<2x32xf32>
    %403 = tpu.concatenate %400, %401 in 1 : vector<2x8xf32>, vector<2x32xf32> -> vector<2x40xf32>
    %c0_271 = arith.constant 0 : index
    %c0_272 = arith.constant 0 : index
    %404 = vector.load %arg8[%c0_271, %c0_272] : memref<40x128xf32, #tpu.memory_space<vmem>>, vector<40x128xf32>
    %cst_273 = arith.constant dense<0.000000e+00> : vector<2x128xf32>
    %405 = tpu.matmul %403, %404, %cst_273 {dimension_numbers = #tpu.dot_dimension_numbers<[1], [0], [0], [1], [0, 0, 1, 1], [], []>} : vector<2x40xf32>, vector<40x128xf32>, vector<2x128xf32> -> vector<2x128xf32>
    %c0_274 = arith.constant 0 : index
    %c0_275 = arith.constant 0 : index
    %406 = vector.load %arg9[%c0_274, %c0_275] : memref<1x128xf32, #tpu.memory_space<vmem>>, vector<1x128xf32>
    %407 = vector.broadcast %406 : vector<1x128xf32> to vector<2x128xf32>
    %408 = arith.addf %405, %407 : vector<2x128xf32>
    %409 = arith.negf %408 : vector<2x128xf32>
    %410 = math.exp %409 : vector<2x128xf32>
    %cst_276 = arith.constant 1.000000e+00 : f32
    %411 = vector.broadcast %cst_276 : f32 to vector<2x128xf32>
    %412 = arith.addf %411, %410 : vector<2x128xf32>
    %413 = arith.divf %411, %412 : vector<2x128xf32>
    %414 = math.tanh %408 : vector<2x128xf32>
    %415 = vector.extract_strided_slice %413 {offsets = [0, 0], sizes = [2, 32], strides = [1, 1]} : vector<2x128xf32> to vector<2x32xf32>
    %416 = vector.extract_strided_slice %413 {offsets = [0, 32], sizes = [2, 32], strides = [1, 1]} : vector<2x128xf32> to vector<2x32xf32>
    %417 = vector.extract_strided_slice %414 {offsets = [0, 64], sizes = [2, 32], strides = [1, 1]} : vector<2x128xf32> to vector<2x32xf32>
    %418 = vector.extract_strided_slice %413 {offsets = [0, 96], sizes = [2, 32], strides = [1, 1]} : vector<2x128xf32> to vector<2x32xf32>
    %419 = arith.mulf %416, %402 : vector<2x32xf32>
    %420 = arith.mulf %415, %417 : vector<2x32xf32>
    %421 = arith.addf %419, %420 : vector<2x32xf32>
    %422 = math.tanh %421 : vector<2x32xf32>
    %423 = arith.mulf %418, %422 : vector<2x32xf32>
    %c0_277 = arith.constant 0 : index
    %c0_278 = arith.constant 0 : index
    %424 = vector.load %arg18[%c0_277, %c0_278] : memref<2x32xf32, #tpu.memory_space<vmem>>, vector<2x32xf32>
    tpu.vector_store %arg18[%c0_277, %c0_278], %423 {strides = array<i32>} : memref<2x32xf32, #tpu.memory_space<vmem>>, vector<2x32xf32>,
    %c0_279 = arith.constant 0 : index
    %c0_280 = arith.constant 0 : index
    %425 = vector.load %arg20[%c0_279, %c0_280] : memref<2x32xf32, #tpu.memory_space<vmem>>, vector<2x32xf32>
    tpu.vector_store %arg20[%c0_279, %c0_280], %421 {strides = array<i32>} : memref<2x32xf32, #tpu.memory_space<vmem>>, vector<2x32xf32>,
    %c0_281 = arith.constant 0 : index
    %c0_282 = arith.constant 0 : index
    %426 = vector.load %arg19[%c0_281, %c0_282] : memref<2x32xf32, #tpu.memory_space<vmem>>, vector<2x32xf32>
    %c0_283 = arith.constant 0 : index
    %c0_284 = arith.constant 0 : index
    %427 = vector.load %arg21[%c0_283, %c0_284] : memref<2x32xf32, #tpu.memory_space<vmem>>, vector<2x32xf32>
    %428 = tpu.concatenate %423, %426 in 1 : vector<2x32xf32>, vector<2x32xf32> -> vector<2x64xf32>
    %c0_285 = arith.constant 0 : index
    %c0_286 = arith.constant 0 : index
    %429 = vector.load %arg10[%c0_285, %c0_286] : memref<64x128xf32, #tpu.memory_space<vmem>>, vector<64x128xf32>
    %cst_287 = arith.constant dense<0.000000e+00> : vector<2x128xf32>
    %430 = tpu.matmul %428, %429, %cst_287 {dimension_numbers = #tpu.dot_dimension_numbers<[1], [0], [0], [1], [0, 0, 1, 1], [], []>} : vector<2x64xf32>, vector<64x128xf32>, vector<2x128xf32> -> vector<2x128xf32>
    %c0_288 = arith.constant 0 : index
    %c0_289 = arith.constant 0 : index
    %431 = vector.load %arg11[%c0_288, %c0_289] : memref<1x128xf32, #tpu.memory_space<vmem>>, vector<1x128xf32>
    %432 = vector.broadcast %431 : vector<1x128xf32> to vector<2x128xf32>
    %433 = arith.addf %430, %432 : vector<2x128xf32>
    %434 = arith.negf %433 : vector<2x128xf32>
    %435 = math.exp %434 : vector<2x128xf32>
    %cst_290 = arith.constant 1.000000e+00 : f32
    %436 = vector.broadcast %cst_290 : f32 to vector<2x128xf32>
    %437 = arith.addf %436, %435 : vector<2x128xf32>
    %438 = arith.divf %436, %437 : vector<2x128xf32>
    %439 = math.tanh %433 : vector<2x128xf32>
    %440 = vector.extract_strided_slice %438 {offsets = [0, 0], sizes = [2, 32], strides = [1, 1]} : vector<2x128xf32> to vector<2x32xf32>
    %441 = vector.extract_strided_slice %438 {offsets = [0, 32], sizes = [2, 32], strides = [1, 1]} : vector<2x128xf32> to vector<2x32xf32>
    %442 = vector.extract_strided_slice %439 {offsets = [0, 64], sizes = [2, 32], strides = [1, 1]} : vector<2x128xf32> to vector<2x32xf32>
    %443 = vector.extract_strided_slice %438 {offsets = [0, 96], sizes = [2, 32], strides = [1, 1]} : vector<2x128xf32> to vector<2x32xf32>
    %444 = arith.mulf %441, %427 : vector<2x32xf32>
    %445 = arith.mulf %440, %442 : vector<2x32xf32>
    %446 = arith.addf %444, %445 : vector<2x32xf32>
    %447 = math.tanh %446 : vector<2x32xf32>
    %448 = arith.mulf %443, %447 : vector<2x32xf32>
    %c0_291 = arith.constant 0 : index
    %c0_292 = arith.constant 0 : index
    %449 = vector.load %arg19[%c0_291, %c0_292] : memref<2x32xf32, #tpu.memory_space<vmem>>, vector<2x32xf32>
    tpu.vector_store %arg19[%c0_291, %c0_292], %448 {strides = array<i32>} : memref<2x32xf32, #tpu.memory_space<vmem>>, vector<2x32xf32>,
    %c0_293 = arith.constant 0 : index
    %c0_294 = arith.constant 0 : index
    %450 = vector.load %arg21[%c0_293, %c0_294] : memref<2x32xf32, #tpu.memory_space<vmem>>, vector<2x32xf32>
    tpu.vector_store %arg21[%c0_293, %c0_294], %446 {strides = array<i32>} : memref<2x32xf32, #tpu.memory_space<vmem>>, vector<2x32xf32>,
    %c0_295 = arith.constant 0 : index
    %c0_296 = arith.constant 0 : index
    %451 = vector.load %arg12[%c0_295, %c0_296] : memref<32x8xf32, #tpu.memory_space<vmem>>, vector<32x8xf32>
    %cst_297 = arith.constant dense<0.000000e+00> : vector<2x8xf32>
    %452 = tpu.matmul %448, %451, %cst_297 {dimension_numbers = #tpu.dot_dimension_numbers<[1], [0], [0], [1], [0, 0, 1, 1], [], []>} : vector<2x32xf32>, vector<32x8xf32>, vector<2x8xf32> -> vector<2x8xf32>
    %c0_298 = arith.constant 0 : index
    %c0_299 = arith.constant 0 : index
    %453 = vector.load %arg13[%c0_298, %c0_299] : memref<1x8xf32, #tpu.memory_space<vmem>>, vector<1x8xf32>
    %454 = vector.broadcast %453 : vector<1x8xf32> to vector<2x8xf32>
    %455 = arith.addf %452, %454 : vector<2x8xf32>
    %456 = arith.addf %455, %400 : vector<2x8xf32>
    %c0_300 = arith.constant 0 : index
    %c0_301 = arith.constant 0 : index
    %c0_302 = arith.constant 0 : index
    %457 = vector.load %arg14[%c0_300, %c0_301, %c0_302] : memref<4x2x8xf32, #tpu.memory_space<vmem>>, vector<1x2x8xf32>
    %458 = vector.shape_cast %457 : vector<1x2x8xf32> to vector<2x8xf32>
    %459 = vector.shape_cast %456 : vector<2x8xf32> to vector<1x2x8xf32>
    tpu.vector_store %arg14[%c0_300, %c0_301, %c0_302], %459 {strides = array<i32>} : memref<4x2x8xf32, #tpu.memory_space<vmem>>, vector<1x2x8xf32>,
    %c0_303 = arith.constant 0 : index
    %c0_304 = arith.constant 0 : index
    %460 = vector.load %arg17[%c0_303, %c0_304] : memref<2x8xf32, #tpu.memory_space<vmem>>, vector<2x8xf32>
    tpu.vector_store %arg17[%c0_303, %c0_304], %456 {strides = array<i32>} : memref<2x8xf32, #tpu.memory_space<vmem>>, vector<2x8xf32>,
    %c0_305 = arith.constant 0 : index
    %c0_306 = arith.constant 0 : index
    %461 = vector.load %arg17[%c0_305, %c0_306] : memref<2x8xf32, #tpu.memory_space<vmem>>, vector<2x8xf32>
    %c0_307 = arith.constant 0 : index
    %c0_308 = arith.constant 0 : index
    %462 = vector.load %arg18[%c0_307, %c0_308] : memref<2x32xf32, #tpu.memory_space<vmem>>, vector<2x32xf32>
    %c0_309 = arith.constant 0 : index
    %c0_310 = arith.constant 0 : index
    %463 = vector.load %arg20[%c0_309, %c0_310] : memref<2x32xf32, #tpu.memory_space<vmem>>, vector<2x32xf32>
    %464 = tpu.concatenate %461, %462 in 1 : vector<2x8xf32>, vector<2x32xf32> -> vector<2x40xf32>
    %c0_311 = arith.constant 0 : index
    %c0_312 = arith.constant 0 : index
    %465 = vector.load %arg8[%c0_311, %c0_312] : memref<40x128xf32, #tpu.memory_space<vmem>>, vector<40x128xf32>
    %cst_313 = arith.constant dense<0.000000e+00> : vector<2x128xf32>
    %466 = tpu.matmul %464, %465, %cst_313 {dimension_numbers = #tpu.dot_dimension_numbers<[1], [0], [0], [1], [0, 0, 1, 1], [], []>} : vector<2x40xf32>, vector<40x128xf32>, vector<2x128xf32> -> vector<2x128xf32>
    %c0_314 = arith.constant 0 : index
    %c0_315 = arith.constant 0 : index
    %467 = vector.load %arg9[%c0_314, %c0_315] : memref<1x128xf32, #tpu.memory_space<vmem>>, vector<1x128xf32>
    %468 = vector.broadcast %467 : vector<1x128xf32> to vector<2x128xf32>
    %469 = arith.addf %466, %468 : vector<2x128xf32>
    %470 = arith.negf %469 : vector<2x128xf32>
    %471 = math.exp %470 : vector<2x128xf32>
    %cst_316 = arith.constant 1.000000e+00 : f32
    %472 = vector.broadcast %cst_316 : f32 to vector<2x128xf32>
    %473 = arith.addf %472, %471 : vector<2x128xf32>
    %474 = arith.divf %472, %473 : vector<2x128xf32>
    %475 = math.tanh %469 : vector<2x128xf32>
    %476 = vector.extract_strided_slice %474 {offsets = [0, 0], sizes = [2, 32], strides = [1, 1]} : vector<2x128xf32> to vector<2x32xf32>
    %477 = vector.extract_strided_slice %474 {offsets = [0, 32], sizes = [2, 32], strides = [1, 1]} : vector<2x128xf32> to vector<2x32xf32>
    %478 = vector.extract_strided_slice %475 {offsets = [0, 64], sizes = [2, 32], strides = [1, 1]} : vector<2x128xf32> to vector<2x32xf32>
    %479 = vector.extract_strided_slice %474 {offsets = [0, 96], sizes = [2, 32], strides = [1, 1]} : vector<2x128xf32> to vector<2x32xf32>
    %480 = arith.mulf %477, %463 : vector<2x32xf32>
    %481 = arith.mulf %476, %478 : vector<2x32xf32>
    %482 = arith.addf %480, %481 : vector<2x32xf32>
    %483 = math.tanh %482 : vector<2x32xf32>
    %484 = arith.mulf %479, %483 : vector<2x32xf32>
    %c0_317 = arith.constant 0 : index
    %c0_318 = arith.constant 0 : index
    %485 = vector.load %arg18[%c0_317, %c0_318] : memref<2x32xf32, #tpu.memory_space<vmem>>, vector<2x32xf32>
    tpu.vector_store %arg18[%c0_317, %c0_318], %484 {strides = array<i32>} : memref<2x32xf32, #tpu.memory_space<vmem>>, vector<2x32xf32>,
    %c0_319 = arith.constant 0 : index
    %c0_320 = arith.constant 0 : index
    %486 = vector.load %arg20[%c0_319, %c0_320] : memref<2x32xf32, #tpu.memory_space<vmem>>, vector<2x32xf32>
    tpu.vector_store %arg20[%c0_319, %c0_320], %482 {strides = array<i32>} : memref<2x32xf32, #tpu.memory_space<vmem>>, vector<2x32xf32>,
    %c0_321 = arith.constant 0 : index
    %c0_322 = arith.constant 0 : index
    %487 = vector.load %arg19[%c0_321, %c0_322] : memref<2x32xf32, #tpu.memory_space<vmem>>, vector<2x32xf32>
    %c0_323 = arith.constant 0 : index
    %c0_324 = arith.constant 0 : index
    %488 = vector.load %arg21[%c0_323, %c0_324] : memref<2x32xf32, #tpu.memory_space<vmem>>, vector<2x32xf32>
    %489 = tpu.concatenate %484, %487 in 1 : vector<2x32xf32>, vector<2x32xf32> -> vector<2x64xf32>
    %c0_325 = arith.constant 0 : index
    %c0_326 = arith.constant 0 : index
    %490 = vector.load %arg10[%c0_325, %c0_326] : memref<64x128xf32, #tpu.memory_space<vmem>>, vector<64x128xf32>
    %cst_327 = arith.constant dense<0.000000e+00> : vector<2x128xf32>
    %491 = tpu.matmul %489, %490, %cst_327 {dimension_numbers = #tpu.dot_dimension_numbers<[1], [0], [0], [1], [0, 0, 1, 1], [], []>} : vector<2x64xf32>, vector<64x128xf32>, vector<2x128xf32> -> vector<2x128xf32>
    %c0_328 = arith.constant 0 : index
    %c0_329 = arith.constant 0 : index
    %492 = vector.load %arg11[%c0_328, %c0_329] : memref<1x128xf32, #tpu.memory_space<vmem>>, vector<1x128xf32>
    %493 = vector.broadcast %492 : vector<1x128xf32> to vector<2x128xf32>
    %494 = arith.addf %491, %493 : vector<2x128xf32>
    %495 = arith.negf %494 : vector<2x128xf32>
    %496 = math.exp %495 : vector<2x128xf32>
    %cst_330 = arith.constant 1.000000e+00 : f32
    %497 = vector.broadcast %cst_330 : f32 to vector<2x128xf32>
    %498 = arith.addf %497, %496 : vector<2x128xf32>
    %499 = arith.divf %497, %498 : vector<2x128xf32>
    %500 = math.tanh %494 : vector<2x128xf32>
    %501 = vector.extract_strided_slice %499 {offsets = [0, 0], sizes = [2, 32], strides = [1, 1]} : vector<2x128xf32> to vector<2x32xf32>
    %502 = vector.extract_strided_slice %499 {offsets = [0, 32], sizes = [2, 32], strides = [1, 1]} : vector<2x128xf32> to vector<2x32xf32>
    %503 = vector.extract_strided_slice %500 {offsets = [0, 64], sizes = [2, 32], strides = [1, 1]} : vector<2x128xf32> to vector<2x32xf32>
    %504 = vector.extract_strided_slice %499 {offsets = [0, 96], sizes = [2, 32], strides = [1, 1]} : vector<2x128xf32> to vector<2x32xf32>
    %505 = arith.mulf %502, %488 : vector<2x32xf32>
    %506 = arith.mulf %501, %503 : vector<2x32xf32>
    %507 = arith.addf %505, %506 : vector<2x32xf32>
    %508 = math.tanh %507 : vector<2x32xf32>
    %509 = arith.mulf %504, %508 : vector<2x32xf32>
    %c0_331 = arith.constant 0 : index
    %c0_332 = arith.constant 0 : index
    %510 = vector.load %arg19[%c0_331, %c0_332] : memref<2x32xf32, #tpu.memory_space<vmem>>, vector<2x32xf32>
    tpu.vector_store %arg19[%c0_331, %c0_332], %509 {strides = array<i32>} : memref<2x32xf32, #tpu.memory_space<vmem>>, vector<2x32xf32>,
    %c0_333 = arith.constant 0 : index
    %c0_334 = arith.constant 0 : index
    %511 = vector.load %arg21[%c0_333, %c0_334] : memref<2x32xf32, #tpu.memory_space<vmem>>, vector<2x32xf32>
    tpu.vector_store %arg21[%c0_333, %c0_334], %507 {strides = array<i32>} : memref<2x32xf32, #tpu.memory_space<vmem>>, vector<2x32xf32>,
    %c0_335 = arith.constant 0 : index
    %c0_336 = arith.constant 0 : index
    %512 = vector.load %arg12[%c0_335, %c0_336] : memref<32x8xf32, #tpu.memory_space<vmem>>, vector<32x8xf32>
    %cst_337 = arith.constant dense<0.000000e+00> : vector<2x8xf32>
    %513 = tpu.matmul %509, %512, %cst_337 {dimension_numbers = #tpu.dot_dimension_numbers<[1], [0], [0], [1], [0, 0, 1, 1], [], []>} : vector<2x32xf32>, vector<32x8xf32>, vector<2x8xf32> -> vector<2x8xf32>
    %c0_338 = arith.constant 0 : index
    %c0_339 = arith.constant 0 : index
    %514 = vector.load %arg13[%c0_338, %c0_339] : memref<1x8xf32, #tpu.memory_space<vmem>>, vector<1x8xf32>
    %515 = vector.broadcast %514 : vector<1x8xf32> to vector<2x8xf32>
    %516 = arith.addf %513, %515 : vector<2x8xf32>
    %517 = arith.addf %516, %461 : vector<2x8xf32>
    %c1 = arith.constant 1 : index
    %c0_340 = arith.constant 0 : index
    %c0_341 = arith.constant 0 : index
    %518 = vector.load %arg14[%c1, %c0_340, %c0_341] : memref<4x2x8xf32, #tpu.memory_space<vmem>>, vector<1x2x8xf32>
    %519 = vector.shape_cast %518 : vector<1x2x8xf32> to vector<2x8xf32>
    %520 = vector.shape_cast %517 : vector<2x8xf32> to vector<1x2x8xf32>
    tpu.vector_store %arg14[%c1, %c0_340, %c0_341], %520 {strides = array<i32>} : memref<4x2x8xf32, #tpu.memory_space<vmem>>, vector<1x2x8xf32>,
    %c0_342 = arith.constant 0 : index
    %c0_343 = arith.constant 0 : index
    %521 = vector.load %arg17[%c0_342, %c0_343] : memref<2x8xf32, #tpu.memory_space<vmem>>, vector<2x8xf32>
    tpu.vector_store %arg17[%c0_342, %c0_343], %517 {strides = array<i32>} : memref<2x8xf32, #tpu.memory_space<vmem>>, vector<2x8xf32>,
    %c0_344 = arith.constant 0 : index
    %c0_345 = arith.constant 0 : index
    %522 = vector.load %arg17[%c0_344, %c0_345] : memref<2x8xf32, #tpu.memory_space<vmem>>, vector<2x8xf32>
    %c0_346 = arith.constant 0 : index
    %c0_347 = arith.constant 0 : index
    %523 = vector.load %arg18[%c0_346, %c0_347] : memref<2x32xf32, #tpu.memory_space<vmem>>, vector<2x32xf32>
    %c0_348 = arith.constant 0 : index
    %c0_349 = arith.constant 0 : index
    %524 = vector.load %arg20[%c0_348, %c0_349] : memref<2x32xf32, #tpu.memory_space<vmem>>, vector<2x32xf32>
    %525 = tpu.concatenate %522, %523 in 1 : vector<2x8xf32>, vector<2x32xf32> -> vector<2x40xf32>
    %c0_350 = arith.constant 0 : index
    %c0_351 = arith.constant 0 : index
    %526 = vector.load %arg8[%c0_350, %c0_351] : memref<40x128xf32, #tpu.memory_space<vmem>>, vector<40x128xf32>
    %cst_352 = arith.constant dense<0.000000e+00> : vector<2x128xf32>
    %527 = tpu.matmul %525, %526, %cst_352 {dimension_numbers = #tpu.dot_dimension_numbers<[1], [0], [0], [1], [0, 0, 1, 1], [], []>} : vector<2x40xf32>, vector<40x128xf32>, vector<2x128xf32> -> vector<2x128xf32>
    %c0_353 = arith.constant 0 : index
    %c0_354 = arith.constant 0 : index
    %528 = vector.load %arg9[%c0_353, %c0_354] : memref<1x128xf32, #tpu.memory_space<vmem>>, vector<1x128xf32>
    %529 = vector.broadcast %528 : vector<1x128xf32> to vector<2x128xf32>
    %530 = arith.addf %527, %529 : vector<2x128xf32>
    %531 = arith.negf %530 : vector<2x128xf32>
    %532 = math.exp %531 : vector<2x128xf32>
    %cst_355 = arith.constant 1.000000e+00 : f32
    %533 = vector.broadcast %cst_355 : f32 to vector<2x128xf32>
    %534 = arith.addf %533, %532 : vector<2x128xf32>
    %535 = arith.divf %533, %534 : vector<2x128xf32>
    %536 = math.tanh %530 : vector<2x128xf32>
    %537 = vector.extract_strided_slice %535 {offsets = [0, 0], sizes = [2, 32], strides = [1, 1]} : vector<2x128xf32> to vector<2x32xf32>
    %538 = vector.extract_strided_slice %535 {offsets = [0, 32], sizes = [2, 32], strides = [1, 1]} : vector<2x128xf32> to vector<2x32xf32>
    %539 = vector.extract_strided_slice %536 {offsets = [0, 64], sizes = [2, 32], strides = [1, 1]} : vector<2x128xf32> to vector<2x32xf32>
    %540 = vector.extract_strided_slice %535 {offsets = [0, 96], sizes = [2, 32], strides = [1, 1]} : vector<2x128xf32> to vector<2x32xf32>
    %541 = arith.mulf %538, %524 : vector<2x32xf32>
    %542 = arith.mulf %537, %539 : vector<2x32xf32>
    %543 = arith.addf %541, %542 : vector<2x32xf32>
    %544 = math.tanh %543 : vector<2x32xf32>
    %545 = arith.mulf %540, %544 : vector<2x32xf32>
    %c0_356 = arith.constant 0 : index
    %c0_357 = arith.constant 0 : index
    %546 = vector.load %arg18[%c0_356, %c0_357] : memref<2x32xf32, #tpu.memory_space<vmem>>, vector<2x32xf32>
    tpu.vector_store %arg18[%c0_356, %c0_357], %545 {strides = array<i32>} : memref<2x32xf32, #tpu.memory_space<vmem>>, vector<2x32xf32>,
    %c0_358 = arith.constant 0 : index
    %c0_359 = arith.constant 0 : index
    %547 = vector.load %arg20[%c0_358, %c0_359] : memref<2x32xf32, #tpu.memory_space<vmem>>, vector<2x32xf32>
    tpu.vector_store %arg20[%c0_358, %c0_359], %543 {strides = array<i32>} : memref<2x32xf32, #tpu.memory_space<vmem>>, vector<2x32xf32>,
    %c0_360 = arith.constant 0 : index
    %c0_361 = arith.constant 0 : index
    %548 = vector.load %arg19[%c0_360, %c0_361] : memref<2x32xf32, #tpu.memory_space<vmem>>, vector<2x32xf32>
    %c0_362 = arith.constant 0 : index
    %c0_363 = arith.constant 0 : index
    %549 = vector.load %arg21[%c0_362, %c0_363] : memref<2x32xf32, #tpu.memory_space<vmem>>, vector<2x32xf32>
    %550 = tpu.concatenate %545, %548 in 1 : vector<2x32xf32>, vector<2x32xf32> -> vector<2x64xf32>
    %c0_364 = arith.constant 0 : index
    %c0_365 = arith.constant 0 : index
    %551 = vector.load %arg10[%c0_364, %c0_365] : memref<64x128xf32, #tpu.memory_space<vmem>>, vector<64x128xf32>
    %cst_366 = arith.constant dense<0.000000e+00> : vector<2x128xf32>
    %552 = tpu.matmul %550, %551, %cst_366 {dimension_numbers = #tpu.dot_dimension_numbers<[1], [0], [0], [1], [0, 0, 1, 1], [], []>} : vector<2x64xf32>, vector<64x128xf32>, vector<2x128xf32> -> vector<2x128xf32>
    %c0_367 = arith.constant 0 : index
    %c0_368 = arith.constant 0 : index
    %553 = vector.load %arg11[%c0_367, %c0_368] : memref<1x128xf32, #tpu.memory_space<vmem>>, vector<1x128xf32>
    %554 = vector.broadcast %553 : vector<1x128xf32> to vector<2x128xf32>
    %555 = arith.addf %552, %554 : vector<2x128xf32>
    %556 = arith.negf %555 : vector<2x128xf32>
    %557 = math.exp %556 : vector<2x128xf32>
    %cst_369 = arith.constant 1.000000e+00 : f32
    %558 = vector.broadcast %cst_369 : f32 to vector<2x128xf32>
    %559 = arith.addf %558, %557 : vector<2x128xf32>
    %560 = arith.divf %558, %559 : vector<2x128xf32>
    %561 = math.tanh %555 : vector<2x128xf32>
    %562 = vector.extract_strided_slice %560 {offsets = [0, 0], sizes = [2, 32], strides = [1, 1]} : vector<2x128xf32> to vector<2x32xf32>
    %563 = vector.extract_strided_slice %560 {offsets = [0, 32], sizes = [2, 32], strides = [1, 1]} : vector<2x128xf32> to vector<2x32xf32>
    %564 = vector.extract_strided_slice %561 {offsets = [0, 64], sizes = [2, 32], strides = [1, 1]} : vector<2x128xf32> to vector<2x32xf32>
    %565 = vector.extract_strided_slice %560 {offsets = [0, 96], sizes = [2, 32], strides = [1, 1]} : vector<2x128xf32> to vector<2x32xf32>
    %566 = arith.mulf %563, %549 : vector<2x32xf32>
    %567 = arith.mulf %562, %564 : vector<2x32xf32>
    %568 = arith.addf %566, %567 : vector<2x32xf32>
    %569 = math.tanh %568 : vector<2x32xf32>
    %570 = arith.mulf %565, %569 : vector<2x32xf32>
    %c0_370 = arith.constant 0 : index
    %c0_371 = arith.constant 0 : index
    %571 = vector.load %arg19[%c0_370, %c0_371] : memref<2x32xf32, #tpu.memory_space<vmem>>, vector<2x32xf32>
    tpu.vector_store %arg19[%c0_370, %c0_371], %570 {strides = array<i32>} : memref<2x32xf32, #tpu.memory_space<vmem>>, vector<2x32xf32>,
    %c0_372 = arith.constant 0 : index
    %c0_373 = arith.constant 0 : index
    %572 = vector.load %arg21[%c0_372, %c0_373] : memref<2x32xf32, #tpu.memory_space<vmem>>, vector<2x32xf32>
    tpu.vector_store %arg21[%c0_372, %c0_373], %568 {strides = array<i32>} : memref<2x32xf32, #tpu.memory_space<vmem>>, vector<2x32xf32>,
    %c0_374 = arith.constant 0 : index
    %c0_375 = arith.constant 0 : index
    %573 = vector.load %arg12[%c0_374, %c0_375] : memref<32x8xf32, #tpu.memory_space<vmem>>, vector<32x8xf32>
    %cst_376 = arith.constant dense<0.000000e+00> : vector<2x8xf32>
    %574 = tpu.matmul %570, %573, %cst_376 {dimension_numbers = #tpu.dot_dimension_numbers<[1], [0], [0], [1], [0, 0, 1, 1], [], []>} : vector<2x32xf32>, vector<32x8xf32>, vector<2x8xf32> -> vector<2x8xf32>
    %c0_377 = arith.constant 0 : index
    %c0_378 = arith.constant 0 : index
    %575 = vector.load %arg13[%c0_377, %c0_378] : memref<1x8xf32, #tpu.memory_space<vmem>>, vector<1x8xf32>
    %576 = vector.broadcast %575 : vector<1x8xf32> to vector<2x8xf32>
    %577 = arith.addf %574, %576 : vector<2x8xf32>
    %578 = arith.addf %577, %522 : vector<2x8xf32>
    %c2_379 = arith.constant 2 : index
    %c0_380 = arith.constant 0 : index
    %c0_381 = arith.constant 0 : index
    %579 = vector.load %arg14[%c2_379, %c0_380, %c0_381] : memref<4x2x8xf32, #tpu.memory_space<vmem>>, vector<1x2x8xf32>
    %580 = vector.shape_cast %579 : vector<1x2x8xf32> to vector<2x8xf32>
    %581 = vector.shape_cast %578 : vector<2x8xf32> to vector<1x2x8xf32>
    tpu.vector_store %arg14[%c2_379, %c0_380, %c0_381], %581 {strides = array<i32>} : memref<4x2x8xf32, #tpu.memory_space<vmem>>, vector<1x2x8xf32>,
    %c0_382 = arith.constant 0 : index
    %c0_383 = arith.constant 0 : index
    %582 = vector.load %arg17[%c0_382, %c0_383] : memref<2x8xf32, #tpu.memory_space<vmem>>, vector<2x8xf32>
    tpu.vector_store %arg17[%c0_382, %c0_383], %578 {strides = array<i32>} : memref<2x8xf32, #tpu.memory_space<vmem>>, vector<2x8xf32>,
    %c0_384 = arith.constant 0 : index
    %c0_385 = arith.constant 0 : index
    %583 = vector.load %arg17[%c0_384, %c0_385] : memref<2x8xf32, #tpu.memory_space<vmem>>, vector<2x8xf32>
    %c0_386 = arith.constant 0 : index
    %c0_387 = arith.constant 0 : index
    %584 = vector.load %arg18[%c0_386, %c0_387] : memref<2x32xf32, #tpu.memory_space<vmem>>, vector<2x32xf32>
    %c0_388 = arith.constant 0 : index
    %c0_389 = arith.constant 0 : index
    %585 = vector.load %arg20[%c0_388, %c0_389] : memref<2x32xf32, #tpu.memory_space<vmem>>, vector<2x32xf32>
    %586 = tpu.concatenate %583, %584 in 1 : vector<2x8xf32>, vector<2x32xf32> -> vector<2x40xf32>
    %c0_390 = arith.constant 0 : index
    %c0_391 = arith.constant 0 : index
    %587 = vector.load %arg8[%c0_390, %c0_391] : memref<40x128xf32, #tpu.memory_space<vmem>>, vector<40x128xf32>
    %cst_392 = arith.constant dense<0.000000e+00> : vector<2x128xf32>
    %588 = tpu.matmul %586, %587, %cst_392 {dimension_numbers = #tpu.dot_dimension_numbers<[1], [0], [0], [1], [0, 0, 1, 1], [], []>} : vector<2x40xf32>, vector<40x128xf32>, vector<2x128xf32> -> vector<2x128xf32>
    %c0_393 = arith.constant 0 : index
    %c0_394 = arith.constant 0 : index
    %589 = vector.load %arg9[%c0_393, %c0_394] : memref<1x128xf32, #tpu.memory_space<vmem>>, vector<1x128xf32>
    %590 = vector.broadcast %589 : vector<1x128xf32> to vector<2x128xf32>
    %591 = arith.addf %588, %590 : vector<2x128xf32>
    %592 = arith.negf %591 : vector<2x128xf32>
    %593 = math.exp %592 : vector<2x128xf32>
    %cst_395 = arith.constant 1.000000e+00 : f32
    %594 = vector.broadcast %cst_395 : f32 to vector<2x128xf32>
    %595 = arith.addf %594, %593 : vector<2x128xf32>
    %596 = arith.divf %594, %595 : vector<2x128xf32>
    %597 = math.tanh %591 : vector<2x128xf32>
    %598 = vector.extract_strided_slice %596 {offsets = [0, 0], sizes = [2, 32], strides = [1, 1]} : vector<2x128xf32> to vector<2x32xf32>
    %599 = vector.extract_strided_slice %596 {offsets = [0, 32], sizes = [2, 32], strides = [1, 1]} : vector<2x128xf32> to vector<2x32xf32>
    %600 = vector.extract_strided_slice %597 {offsets = [0, 64], sizes = [2, 32], strides = [1, 1]} : vector<2x128xf32> to vector<2x32xf32>
    %601 = vector.extract_strided_slice %596 {offsets = [0, 96], sizes = [2, 32], strides = [1, 1]} : vector<2x128xf32> to vector<2x32xf32>
    %602 = arith.mulf %599, %585 : vector<2x32xf32>
    %603 = arith.mulf %598, %600 : vector<2x32xf32>
    %604 = arith.addf %602, %603 : vector<2x32xf32>
    %605 = math.tanh %604 : vector<2x32xf32>
    %606 = arith.mulf %601, %605 : vector<2x32xf32>
    %c0_396 = arith.constant 0 : index
    %c0_397 = arith.constant 0 : index
    %607 = vector.load %arg18[%c0_396, %c0_397] : memref<2x32xf32, #tpu.memory_space<vmem>>, vector<2x32xf32>
    tpu.vector_store %arg18[%c0_396, %c0_397], %606 {strides = array<i32>} : memref<2x32xf32, #tpu.memory_space<vmem>>, vector<2x32xf32>,
    %c0_398 = arith.constant 0 : index
    %c0_399 = arith.constant 0 : index
    %608 = vector.load %arg20[%c0_398, %c0_399] : memref<2x32xf32, #tpu.memory_space<vmem>>, vector<2x32xf32>
    tpu.vector_store %arg20[%c0_398, %c0_399], %604 {strides = array<i32>} : memref<2x32xf32, #tpu.memory_space<vmem>>, vector<2x32xf32>,
    %c0_400 = arith.constant 0 : index
    %c0_401 = arith.constant 0 : index
    %609 = vector.load %arg19[%c0_400, %c0_401] : memref<2x32xf32, #tpu.memory_space<vmem>>, vector<2x32xf32>
    %c0_402 = arith.constant 0 : index
    %c0_403 = arith.constant 0 : index
    %610 = vector.load %arg21[%c0_402, %c0_403] : memref<2x32xf32, #tpu.memory_space<vmem>>, vector<2x32xf32>
    %611 = tpu.concatenate %606, %609 in 1 : vector<2x32xf32>, vector<2x32xf32> -> vector<2x64xf32>
    %c0_404 = arith.constant 0 : index
    %c0_405 = arith.constant 0 : index
    %612 = vector.load %arg10[%c0_404, %c0_405] : memref<64x128xf32, #tpu.memory_space<vmem>>, vector<64x128xf32>
    %cst_406 = arith.constant dense<0.000000e+00> : vector<2x128xf32>
    %613 = tpu.matmul %611, %612, %cst_406 {dimension_numbers = #tpu.dot_dimension_numbers<[1], [0], [0], [1], [0, 0, 1, 1], [], []>} : vector<2x64xf32>, vector<64x128xf32>, vector<2x128xf32> -> vector<2x128xf32>
    %c0_407 = arith.constant 0 : index
    %c0_408 = arith.constant 0 : index
    %614 = vector.load %arg11[%c0_407, %c0_408] : memref<1x128xf32, #tpu.memory_space<vmem>>, vector<1x128xf32>
    %615 = vector.broadcast %614 : vector<1x128xf32> to vector<2x128xf32>
    %616 = arith.addf %613, %615 : vector<2x128xf32>
    %617 = arith.negf %616 : vector<2x128xf32>
    %618 = math.exp %617 : vector<2x128xf32>
    %cst_409 = arith.constant 1.000000e+00 : f32
    %619 = vector.broadcast %cst_409 : f32 to vector<2x128xf32>
    %620 = arith.addf %619, %618 : vector<2x128xf32>
    %621 = arith.divf %619, %620 : vector<2x128xf32>
    %622 = math.tanh %616 : vector<2x128xf32>
    %623 = vector.extract_strided_slice %621 {offsets = [0, 0], sizes = [2, 32], strides = [1, 1]} : vector<2x128xf32> to vector<2x32xf32>
    %624 = vector.extract_strided_slice %621 {offsets = [0, 32], sizes = [2, 32], strides = [1, 1]} : vector<2x128xf32> to vector<2x32xf32>
    %625 = vector.extract_strided_slice %622 {offsets = [0, 64], sizes = [2, 32], strides = [1, 1]} : vector<2x128xf32> to vector<2x32xf32>
    %626 = vector.extract_strided_slice %621 {offsets = [0, 96], sizes = [2, 32], strides = [1, 1]} : vector<2x128xf32> to vector<2x32xf32>
    %627 = arith.mulf %624, %610 : vector<2x32xf32>
    %628 = arith.mulf %623, %625 : vector<2x32xf32>
    %629 = arith.addf %627, %628 : vector<2x32xf32>
    %630 = math.tanh %629 : vector<2x32xf32>
    %631 = arith.mulf %626, %630 : vector<2x32xf32>
    %c0_410 = arith.constant 0 : index
    %c0_411 = arith.constant 0 : index
    %632 = vector.load %arg19[%c0_410, %c0_411] : memref<2x32xf32, #tpu.memory_space<vmem>>, vector<2x32xf32>
    tpu.vector_store %arg19[%c0_410, %c0_411], %631 {strides = array<i32>} : memref<2x32xf32, #tpu.memory_space<vmem>>, vector<2x32xf32>,
    %c0_412 = arith.constant 0 : index
    %c0_413 = arith.constant 0 : index
    %633 = vector.load %arg21[%c0_412, %c0_413] : memref<2x32xf32, #tpu.memory_space<vmem>>, vector<2x32xf32>
    tpu.vector_store %arg21[%c0_412, %c0_413], %629 {strides = array<i32>} : memref<2x32xf32, #tpu.memory_space<vmem>>, vector<2x32xf32>,
    %c0_414 = arith.constant 0 : index
    %c0_415 = arith.constant 0 : index
    %634 = vector.load %arg12[%c0_414, %c0_415] : memref<32x8xf32, #tpu.memory_space<vmem>>, vector<32x8xf32>
    %cst_416 = arith.constant dense<0.000000e+00> : vector<2x8xf32>
    %635 = tpu.matmul %631, %634, %cst_416 {dimension_numbers = #tpu.dot_dimension_numbers<[1], [0], [0], [1], [0, 0, 1, 1], [], []>} : vector<2x32xf32>, vector<32x8xf32>, vector<2x8xf32> -> vector<2x8xf32>
    %c0_417 = arith.constant 0 : index
    %c0_418 = arith.constant 0 : index
    %636 = vector.load %arg13[%c0_417, %c0_418] : memref<1x8xf32, #tpu.memory_space<vmem>>, vector<1x8xf32>
    %637 = vector.broadcast %636 : vector<1x8xf32> to vector<2x8xf32>
    %638 = arith.addf %635, %637 : vector<2x8xf32>
    %639 = arith.addf %638, %583 : vector<2x8xf32>
    %c3 = arith.constant 3 : index
    %c0_419 = arith.constant 0 : index
    %c0_420 = arith.constant 0 : index
    %640 = vector.load %arg14[%c3, %c0_419, %c0_420] : memref<4x2x8xf32, #tpu.memory_space<vmem>>, vector<1x2x8xf32>
    %641 = vector.shape_cast %640 : vector<1x2x8xf32> to vector<2x8xf32>
    %642 = vector.shape_cast %639 : vector<2x8xf32> to vector<1x2x8xf32>
    tpu.vector_store %arg14[%c3, %c0_419, %c0_420], %642 {strides = array<i32>} : memref<4x2x8xf32, #tpu.memory_space<vmem>>, vector<1x2x8xf32>,
    %c0_421 = arith.constant 0 : index
    %c0_422 = arith.constant 0 : index
    %643 = vector.load %arg17[%c0_421, %c0_422] : memref<2x8xf32, #tpu.memory_space<vmem>>, vector<2x8xf32>
    tpu.vector_store %arg17[%c0_421, %c0_422], %639 {strides = array<i32>} : memref<2x8xf32, #tpu.memory_space<vmem>>, vector<2x8xf32>,
    return
  }
}

</mosaic_0001>

<bundles_post_ra>
// kernel: seq2seq_forward.1
= control target key start
LH: loop header
LB: loop body
LE: loop exit
PB: predicated region body
PF: predicated region fallthrough
CT: control target
= control target key end

     0   :  { %19 = vsyncpa [#allocation10], 0  ;;  %s5680_s0 = inlined_call_operand.vmem [shape: f32[16,4], index: 0, kind: input, shape index: {}]   ;;  %s5681_s1 = inlined_call_operand.vmem [shape: f32[2,8], index: 1, kind: input, shape index: {}]   ;;  %s5682_s2 = inlined_call_operand.hbm [shape: f32[4,128], index: 2, kind: input, shape index: {}]   ;;  %s5683_s3 = inlined_call_operand.hbm [shape: f32[32,128], index: 3, kind: input, shape index: {}]   ;;  %s5684_s4 = inlined_call_operand.vmem [shape: f32[1,128], index: 4, kind: input, shape index: {}]   ;;  %s5685_s5 = inlined_call_operand.vmem [shape: f32[32,128], index: 5, kind: input, shape index: {}]   ;;  %s5686_s6 = inlined_call_operand.hbm [shape: f32[32,128], index: 6, kind: input, shape index: {}]   ;;  %s5687_s7 = inlined_call_operand.hbm [shape: f32[1,128], index: 7, kind: input, shape index: {}]   ;;  %s5688_s8 = inlined_call_operand.hbm [shape: f32[40,128], index: 8, kind: input, shape index: {}]   ;;  %s5689_s9 = inlined_call_operand.hbm [shape: f32[1,128], index: 9, kind: input, shape index: {}]   ;;  %s5690_s10 = inlined_call_operand.vmem [shape: f32[64,128], index: 10, kind: input, shape index: {}]   ;;  %s5691_s11 = inlined_call_operand.hbm [shape: f32[1,128], index: 11, kind: input, shape index: {}]   ;;  %s5692_s12 = inlined_call_operand.vmem [shape: f32[32,8], index: 12, kind: input, shape index: {}]   ;;  %s5693_s13 = inlined_call_operand.hbm [shape: f32[1,8], index: 13, kind: input, shape index: {}]   ;;  %s5694_s14 = inlined_call_operand.vmem [shape: f32[4,2,8], index: 14, kind: output, shape index: {}]  }
   0x1   :  { %20 = vsyncpa [#allocation12], 0 }
   0x2   :  { %21 = vsyncpa [#allocation15], 0 }
   0x3   :  { %22 = vsyncpa [#allocation18], 0 }
   0x4   :  { %23 = vsyncpa [#allocation21], 0  ;;  %s4877_s29 = smov [#allocation11]   ;;  %s4691_s17 = scalar_lea.hbm %s5683_s3, 512 }
   0x5   :  { %s43_s30 = sshll.u32 %s4877_s29, 4  ;;  %p4692_p0 = scmp.ne.s32.totalorder %s5683_s3, %s4691_s17  ;;  %s44_s30 = int_to_ptr.vmem [resolvable:$true] %s43_s30 }
   0x6   :  { %p4695_p1 = scmp.lt.u32.totalorder %s4691_s17, %s5683_s3 }
   0x8   :  { %p4697_p2 = pnand %p4695_p1, %p4692_p0 }
   0xa   :  { %4700 = shalt.err (!%p4697_p2)
}
   0xb   :  { %s4701_s22 = scalar_lea.vmem %s44_s30, 512  ;;  %p4706_p4 = scmp.lt.s32.totalorder %s44_s30, %s44_s30 }
   0xc   :  { %p4702_p3 = scmp.ne.s32.totalorder %s44_s30, %s4701_s22  ;;  %p4707_p5 = scmp.lt.s32.totalorder %s4701_s22, %s4701_s22 }
   0xe   :  { %p4708_p6 = por %p4707_p5, %p4706_p4 }
  0x10   :  { %p4709_p7 = pnand %p4708_p6, %p4702_p3 }
  0x12   :  { %4712 = shalt.err (!%p4709_p7)
}
  0x13   :  { %s4878_s23 = smov 128   ;;  %s4879_s24 = smov 8  }
  0x14   :  { %49 = dma.hbm_to_vmem [thread:$0]  %s5683_s3, 512, %s44_s30, [#allocation12], %s4878_s23, %s4878_s23, %s4879_s24  }
  0x15   :  { %s4880_s27 = smov [#allocation14]   ;;  %s4881_s29 = smov [#allocation17]  }
  0x16   :  { %s72_s28 = sshll.u32 %s4880_s27, 4  ;;  %s94_s15 = sshll.u32 %s4881_s29, 4  ;;  %s73_s28 = int_to_ptr.vmem [resolvable:$true] %s72_s28  ;;  %s95_s15 = int_to_ptr.vmem [resolvable:$true] %s94_s15 }
  0x17   :  { %s4713_s18 = scalar_lea.hbm %s5687_s7, 16 }
  0x18   :  { %p4714_p8 = scmp.ne.s32.totalorder %s5687_s7, %s4713_s18  ;;  %p4717_p9 = scmp.lt.u32.totalorder %s4713_s18, %s5687_s7 }
  0x1a   :  { %p4719_p10 = pnand %p4717_p9, %p4714_p8 }
  0x1c   :  { %4722 = shalt.err (!%p4719_p10)
}
  0x1d   :  { %s4723_s3 = scalar_lea.vmem %s73_s28, 16  ;;  %s4727_s30 = scalar_lea.vmem %s73_s28, 32 }
  0x1e   :  { %p4724_p11 = scmp.ne.s32.totalorder %s73_s28, %s4723_s3  ;;  %p4728_p12 = scmp.lt.s32.totalorder %s73_s28, %s73_s28 }
  0x1f   :  { %p4729_p13 = scmp.lt.s32.totalorder %s4727_s30, %s4723_s3 }
  0x21   :  { %p4730_p0 = por %p4729_p13, %p4728_p12 }
  0x23   :  { %p4731_p1 = pnand %p4730_p0, %p4724_p11 }
  0x25   :  { %4734 = shalt.err (!%p4731_p1)
}
  0x26   :  { %75 = dma.hbm_to_vmem [thread:$0]  %s5687_s7, 16, %s73_s28, [#allocation15]  }
  0x27   :  { %s4735_s16 = scalar_lea.hbm %s5689_s9, 16 }
  0x28   :  { %p4736_p2 = scmp.ne.s32.totalorder %s5689_s9, %s4735_s16  ;;  %p4739_p3 = scmp.lt.u32.totalorder %s4735_s16, %s5689_s9 }
  0x2a   :  { %p4741_p4 = pnand %p4739_p3, %p4736_p2 }
  0x2c   :  { %4744 = shalt.err (!%p4741_p4)
}
  0x2d   :  { %s4745_s21 = scalar_lea.vmem %s95_s15, 16  ;;  %s4749_s22 = scalar_lea.vmem %s95_s15, 32 }
  0x2e   :  { %p4746_p5 = scmp.ne.s32.totalorder %s95_s15, %s4745_s21  ;;  %p4750_p6 = scmp.lt.s32.totalorder %s95_s15, %s95_s15 }
  0x2f   :  { %p4751_p7 = scmp.lt.s32.totalorder %s4749_s22, %s4745_s21 }
  0x31   :  { %p4752_p8 = por %p4751_p7, %p4750_p6 }
  0x33   :  { %p4753_p9 = pnand %p4752_p8, %p4746_p5 }
  0x35   :  { %4756 = shalt.err (!%p4753_p9)
}
  0x36   :  { %97 = dma.hbm_to_vmem [thread:$0]  %s5689_s9, 16, %s95_s15, [#allocation18]  }
  0x37   :  { %s4882_s3 = smov [#allocation9]   ;;  %s4883_s25 = smov [#allocation13]  }
  0x38   :  { %s34_s30 = sshll.u32 %s4882_s3, 4  ;;  %s59_s26 = sshll.u32 %s4883_s25, 4  ;;  %s35_s30 = int_to_ptr.vmem [resolvable:$true] %s34_s30  ;;  %s60_s26 = int_to_ptr.vmem [resolvable:$true] %s59_s26 }
  0x39   :  { %s4757_s16 = scalar_lea.hbm %s5682_s2, 64 }
  0x3a   :  { %p4758_p10 = scmp.ne.s32.totalorder %s5682_s2, %s4757_s16  ;;  %p4761_p11 = scmp.lt.u32.totalorder %s4757_s16, %s5682_s2 }
  0x3c   :  { %p4763_p12 = pnand %p4761_p11, %p4758_p10 }
  0x3e   :  { %4766 = shalt.err (!%p4763_p12)
}
  0x3f   :  { %s4767_s9 = scalar_lea.vmem %s35_s30, 64  ;;  %p4772_p0 = scmp.lt.s32.totalorder %s35_s30, %s35_s30 }
  0x40   :  { %p4768_p13 = scmp.ne.s32.totalorder %s35_s30, %s4767_s9  ;;  %p4773_p1 = scmp.lt.s32.totalorder %s4767_s9, %s4767_s9 }
  0x42   :  { %p4774_p2 = por %p4773_p1, %p4772_p0 }
  0x44   :  { %p4775_p3 = pnand %p4774_p2, %p4768_p13 }
  0x46   :  { %4778 = shalt.err (!%p4775_p3)
}
  0x47   :  { %37 = dma.hbm_to_vmem [thread:$0]  %s5682_s2, 64, %s35_s30, [#allocation10]  }
  0x48   :  { %s4779_s28 = scalar_lea.hbm %s5686_s6, 512 }
  0x49   :  { %p4780_p4 = scmp.ne.s32.totalorder %s5686_s6, %s4779_s28  ;;  %p4783_p5 = scmp.lt.u32.totalorder %s4779_s28, %s5686_s6 }
  0x4b   :  { %p4785_p6 = pnand %p4783_p5, %p4780_p4 }
  0x4d   :  { %4788 = shalt.err (!%p4785_p6)
}
  0x4e   :  { %s4789_s16 = scalar_lea.vmem %s60_s26, 512  ;;  %p4794_p8 = scmp.lt.s32.totalorder %s60_s26, %s60_s26 }
  0x4f   :  { %p4790_p7 = scmp.ne.s32.totalorder %s60_s26, %s4789_s16  ;;  %p4795_p9 = scmp.lt.s32.totalorder %s4789_s16, %s4789_s16 }
  0x51   :  { %p4796_p10 = por %p4795_p9, %p4794_p8 }
  0x53   :  { %p4797_p11 = pnand %p4796_p10, %p4790_p7 }
  0x55   :  { %4800 = shalt.err (!%p4797_p11)
}
  0x56   :  { %65 = dma.hbm_to_vmem [thread:$0]  %s5686_s6, 512, %s60_s26, [#allocation12], %s4878_s23, %s4878_s23, %s4879_s24  }
  0x57   :  { %s4884_s17 = smov [#allocation16]   ;;  %s4885_s19 = smov [#allocation19]  }
  0x58   :  { %s81_s18 = sshll.u32 %s4884_s17, 4  ;;  %s106_s20 = sshll.u32 %s4885_s19, 4  ;;  %s82_s18 = int_to_ptr.vmem [resolvable:$true] %s81_s18  ;;  %s107_s20 = int_to_ptr.vmem [resolvable:$true] %s106_s20 }
  0x59   :  { %s4801_s21 = scalar_lea.hbm %s5688_s8, 640 }
  0x5a   :  { %p4802_p12 = scmp.ne.s32.totalorder %s5688_s8, %s4801_s21  ;;  %p4805_p13 = scmp.lt.u32.totalorder %s4801_s21, %s5688_s8 }
  0x5c   :  { %p4807_p0 = pnand %p4805_p13, %p4802_p12 }
  0x5e   :  { %4810 = shalt.err (!%p4807_p0)
}
  0x5f   :  { %s4811_s6 = scalar_lea.vmem %s82_s18, 640  ;;  %p4816_p2 = scmp.lt.s32.totalorder %s82_s18, %s82_s18 }
  0x60   :  { %p4812_p1 = scmp.ne.s32.totalorder %s82_s18, %s4811_s6  ;;  %p4817_p3 = scmp.lt.s32.totalorder %s4811_s6, %s4811_s6 }
  0x62   :  { %p4818_p4 = por %p4817_p3, %p4816_p2 }
  0x64   :  { %p4819_p5 = pnand %p4818_p4, %p4812_p1 }
  0x66   :  { %4822 = shalt.err (!%p4819_p5)
}
  0x67   :  { %87 = dma.hbm_to_vmem [thread:$0]  %s5688_s8, 640, %s82_s18, [#allocation15], %s4878_s23, %s4878_s23, %s4879_s24  }
  0x68   :  { %s4823_s16 = scalar_lea.hbm %s5691_s11, 16 }
  0x69   :  { %p4824_p6 = scmp.ne.s32.totalorder %s5691_s11, %s4823_s16  ;;  %p4827_p7 = scmp.lt.u32.totalorder %s4823_s16, %s5691_s11 }
  0x6b   :  { %p4829_p8 = pnand %p4827_p7, %p4824_p6 }
  0x6d   :  { %4832 = shalt.err (!%p4829_p8)
}
  0x6e   :  { %s4833_s9 = scalar_lea.vmem %s107_s20, 16  ;;  %s4837_s15 = scalar_lea.vmem %s107_s20, 32 }
  0x6f   :  { %p4834_p9 = scmp.ne.s32.totalorder %s107_s20, %s4833_s9  ;;  %p4838_p10 = scmp.lt.s32.totalorder %s107_s20, %s107_s20 }
  0x70   :  { %p4839_p11 = scmp.lt.s32.totalorder %s4837_s15, %s4833_s9 }
  0x72   :  { %p4840_p12 = por %p4839_p11, %p4838_p10 }
  0x74   :  { %p4841_p13 = pnand %p4840_p12, %p4834_p9 }
  0x76   :  { %4844 = shalt.err (!%p4841_p13)
}
  0x77   :  { %109 = dma.hbm_to_vmem [thread:$0]  %s5691_s11, 16, %s107_s20, [#allocation18]  }
  0x78   :  { %s4886_s18 = smov [#allocation20]   ;;  %s4845_s28 = scalar_lea.hbm %s5693_s13, 16 }
  0x79   :  { %s118_s21 = sshll.u32 %s4886_s18, 4  ;;  %p4846_p0 = scmp.ne.s32.totalorder %s5693_s13, %s4845_s28  ;;  %s119_s21 = int_to_ptr.vmem [resolvable:$true] %s118_s21 }
  0x7a   :  { %p4849_p1 = scmp.lt.u32.totalorder %s4845_s28, %s5693_s13 }
  0x7c   :  { %p4851_p2 = pnand %p4849_p1, %p4846_p0 }
  0x7e   :  { %4854 = shalt.err (!%p4851_p2)
}
  0x7f   :  { %s4855_s27 = scalar_lea.vmem %s119_s21, 16  ;;  %s4859_s11 = scalar_lea.vmem %s119_s21, 32 }
  0x80   :  { %p4856_p3 = scmp.ne.s32.totalorder %s119_s21, %s4855_s27  ;;  %p4860_p4 = scmp.lt.s32.totalorder %s119_s21, %s119_s21 }
  0x81   :  { %p4861_p5 = scmp.lt.s32.totalorder %s4859_s11, %s4855_s27 }
  0x83   :  { %p4862_p6 = por %p4861_p5, %p4860_p4 }
  0x85   :  { %p4863_p7 = pnand %p4862_p6, %p4856_p3 }
  0x87   :  { %4866 = shalt.err (!%p4863_p7)
}
  0x88   :  { %121 = dma.hbm_to_vmem [thread:$0]  %s5693_s13, 16, %s119_s21, [#allocation21]  }
  0x89   :  { %4867 = dma.done.wait [#allocation10], 64  }
  0x8a   :  { %4868 = vsyncadd [#allocation10], 4294967232 }
  0x8b   :  { %4869 = dma.done.wait [#allocation12], 1024  }
  0x8c   :  { %4870 = vsyncadd [#allocation12], 4294966272 }
  0x8d   :  { %4871 = dma.done.wait [#allocation15], 656  }
  0x8e   :  { %4872 = vsyncadd [#allocation15], 4294966640 }
  0x8f   :  { %4873 = dma.done.wait [#allocation18], 32  }
  0x90   :  { %4874 = vsyncadd [#allocation18], 4294967264 }
  0x91   :  { %4875 = dma.done.wait [#allocation21], 16  }
  0x92   :  { %4876 = vsyncadd [#allocation21], 4294967280  ;;  %v4887_v0 = vmov 0.0|0.0   ;;  %vm146_vm0 = vcmask 254976   ;;  %vm4888_vm1 = vmmov 0   ;;  %v4889_v1 = vmov 0.0  }
  0x93   :  { %4283 = vmatprep.subr.bf16.mxu1 %v4887_v0  ;;  %3932 = vmatprep.mubr.msk.f32.mxu1 %vm4888_vm1, %v4889_v1  ;;  %147 = vst.msk [vmem:[#allocation5] sm:$0x3] %vm146_vm0, %v4889_v1  ;;  %148 = vst.msk [vmem:[#allocation7] sm:$0x3] %vm146_vm0, %v4889_v1  ;;  %vm168_vm2 = vcmask 1043456   ;;  %vm161_vm3 = vcmask 31744  }
  0x94   :  { %149 = vst.msk [vmem:[#allocation6] sm:$0x3] %vm146_vm0, %v4889_v1  ;;  %150 = vst.msk [vmem:[#allocation8] sm:$0x3] %vm146_vm0, %v4889_v1  ;;  %v153_v2 = vld [vmem:[#allocation9] sm:$0xf] }
  0x95   :  { %v151_v3 = vld [vmem:[%s5680_s0] sm:$0xff]  ;;  %v152_v4 = vld [vmem:[%s5680_s0 + $0x8] sm:$0xff]  ;;  %3919 = vmatprep.subr.msk.mxu0 %vm168_vm2, %v153_v2  ;;  %v253_v6 = vld [vmem:[#allocation11 + $0x8] sm:$0xff]  ;;  %vm256_vm4 = vcmask 261120   ;;  %s4890_s19 = smov 64   ;;  %s4891_s9 = smov 32  }
  0x96   :  { %3921 = vmatprep.mubr.msk.f32.mxu0 %vm161_vm3, %v151_v3  ;;  %v252_v5 = vld [vmem:[#allocation11] sm:$0xff]  ;;  %v254_v7 = vld [vmem:[#allocation11 + $0x10] sm:$0xff]  ;;  %3920 = vmatpush3.msk.msra.mxu0 %vm168_vm2, %v153_v2  ;;  %v255_v9 = vld [vmem:[#allocation11 + $0x18] sm:$0xff]  ;;  %vm2259_vm5 = vcmask 58368   ;;  %vm2268_vm6 = vcmask 64512   ;;  %vm2282_vm7 = vcmask 326656  }
  0x97   :  { %v5090_v8 = vpack.c.bf16 %v253_v6, %v252_v5  ;;  %3922 = vmatmul.mubr.msk.f32.vlgmr.msra.gmra.mrb[0].mxu0 %vm161_vm3, %v152_v4  ;;  %4289 = vmatprep.subr.bf16.mxu0 %v4887_v0  ;;  %v5094_v10 = vpack.c.bf16 %v255_v9, %v254_v7  ;;  %v3676_v12 = vld [vmem:[%s5684_s4] ss:$0 sm:$0xff]  ;;  %s4892_s4 = smov 96   ;;  %vm2416_vm8 = vcmask 523264  }
  0x98   :  { %3943 = vmatprep.mubr.msk.f32.mxu0 %vm4888_vm1, %v4889_v1 }
  0x99   :  { %4285 = vmatpush3.bf16.msra.mxu1 %v5090_v8  ;;  %4291 = vmatpush3.bf16.msra.mxu0 %v5090_v8 }
  0x9a   :  { %4286 = vmatprep.subr.bf16.mxu1 %v4887_v0  ;;  %4292 = vmatprep.subr.bf16.mxu0 %v4887_v0  ;;  %v249_v11 = vld [vmem:[#allocation5] sm:$0x3]  ;;  %v250_v22 = vld [vmem:[#allocation7] sm:$0x3] }
  0x9d   :  { %4288 = vmatpush3.bf16.msra.mxu1 %v5094_v10  ;;  %4294 = vmatpush3.bf16.msra.mxu0 %v5094_v10 }
  0x9e   :  { %4295 = vmatprep.subr.bf16.mxu1 %v4887_v0  ;;  %4301 = vmatprep.subr.bf16.mxu0 %v4887_v0 }
  0xa0   :  { %3933 = vmatmul.mubr.msk.f32.vlgmr.msra.gmra.mrb[0].mxu1 %vm256_vm4, %v249_v11 }
  0xa1   :  { %4297 = vmatpush3.bf16.msra.mxu1 %v5090_v8  ;;  %3954 = vmatprep.mubr.msk.f32.mxu1 %vm4888_vm1, %v4889_v1 }
  0xa2   :  { %4298 = vmatprep.subr.bf16.mxu1 %v4887_v0 }
  0xa5   :  { %4300 = vmatpush3.bf16.msra.mxu1 %v5094_v10 }
  0xa6   :  { %4307 = vmatprep.subr.bf16.mxu1 %v4887_v0 }
 0x16a   :  { %v3923_v13 = vpop.f32.mrb[0].mxu0 }
 0x16b   :  { %v244_v14 = vadd.f32 %v3923_v13, %v3676_v12  ;;  %v238_v15 = vpop.f32.mrb[1].mxu0 }
 0x16c   :  { %v239_v16 = vadd.f32 %v3676_v12, %v238_v15 }
 0x16d   :  { %248 = vst [vmem:[#allocation2 + $0x8] sm:$0xff] %v244_v14 }
 0x16e   :  { %247 = vst [vmem:[#allocation2] sm:$0xff] %v239_v16 }
 0x173   :  { %v326_v17 = vpop.f32.mrb[0].mxu1 }
 0x174   :  { %v3934_v18 = vpop.f32.mrb[1].mxu1 }
 0x175   :  { %v251_v19 = vld [vmem:[#allocation2] sm:$0x3]  ;;  %v372_v40 = vld [vmem:[#allocation2 + $0x2] sm:$0x3]  ;;  %v492_v62 = vld [vmem:[#allocation2 + $0x4] sm:$0x3] }
 0x176   :  { %v330_v20 = vadd.f32 %v326_v17, %v251_v19 }
 0x178   :  { %4499 = vtanh.f32 %v330_v20  ;;  %v3681_v23 = vmul.f32 -1.442695, %v330_v20 }
 0x17a   :  { %4501 = vpow2.f32 %v3681_v23 }
 0x182   :  { %v4500_v21 = vpop.eup %4499 }
 0x183   :  { %344 = vrot.lane.b32.xlu0 %v4500_v21, %s4890_s19 }
 0x184   :  { %v4502_v24 = vpop.eup %4501 }
 0x185   :  { %v334_v25 = vadd.f32 1.0, %v4502_v24  ;;  %v612_v24 = vld [vmem:[#allocation2 + $0x6] sm:$0x3] }
 0x187   :  { %339 = vrot.lane.b32.xlu0 %v250_v22, %s4891_s9  ;;  %4503 = vrcp.f32 %v334_v25 }
 0x191   :  { %v4504_v26 = vpop.eup %4503 }
 0x1f5   :  { %v345_v27 = vpop.permute.xlu0 %344 }
 0x1f6   :  { %v347_v28 = vmul.f32 %v4504_v26, %v345_v27 }
 0x1f8   :  { %349 = vrot.lane.b32.xlu1 %v347_v28, %s4891_s9 }
 0x1f9   :  { %v340_v29 = vpop.permute.xlu0 %339 }
 0x1fa   :  { %v342_v30 = vmul.f32 %v4504_v26, %v340_v29 }
 0x26a   :  { %v350_v31 = vpop.permute.xlu1 %349 }
 0x26b   :  { %v352_v32 = vadd.f32 %v350_v31, %v342_v30 }
 0x26d   :  { %4505 = vtanh.f32 %v352_v32 }
 0x277   :  { %v4506_v33 = vpop.eup %4505 }
 0x278   :  { %355 = vrot.lane.b32.xlu1 %v4506_v33, %s4890_s19 }
 0x27c   :  { %365 = vrot.lane.b32.xlu1 %v352_v32, %s4892_s4 }
 0x2ea   :  { %v356_v34 = vpop.permute.xlu1 %355 }
 0x2eb   :  { %v358_v35 = vmul.f32 %v4504_v26, %v356_v34 }
 0x2ed   :  { %360 = vrot.lane.b32.xlu0 %v358_v35, %s4891_s9 }
 0x2ee   :  { %v366_v36 = vpop.permute.xlu1 %365 }
 0x2ef   :  { %368 = vst.msk [vmem:[#allocation7] sm:$0x3] %vm146_vm0, %v366_v36 }
 0x2f6   :  { %v371_v37 = vld [vmem:[#allocation7] sm:$0x3] }
 0x2f7   :  { %459 = vrot.lane.b32.xlu1 %v371_v37, %s4891_s9 }
 0x35f   :  { %v361_v38 = vpop.permute.xlu0 %360 }
 0x360   :  { %363 = vst.msk [vmem:[#allocation5] sm:$0x3] %vm146_vm0, %v361_v38  ;;  %369 = vst.msk [vmem:[#allocation3] sm:$0x3] %vm146_vm0, %v361_v38 }
 0x367   :  { %v370_v39 = vld [vmem:[#allocation5] sm:$0x3] }
 0x368   :  { %3944 = vmatmul.mubr.msk.f32.vlgmr.msra.gmra.mrb[2].mxu0 %vm256_vm4, %v370_v39 }
 0x369   :  { %4303 = vmatpush3.bf16.msra.mxu0 %v5090_v8  ;;  %3965 = vmatprep.mubr.msk.f32.mxu0 %vm4888_vm1, %v4889_v1  ;;  %v460_v51 = vpop.permute.xlu1 %459 }
 0x36a   :  { %4304 = vmatprep.subr.bf16.mxu0 %v4887_v0 }
 0x36d   :  { %4306 = vmatpush3.bf16.msra.mxu0 %v5094_v10 }
 0x36e   :  { %4313 = vmatprep.subr.bf16.mxu0 %v4887_v0 }
 0x43b   :  { %v446_v41 = vpop.f32.mrb[2].mxu0 }
 0x43c   :  { %v450_v42 = vadd.f32 %v446_v41, %v372_v40  ;;  %v3945_v43 = vpop.f32.mrb[3].mxu0 }
 0x43e   :  { %4507 = vtanh.f32 %v450_v42  ;;  %v3683_v45 = vmul.f32 -1.442695, %v450_v42 }
 0x440   :  { %4509 = vpow2.f32 %v3683_v45 }
 0x448   :  { %v4508_v44 = vpop.eup %4507 }
 0x449   :  { %464 = vrot.lane.b32.xlu0 %v4508_v44, %s4890_s19 }
 0x44a   :  { %v4510_v46 = vpop.eup %4509 }
 0x44b   :  { %v454_v47 = vadd.f32 1.0, %v4510_v46  ;;  %v732_v46 = vld [vmem:[#allocation2 + $0x8] sm:$0x3] }
 0x44d   :  { %4511 = vrcp.f32 %v454_v47 }
 0x457   :  { %v4512_v48 = vpop.eup %4511 }
 0x458   :  { %v462_v52 = vmul.f32 %v4512_v48, %v460_v51 }
 0x4bb   :  { %v465_v49 = vpop.permute.xlu0 %464 }
 0x4bc   :  { %v467_v50 = vmul.f32 %v4512_v48, %v465_v49 }
 0x4be   :  { %469 = vrot.lane.b32.xlu0 %v467_v50, %s4891_s9 }
 0x530   :  { %v470_v53 = vpop.permute.xlu0 %469 }
 0x531   :  { %v472_v54 = vadd.f32 %v470_v53, %v462_v52 }
 0x533   :  { %4513 = vtanh.f32 %v472_v54 }
 0x53d   :  { %v4514_v55 = vpop.eup %4513 }
 0x53e   :  { %475 = vrot.lane.b32.xlu1 %v4514_v55, %s4890_s19 }
 0x542   :  { %485 = vrot.lane.b32.xlu1 %v472_v54, %s4892_s4 }
 0x5b0   :  { %v476_v56 = vpop.permute.xlu1 %475 }
 0x5b1   :  { %v478_v57 = vmul.f32 %v4512_v48, %v476_v56 }
 0x5b3   :  { %480 = vrot.lane.b32.xlu0 %v478_v57, %s4891_s9 }
 0x5b4   :  { %v486_v58 = vpop.permute.xlu1 %485 }
 0x5b5   :  { %488 = vst.msk [vmem:[#allocation7] sm:$0x3] %vm146_vm0, %v486_v58 }
 0x5bc   :  { %v491_v59 = vld [vmem:[#allocation7] sm:$0x3] }
 0x5bd   :  { %579 = vrot.lane.b32.xlu1 %v491_v59, %s4891_s9 }
 0x625   :  { %v481_v60 = vpop.permute.xlu0 %480 }
 0x626   :  { %483 = vst.msk [vmem:[#allocation5] sm:$0x3] %vm146_vm0, %v481_v60  ;;  %489 = vst.msk [vmem:[#allocation3 + $0x2] sm:$0x3] %vm146_vm0, %v481_v60 }
 0x62d   :  { %v490_v61 = vld [vmem:[#allocation5] sm:$0x3] }
 0x62e   :  { %3955 = vmatmul.mubr.msk.f32.vlgmr.msra.gmra.mrb[2].mxu1 %vm256_vm4, %v490_v61 }
 0x62f   :  { %4309 = vmatpush3.bf16.msra.mxu1 %v5090_v8  ;;  %3976 = vmatprep.mubr.msk.f32.mxu1 %vm4888_vm1, %v4889_v1  ;;  %v580_v13 = vpop.permute.xlu1 %579 }
 0x630   :  { %4310 = vmatprep.subr.bf16.mxu1 %v4887_v0 }
 0x633   :  { %4312 = vmatpush3.bf16.msra.mxu1 %v5094_v10 }
 0x634   :  { %4319 = vmatprep.subr.bf16.mxu1 %v4887_v0 }
 0x701   :  { %v566_v63 = vpop.f32.mrb[2].mxu1 }
 0x702   :  { %v570_v2 = vadd.f32 %v566_v63, %v492_v62  ;;  %v3956_v3 = vpop.f32.mrb[3].mxu1 }
 0x704   :  { %4515 = vtanh.f32 %v570_v2  ;;  %v3685_v5 = vmul.f32 -1.442695, %v570_v2 }
 0x706   :  { %4517 = vpow2.f32 %v3685_v5 }
 0x70e   :  { %v4516_v4 = vpop.eup %4515 }
 0x70f   :  { %584 = vrot.lane.b32.xlu0 %v4516_v4, %s4890_s19 }
 0x710   :  { %v4518_v6 = vpop.eup %4517 }
 0x711   :  { %v574_v7 = vadd.f32 1.0, %v4518_v6  ;;  %v852_v6 = vld [vmem:[#allocation2 + $0xa] sm:$0x3] }
 0x713   :  { %4519 = vrcp.f32 %v574_v7 }
 0x71d   :  { %v4520_v9 = vpop.eup %4519 }
 0x71e   :  { %v582_v14 = vmul.f32 %v4520_v9, %v580_v13 }
 0x781   :  { %v585_v11 = vpop.permute.xlu0 %584 }
 0x782   :  { %v587_v12 = vmul.f32 %v4520_v9, %v585_v11 }
 0x784   :  { %589 = vrot.lane.b32.xlu0 %v587_v12, %s4891_s9 }
 0x7f6   :  { %v590_v15 = vpop.permute.xlu0 %589 }
 0x7f7   :  { %v592_v16 = vadd.f32 %v590_v15, %v582_v14 }
 0x7f9   :  { %4521 = vtanh.f32 %v592_v16 }
 0x803   :  { %v4522_v17 = vpop.eup %4521 }
 0x804   :  { %595 = vrot.lane.b32.xlu1 %v4522_v17, %s4890_s19 }
 0x808   :  { %605 = vrot.lane.b32.xlu1 %v592_v16, %s4892_s4 }
 0x876   :  { %v596_v18 = vpop.permute.xlu1 %595 }
 0x877   :  { %v598_v19 = vmul.f32 %v4520_v9, %v596_v18 }
 0x879   :  { %600 = vrot.lane.b32.xlu0 %v598_v19, %s4891_s9 }
 0x87a   :  { %v606_v20 = vpop.permute.xlu1 %605 }
 0x87b   :  { %608 = vst.msk [vmem:[#allocation7] sm:$0x3] %vm146_vm0, %v606_v20 }
 0x882   :  { %v611_v21 = vld [vmem:[#allocation7] sm:$0x3] }
 0x883   :  { %699 = vrot.lane.b32.xlu1 %v611_v21, %s4891_s9 }
 0x8eb   :  { %v601_v22 = vpop.permute.xlu0 %600 }
 0x8ec   :  { %603 = vst.msk [vmem:[#allocation5] sm:$0x3] %vm146_vm0, %v601_v22  ;;  %609 = vst.msk [vmem:[#allocation3 + $0x4] sm:$0x3] %vm146_vm0, %v601_v22 }
 0x8f3   :  { %v610_v23 = vld [vmem:[#allocation5] sm:$0x3] }
 0x8f4   :  { %3966 = vmatmul.mubr.msk.f32.vlgmr.msra.gmra.mrb[4].mxu0 %vm256_vm4, %v610_v23 }
 0x8f5   :  { %4315 = vmatpush3.bf16.msra.mxu0 %v5090_v8  ;;  %3987 = vmatprep.mubr.msk.f32.mxu0 %vm4888_vm1, %v4889_v1  ;;  %v700_v35 = vpop.permute.xlu1 %699 }
 0x8f6   :  { %4316 = vmatprep.subr.bf16.mxu0 %v4887_v0 }
 0x8f9   :  { %4318 = vmatpush3.bf16.msra.mxu0 %v5094_v10 }
 0x8fa   :  { %4325 = vmatprep.subr.bf16.mxu0 %v4887_v0 }
 0x9c7   :  { %v686_v25 = vpop.f32.mrb[4].mxu0 }
 0x9c8   :  { %v690_v26 = vadd.f32 %v686_v25, %v612_v24  ;;  %v3967_v27 = vpop.f32.mrb[5].mxu0 }
 0x9ca   :  { %4523 = vtanh.f32 %v690_v26  ;;  %v3687_v29 = vmul.f32 -1.442695, %v690_v26 }
 0x9cc   :  { %4525 = vpow2.f32 %v3687_v29  ;;  %v972_v29 = vld [vmem:[#allocation2 + $0xc] sm:$0x3] }
 0x9d4   :  { %v4524_v28 = vpop.eup %4523 }
 0x9d5   :  { %704 = vrot.lane.b32.xlu0 %v4524_v28, %s4890_s19 }
 0x9d6   :  { %v4526_v30 = vpop.eup %4525 }
 0x9d7   :  { %v694_v31 = vadd.f32 1.0, %v4526_v30 }
 0x9d9   :  { %4527 = vrcp.f32 %v694_v31 }
 0x9e3   :  { %v4528_v32 = vpop.eup %4527 }
 0x9e4   :  { %v702_v36 = vmul.f32 %v4528_v32, %v700_v35 }
 0xa47   :  { %v705_v33 = vpop.permute.xlu0 %704 }
 0xa48   :  { %v707_v34 = vmul.f32 %v4528_v32, %v705_v33 }
 0xa4a   :  { %709 = vrot.lane.b32.xlu0 %v707_v34, %s4891_s9 }
 0xabc   :  { %v710_v37 = vpop.permute.xlu0 %709 }
 0xabd   :  { %v712_v38 = vadd.f32 %v710_v37, %v702_v36 }
 0xabf   :  { %4529 = vtanh.f32 %v712_v38 }
 0xac9   :  { %v4530_v39 = vpop.eup %4529 }
 0xaca   :  { %715 = vrot.lane.b32.xlu1 %v4530_v39, %s4890_s19 }
 0xace   :  { %725 = vrot.lane.b32.xlu1 %v712_v38, %s4892_s4 }
 0xb3c   :  { %v716_v40 = vpop.permute.xlu1 %715 }
 0xb3d   :  { %v718_v41 = vmul.f32 %v4528_v32, %v716_v40 }
 0xb3f   :  { %720 = vrot.lane.b32.xlu0 %v718_v41, %s4891_s9 }
 0xb40   :  { %v726_v42 = vpop.permute.xlu1 %725 }
 0xb41   :  { %728 = vst.msk [vmem:[#allocation7] sm:$0x3] %vm146_vm0, %v726_v42 }
 0xb48   :  { %v731_v43 = vld [vmem:[#allocation7] sm:$0x3] }
 0xb49   :  { %819 = vrot.lane.b32.xlu1 %v731_v43, %s4891_s9 }
 0xbb1   :  { %v721_v44 = vpop.permute.xlu0 %720 }
 0xbb2   :  { %723 = vst.msk [vmem:[#allocation5] sm:$0x3] %vm146_vm0, %v721_v44  ;;  %729 = vst.msk [vmem:[#allocation3 + $0x6] sm:$0x3] %vm146_vm0, %v721_v44 }
 0xbb9   :  { %v730_v45 = vld [vmem:[#allocation5] sm:$0x3]  ;;  %v1210_v28 = vld [vmem:[#allocation3] sm:$0xff] }
 0xbba   :  { %3977 = vmatmul.mubr.msk.f32.vlgmr.msra.gmra.mrb[4].mxu1 %vm256_vm4, %v730_v45 }
 0xbbb   :  { %4321 = vmatpush3.bf16.msra.mxu1 %v5090_v8  ;;  %3998 = vmatprep.mubr.msk.f32.mxu1 %vm4888_vm1, %v4889_v1  ;;  %v820_v57 = vpop.permute.xlu1 %819 }
 0xbbc   :  { %4322 = vmatprep.subr.bf16.mxu1 %v4887_v0 }
 0xbbf   :  { %4324 = vmatpush3.bf16.msra.mxu1 %v5094_v10 }
 0xc8d   :  { %v806_v47 = vpop.f32.mrb[4].mxu1 }
 0xc8e   :  { %v810_v48 = vadd.f32 %v806_v47, %v732_v46  ;;  %v3978_v49 = vpop.f32.mrb[5].mxu1 }
 0xc90   :  { %4531 = vtanh.f32 %v810_v48  ;;  %v3689_v51 = vmul.f32 -1.442695, %v810_v48 }
 0xc92   :  { %4533 = vpow2.f32 %v3689_v51  ;;  %v1092_v51 = vld [vmem:[#allocation2 + $0xe] sm:$0x3] }
 0xc9a   :  { %v4532_v50 = vpop.eup %4531 }
 0xc9b   :  { %824 = vrot.lane.b32.xlu0 %v4532_v50, %s4890_s19 }
 0xc9c   :  { %v4534_v52 = vpop.eup %4533 }
 0xc9d   :  { %v814_v53 = vadd.f32 1.0, %v4534_v52 }
 0xc9f   :  { %4535 = vrcp.f32 %v814_v53 }
 0xca9   :  { %v4536_v54 = vpop.eup %4535 }
 0xcaa   :  { %v822_v58 = vmul.f32 %v4536_v54, %v820_v57 }
 0xd0d   :  { %v825_v55 = vpop.permute.xlu0 %824 }
 0xd0e   :  { %v827_v56 = vmul.f32 %v4536_v54, %v825_v55 }
 0xd10   :  { %829 = vrot.lane.b32.xlu0 %v827_v56, %s4891_s9 }
 0xd82   :  { %v830_v59 = vpop.permute.xlu0 %829 }
 0xd83   :  { %v832_v60 = vadd.f32 %v830_v59, %v822_v58 }
 0xd85   :  { %4537 = vtanh.f32 %v832_v60 }
 0xd8f   :  { %v4538_v61 = vpop.eup %4537 }
 0xd90   :  { %835 = vrot.lane.b32.xlu1 %v4538_v61, %s4890_s19 }
 0xd94   :  { %845 = vrot.lane.b32.xlu1 %v832_v60, %s4892_s4 }
 0xe02   :  { %v836_v62 = vpop.permute.xlu1 %835 }
 0xe03   :  { %v838_v63 = vmul.f32 %v4536_v54, %v836_v62 }
 0xe05   :  { %840 = vrot.lane.b32.xlu0 %v838_v63, %s4891_s9 }
 0xe06   :  { %v846_v2 = vpop.permute.xlu1 %845 }
 0xe07   :  { %848 = vst.msk [vmem:[#allocation7] sm:$0x3] %vm146_vm0, %v846_v2 }
 0xe0e   :  { %v851_v3 = vld [vmem:[#allocation7] sm:$0x3] }
 0xe0f   :  { %939 = vrot.lane.b32.xlu1 %v851_v3, %s4891_s9 }
 0xe77   :  { %v841_v4 = vpop.permute.xlu0 %840 }
 0xe78   :  { %843 = vst.msk [vmem:[#allocation5] sm:$0x3] %vm146_vm0, %v841_v4  ;;  %849 = vst.msk [vmem:[#allocation3 + $0x8] sm:$0x3] %vm146_vm0, %v841_v4 }
 0xe7f   :  { %v850_v5 = vld [vmem:[#allocation5] sm:$0x3] }
 0xe80   :  { %3988 = vmatmul.mubr.msk.f32.vlgmr.msra.gmra.mrb[6].mxu0 %vm256_vm4, %v850_v5  ;;  %v1212_v5 = vld [vmem:[%s5685_s5] sm:$0xff] }
 0xe81   :  { %4327 = vmatpush3.bf16.msra.mxu0 %v5090_v8  ;;  %4009 = vmatprep.mubr.msk.f32.mxu0 %vm4888_vm1, %v4889_v1 }
 0xe82   :  { %4328 = vmatprep.subr.bf16.mxu0 %v4887_v0 }
 0xe85   :  { %4330 = vmatpush3.bf16.msra.mxu0 %v5094_v10  ;;  %v940_v10 = vpop.permute.xlu1 %939 }
 0xe86   :  { %4339 = vmatprep.subr.bf16.mxu0 %v4887_v0 }
 0xf53   :  { %v926_v7 = vpop.f32.mrb[6].mxu0 }
 0xf54   :  { %v930_v9 = vadd.f32 %v926_v7, %v852_v6  ;;  %v3989_v11 = vpop.f32.mrb[7].mxu0  ;;  %v1213_v6 = vld [vmem:[%s5685_s5 + $0x8] sm:$0xff] }
 0xf55   :  { %v4331_v7 = vpack.c.bf16 %v1213_v6, %v1212_v5  ;;  %v1215_v11 = vld [vmem:[%s5685_s5 + $0x18] sm:$0xff] }
 0xf56   :  { %4539 = vtanh.f32 %v930_v9  ;;  %v3691_v13 = vmul.f32 -1.442695, %v930_v9  ;;  %v1214_v9 = vld [vmem:[%s5685_s5 + $0x10] sm:$0xff] }
 0xf57   :  { %4332 = vmatprep.subr.bf16.mxu1 %v4331_v7 }
 0xf58   :  { %4541 = vpow2.f32 %v3691_v13  ;;  %v1309_v13 = vld [vmem:[#allocation13] sm:$0xff] }
 0xf60   :  { %v4540_v12 = vpop.eup %4539 }
 0xf61   :  { %944 = vrot.lane.b32.xlu0 %v4540_v12, %s4890_s19  ;;  %v4335_v12 = vpack.c.bf16 %v1215_v11, %v1214_v9 }
 0xf62   :  { %v4542_v8 = vpop.eup %4541 }
 0xf63   :  { %v934_v14 = vadd.f32 1.0, %v4542_v8  ;;  %v1310_v8 = vld [vmem:[#allocation13 + $0x8] sm:$0xff] }
 0xf65   :  { %4543 = vrcp.f32 %v934_v14  ;;  %v1311_v14 = vld [vmem:[#allocation13 + $0x10] sm:$0xff] }
 0xf6f   :  { %v4544_v15 = vpop.eup %4543 }
 0xf70   :  { %v942_v18 = vmul.f32 %v4544_v15, %v940_v10 }
 0xfd3   :  { %v945_v16 = vpop.permute.xlu0 %944 }
 0xfd4   :  { %v947_v17 = vmul.f32 %v4544_v15, %v945_v16  ;;  %v1312_v16 = vld [vmem:[#allocation13 + $0x18] sm:$0xff] }
 0xfd6   :  { %949 = vrot.lane.b32.xlu0 %v947_v17, %s4891_s9 }
0x1048   :  { %v950_v19 = vpop.permute.xlu0 %949 }
0x1049   :  { %v952_v20 = vadd.f32 %v950_v19, %v942_v18  ;;  %v5240_v18 = vpack.c.bf16 %v1312_v16, %v1311_v14  ;;  %v1307_v19 = vld [vmem:[#allocation8] sm:$0x3] }
0x104b   :  { %4545 = vtanh.f32 %v952_v20 }
0x1055   :  { %v4546_v21 = vpop.eup %4545 }
0x1056   :  { %955 = vrot.lane.b32.xlu1 %v4546_v21, %s4890_s19 }
0x105a   :  { %965 = vrot.lane.b32.xlu1 %v952_v20, %s4892_s4  ;;  %v1306_v20 = vld [vmem:[#allocation6] sm:$0x3] }
0x10c8   :  { %v956_v22 = vpop.permute.xlu1 %955 }
0x10c9   :  { %v958_v23 = vmul.f32 %v4544_v15, %v956_v22  ;;  %v5237_v15 = vpack.c.bf16 %v1310_v8, %v1309_v13 }
0x10cb   :  { %960 = vrot.lane.b32.xlu0 %v958_v23, %s4891_s9 }
0x10cc   :  { %v966_v24 = vpop.permute.xlu1 %965 }
0x10cd   :  { %968 = vst.msk [vmem:[#allocation7] sm:$0x3] %vm146_vm0, %v966_v24 }
0x10d4   :  { %v971_v25 = vld [vmem:[#allocation7] sm:$0x3] }
0x10d5   :  { %1059 = vrot.lane.b32.xlu1 %v971_v25, %s4891_s9  ;;  %v3696_v25 = vld [vmem:[#allocation14] ss:$0 sm:$0xff] }
0x113d   :  { %v961_v26 = vpop.permute.xlu0 %960 }
0x113e   :  { %963 = vst.msk [vmem:[#allocation5] sm:$0x3] %vm146_vm0, %v961_v26  ;;  %969 = vst.msk [vmem:[#allocation3 + $0xa] sm:$0x3] %vm146_vm0, %v961_v26 }
0x1145   :  { %v970_v27 = vld [vmem:[#allocation5] sm:$0x3] }
0x1146   :  { %3999 = vmatmul.mubr.msk.f32.vlgmr.msra.gmra.mrb[6].mxu1 %vm256_vm4, %v970_v27 }
0x1147   :  { %4020 = vmatprep.mubr.msk.f32.mxu1 %vm256_vm4, %v1210_v28  ;;  %v1060_v40 = vpop.permute.xlu1 %1059  ;;  %4334 = vmatpush3.bf16.msra.mxu1 %v4331_v7 }
0x1148   :  { %4336 = vmatprep.subr.bf16.mxu1 %v4335_v12 }
0x114b   :  { %4338 = vmatpush3.bf16.msra.mxu1 %v4335_v12 }
0x114c   :  { %4345 = vmatprep.subr.bf16.mxu1 %v4887_v0 }
0x1219   :  { %v1046_v30 = vpop.f32.mrb[6].mxu1 }
0x121a   :  { %v1050_v31 = vadd.f32 %v1046_v30, %v972_v29  ;;  %v4000_v32 = vpop.f32.mrb[7].mxu1 }
0x121c   :  { %4547 = vtanh.f32 %v1050_v31  ;;  %v3693_v34 = vmul.f32 -1.442695, %v1050_v31 }
0x121e   :  { %4549 = vpow2.f32 %v3693_v34 }
0x1226   :  { %v4548_v33 = vpop.eup %4547 }
0x1227   :  { %1064 = vrot.lane.b32.xlu0 %v4548_v33, %s4890_s19 }
0x1228   :  { %v4550_v35 = vpop.eup %4549 }
0x1229   :  { %v1054_v36 = vadd.f32 1.0, %v4550_v35 }
0x122b   :  { %4551 = vrcp.f32 %v1054_v36 }
0x1235   :  { %v4552_v37 = vpop.eup %4551 }
0x1236   :  { %v1062_v41 = vmul.f32 %v4552_v37, %v1060_v40 }
0x1299   :  { %v1065_v38 = vpop.permute.xlu0 %1064 }
0x129a   :  { %v1067_v39 = vmul.f32 %v4552_v37, %v1065_v38 }
0x129c   :  { %1069 = vrot.lane.b32.xlu0 %v1067_v39, %s4891_s9 }
0x130e   :  { %v1070_v42 = vpop.permute.xlu0 %1069 }
0x130f   :  { %v1072_v43 = vadd.f32 %v1070_v42, %v1062_v41 }
0x1311   :  { %4553 = vtanh.f32 %v1072_v43 }
0x131b   :  { %v4554_v44 = vpop.eup %4553 }
0x131c   :  { %1075 = vrot.lane.b32.xlu1 %v4554_v44, %s4890_s19 }
0x1320   :  { %1085 = vrot.lane.b32.xlu1 %v1072_v43, %s4892_s4 }
0x138e   :  { %v1076_v45 = vpop.permute.xlu1 %1075 }
0x138f   :  { %v1078_v46 = vmul.f32 %v4552_v37, %v1076_v45 }
0x1391   :  { %1080 = vrot.lane.b32.xlu0 %v1078_v46, %s4891_s9 }
0x1392   :  { %v1086_v47 = vpop.permute.xlu1 %1085 }
0x1393   :  { %1088 = vst.msk [vmem:[#allocation7] sm:$0x3] %vm146_vm0, %v1086_v47 }
0x139a   :  { %v1091_v48 = vld [vmem:[#allocation7] sm:$0x3] }
0x139b   :  { %1179 = vrot.lane.b32.xlu1 %v1091_v48, %s4891_s9 }
0x1403   :  { %v1081_v49 = vpop.permute.xlu0 %1080 }
0x1404   :  { %1083 = vst.msk [vmem:[#allocation5] sm:$0x3] %vm146_vm0, %v1081_v49  ;;  %1089 = vst.msk [vmem:[#allocation3 + $0xc] sm:$0x3] %vm146_vm0, %v1081_v49 }
0x140b   :  { %v1090_v50 = vld [vmem:[#allocation5] sm:$0x3] }
0x140c   :  { %4010 = vmatmul.mubr.msk.f32.vlgmr.msra.gmra.mrb[8].mxu0 %vm256_vm4, %v1090_v50 }
0x140d   :  { %4031 = vmatprep.mubr.msk.f32.mxu0 %vm4888_vm1, %v4889_v1  ;;  %v1180_v62 = vpop.permute.xlu1 %1179  ;;  %4341 = vmatpush3.bf16.msra.mxu0 %v5237_v15 }
0x140e   :  { %4342 = vmatprep.subr.bf16.mxu0 %v4887_v0 }
0x1411   :  { %4344 = vmatpush3.bf16.msra.mxu0 %v5240_v18 }
0x1412   :  { %4351 = vmatprep.subr.bf16.mxu0 %v4887_v0 }
0x1414   :  { %4032 = vmatmul.mubr.msk.f32.vlgmr.msra.gmra.mrb[10].mxu0 %vm256_vm4, %v1306_v20 }
0x1415   :  { %4353 = vmatpush3.bf16.msra.mxu0 %v5237_v15  ;;  %4053 = vmatprep.mubr.msk.f32.mxu0 %vm4888_vm1, %v4889_v1 }
0x1416   :  { %4354 = vmatprep.subr.bf16.mxu0 %v4887_v0 }
0x1419   :  { %4356 = vmatpush3.bf16.msra.mxu0 %v5240_v18 }
0x141a   :  { %4363 = vmatprep.subr.bf16.mxu0 %v4887_v0 }
0x14df   :  { %v1166_v52 = vpop.f32.mrb[8].mxu0 }
0x14e0   :  { %v1170_v53 = vadd.f32 %v1166_v52, %v1092_v51  ;;  %v4011_v54 = vpop.f32.mrb[9].mxu0 }
0x14e2   :  { %4555 = vtanh.f32 %v1170_v53  ;;  %v3695_v56 = vmul.f32 -1.442695, %v1170_v53 }
0x14e4   :  { %4557 = vpow2.f32 %v3695_v56 }
0x14e7   :  { %v1382_v23 = vpop.f32.mrb[10].mxu0 }
0x14e8   :  { %v4033_v24 = vpop.f32.mrb[11].mxu0 }
0x14ec   :  { %v4556_v55 = vpop.eup %4555 }
0x14ed   :  { %1184 = vrot.lane.b32.xlu0 %v4556_v55, %s4890_s19 }
0x14ee   :  { %v4558_v57 = vpop.eup %4557 }
0x14ef   :  { %v1174_v58 = vadd.f32 1.0, %v4558_v57 }
0x14f1   :  { %4559 = vrcp.f32 %v1174_v58 }
0x14fb   :  { %v4560_v59 = vpop.eup %4559 }
0x14fc   :  { %v1182_v63 = vmul.f32 %v4560_v59, %v1180_v62 }
0x155f   :  { %v1185_v60 = vpop.permute.xlu0 %1184 }
0x1560   :  { %v1187_v61 = vmul.f32 %v4560_v59, %v1185_v60 }
0x1562   :  { %1189 = vrot.lane.b32.xlu0 %v1187_v61, %s4891_s9 }
0x15d4   :  { %v1190_v2 = vpop.permute.xlu0 %1189 }
0x15d5   :  { %v5220_v3 = vadd.f32 %v1190_v2, %v1182_v63 }
0x15d7   :  { %4561 = vtanh.f32 %v5220_v3 }
0x15e1   :  { %v4562_v4 = vpop.eup %4561 }
0x15e2   :  { %1195 = vrot.lane.b32.xlu1 %v4562_v4, %s4890_s19 }
0x1654   :  { %v1196_v17 = vpop.permute.xlu1 %1195 }
0x1655   :  { %v1198_v10 = vmul.f32 %v4560_v59, %v1196_v17 }
0x1657   :  { %1200 = vrot.lane.b32.xlu0 %v1198_v10, %s4891_s9 }
0x165b   :  { %1395 = vrot.lane.b32.xlu0 %v1307_v19, %s4891_s9 }
0x16c9   :  { %v1201_v21 = vpop.permute.xlu0 %1200 }
0x16ca   :  { %1203 = vst.msk [vmem:[#allocation5] sm:$0x3] %vm146_vm0, %v1201_v21  ;;  %1209 = vst.msk [vmem:[#allocation3 + $0xe] sm:$0x3] %vm146_vm0, %v1201_v21 }
0x16cd   :  { %v1396_v39 = vpop.permute.xlu0 %1395 }
0x16d1   :  { %v1211_v22 = vld [vmem:[#allocation3 + $0x8] sm:$0xff] }
0x16d2   :  { %4021 = vmatmul.mubr.msk.f32.vlgmr.msra.gmra.mrb[8].mxu1 %vm256_vm4, %v1211_v22 }
0x16d3   :  { %4347 = vmatpush3.bf16.msra.mxu1 %v5237_v15  ;;  %4042 = vmatprep.mubr.msk.f32.mxu1 %vm4888_vm1, %v4889_v1 }
0x16d4   :  { %4348 = vmatprep.subr.bf16.mxu1 %v4887_v0 }
0x16d7   :  { %4350 = vmatpush3.bf16.msra.mxu1 %v5240_v18 }
0x16d8   :  { %4357 = vmatprep.subr.bf16.mxu1 %v4887_v0 }
0x17a5   :  { %v4022_v26 = vpop.f32.mrb[8].mxu1 }
0x17a6   :  { %v1301_v27 = vadd.f32 %v4022_v26, %v3696_v25  ;;  %v1295_v28 = vpop.f32.mrb[9].mxu1 }
0x17a7   :  { %v1296_v29 = vadd.f32 %v3696_v25, %v1295_v28 }
0x17a8   :  { %1305 = vst [vmem:[#allocation2 + $0x8] sm:$0xff] %v1301_v27 }
0x17a9   :  { %1304 = vst [vmem:[#allocation2] sm:$0xff] %v1296_v29 }
0x17b0   :  { %v1308_v30 = vld [vmem:[#allocation2] sm:$0x3]  ;;  %v1427_v50 = vld [vmem:[#allocation2 + $0x2] sm:$0x3]  ;;  %v1546_v13 = vld [vmem:[#allocation2 + $0x4] sm:$0x3] }
0x17b1   :  { %v1386_v31 = vadd.f32 %v1382_v23, %v1308_v30 }
0x17b3   :  { %4563 = vtanh.f32 %v1386_v31  ;;  %v3700_v33 = vmul.f32 -1.442695, %v1386_v31 }
0x17b5   :  { %4565 = vpow2.f32 %v3700_v33 }
0x17bd   :  { %v4564_v32 = vpop.eup %4563 }
0x17be   :  { %1400 = vrot.lane.b32.xlu1 %v4564_v32, %s4890_s19 }
0x17bf   :  { %v4566_v34 = vpop.eup %4565 }
0x17c0   :  { %v1390_v35 = vadd.f32 1.0, %v4566_v34 }
0x17c2   :  { %4567 = vrcp.f32 %v1390_v35  ;;  %v1665_v35 = vld [vmem:[#allocation2 + $0x6] sm:$0x3] }
0x17cc   :  { %v4568_v36 = vpop.eup %4567 }
0x17cd   :  { %v1398_v40 = vmul.f32 %v4568_v36, %v1396_v39 }
0x1830   :  { %v1401_v37 = vpop.permute.xlu1 %1400 }
0x1831   :  { %v1403_v38 = vmul.f32 %v4568_v36, %v1401_v37 }
0x1833   :  { %1405 = vrot.lane.b32.xlu1 %v1403_v38, %s4891_s9 }
0x18a5   :  { %v1406_v41 = vpop.permute.xlu1 %1405 }
0x18a6   :  { %v1408_v42 = vadd.f32 %v1406_v41, %v1398_v40 }
0x18a8   :  { %4569 = vtanh.f32 %v1408_v42 }
0x18b2   :  { %v4570_v43 = vpop.eup %4569 }
0x18b3   :  { %1411 = vrot.lane.b32.xlu0 %v4570_v43, %s4890_s19 }
0x18b7   :  { %1421 = vrot.lane.b32.xlu0 %v1408_v42, %s4892_s4 }
0x1925   :  { %v1412_v44 = vpop.permute.xlu0 %1411 }
0x1926   :  { %v1414_v45 = vmul.f32 %v4568_v36, %v1412_v44 }
0x1928   :  { %1416 = vrot.lane.b32.xlu1 %v1414_v45, %s4891_s9 }
0x1929   :  { %v1422_v46 = vpop.permute.xlu0 %1421 }
0x192a   :  { %1424 = vst.msk [vmem:[#allocation8] sm:$0x3] %vm146_vm0, %v1422_v46 }
0x1931   :  { %v1426_v47 = vld [vmem:[#allocation8] sm:$0x3] }
0x1932   :  { %1514 = vrot.lane.b32.xlu0 %v1426_v47, %s4891_s9 }
0x199a   :  { %v1417_v48 = vpop.permute.xlu1 %1416 }
0x199b   :  { %1419 = vst.msk [vmem:[#allocation6] sm:$0x3] %vm146_vm0, %v1417_v48 }
0x19a2   :  { %v1425_v49 = vld [vmem:[#allocation6] sm:$0x3] }
0x19a3   :  { %4043 = vmatmul.mubr.msk.f32.vlgmr.msra.gmra.mrb[10].mxu1 %vm256_vm4, %v1425_v49 }
0x19a4   :  { %4359 = vmatpush3.bf16.msra.mxu1 %v5237_v15  ;;  %4064 = vmatprep.mubr.msk.f32.mxu1 %vm4888_vm1, %v4889_v1  ;;  %v1515_v61 = vpop.permute.xlu0 %1514 }
0x19a5   :  { %4360 = vmatprep.subr.bf16.mxu1 %v4887_v0 }
0x19a8   :  { %4362 = vmatpush3.bf16.msra.mxu1 %v5240_v18 }
0x19a9   :  { %4369 = vmatprep.subr.bf16.mxu1 %v4887_v0 }
0x1a76   :  { %v1501_v51 = vpop.f32.mrb[10].mxu1 }
0x1a77   :  { %v1505_v52 = vadd.f32 %v1501_v51, %v1427_v50  ;;  %v4044_v53 = vpop.f32.mrb[11].mxu1 }
0x1a79   :  { %4571 = vtanh.f32 %v1505_v52  ;;  %v3702_v55 = vmul.f32 -1.442695, %v1505_v52 }
0x1a7b   :  { %4573 = vpow2.f32 %v3702_v55 }
0x1a83   :  { %v4572_v54 = vpop.eup %4571 }
0x1a84   :  { %1519 = vrot.lane.b32.xlu1 %v4572_v54, %s4890_s19 }
0x1a85   :  { %v4574_v56 = vpop.eup %4573 }
0x1a86   :  { %v1509_v57 = vadd.f32 1.0, %v4574_v56 }
0x1a88   :  { %4575 = vrcp.f32 %v1509_v57  ;;  %v1784_v57 = vld [vmem:[#allocation2 + $0x8] sm:$0x3] }
0x1a92   :  { %v4576_v58 = vpop.eup %4575 }
0x1a93   :  { %v1517_v62 = vmul.f32 %v4576_v58, %v1515_v61 }
0x1af6   :  { %v1520_v59 = vpop.permute.xlu1 %1519 }
0x1af7   :  { %v1522_v60 = vmul.f32 %v4576_v58, %v1520_v59 }
0x1af9   :  { %1524 = vrot.lane.b32.xlu1 %v1522_v60, %s4891_s9 }
0x1b6b   :  { %v1525_v63 = vpop.permute.xlu1 %1524 }
0x1b6c   :  { %v1527_v2 = vadd.f32 %v1525_v63, %v1517_v62 }
0x1b6e   :  { %4577 = vtanh.f32 %v1527_v2 }
0x1b78   :  { %v4578_v4 = vpop.eup %4577 }
0x1b79   :  { %1530 = vrot.lane.b32.xlu0 %v4578_v4, %s4890_s19 }
0x1b7d   :  { %1540 = vrot.lane.b32.xlu0 %v1527_v2, %s4892_s4 }
0x1beb   :  { %v1531_v5 = vpop.permute.xlu0 %1530 }
0x1bec   :  { %v1533_v6 = vmul.f32 %v4576_v58, %v1531_v5 }
0x1bee   :  { %1535 = vrot.lane.b32.xlu1 %v1533_v6, %s4891_s9 }
0x1bef   :  { %v1541_v7 = vpop.permute.xlu0 %1540 }
0x1bf0   :  { %1543 = vst.msk [vmem:[#allocation8] sm:$0x3] %vm146_vm0, %v1541_v7 }
0x1bf7   :  { %v1545_v9 = vld [vmem:[#allocation8] sm:$0x3] }
0x1bf8   :  { %1633 = vrot.lane.b32.xlu0 %v1545_v9, %s4891_s9 }
0x1c60   :  { %v1536_v11 = vpop.permute.xlu1 %1535 }
0x1c61   :  { %1538 = vst.msk [vmem:[#allocation6] sm:$0x3] %vm146_vm0, %v1536_v11 }
0x1c68   :  { %v1544_v12 = vld [vmem:[#allocation6] sm:$0x3] }
0x1c69   :  { %4054 = vmatmul.mubr.msk.f32.vlgmr.msra.gmra.mrb[12].mxu0 %vm256_vm4, %v1544_v12 }
0x1c6a   :  { %4365 = vmatpush3.bf16.msra.mxu0 %v5237_v15  ;;  %4075 = vmatprep.mubr.msk.f32.mxu0 %vm4888_vm1, %v4889_v1  ;;  %v1634_v24 = vpop.permute.xlu0 %1633 }
0x1c6b   :  { %4366 = vmatprep.subr.bf16.mxu0 %v4887_v0 }
0x1c6e   :  { %4368 = vmatpush3.bf16.msra.mxu0 %v5240_v18 }
0x1c6f   :  { %4375 = vmatprep.subr.bf16.mxu0 %v4887_v0 }
0x1d3c   :  { %v1620_v8 = vpop.f32.mrb[12].mxu0 }
0x1d3d   :  { %v1624_v14 = vadd.f32 %v1620_v8, %v1546_v13  ;;  %v4055_v16 = vpop.f32.mrb[13].mxu0 }
0x1d3f   :  { %4579 = vtanh.f32 %v1624_v14  ;;  %v3704_v10 = vmul.f32 -1.442695, %v1624_v14 }
0x1d41   :  { %4581 = vpow2.f32 %v3704_v10 }
0x1d49   :  { %v4580_v17 = vpop.eup %4579 }
0x1d4a   :  { %1638 = vrot.lane.b32.xlu1 %v4580_v17, %s4890_s19 }
0x1d4b   :  { %v4582_v19 = vpop.eup %4581 }
0x1d4c   :  { %v1628_v20 = vadd.f32 1.0, %v4582_v19 }
0x1d4e   :  { %4583 = vrcp.f32 %v1628_v20  ;;  %v1903_v20 = vld [vmem:[#allocation2 + $0xa] sm:$0x3] }
0x1d58   :  { %v4584_v21 = vpop.eup %4583 }
0x1d59   :  { %v1636_v25 = vmul.f32 %v4584_v21, %v1634_v24 }
0x1dbc   :  { %v1639_v22 = vpop.permute.xlu1 %1638 }
0x1dbd   :  { %v1641_v23 = vmul.f32 %v4584_v21, %v1639_v22 }
0x1dbf   :  { %1643 = vrot.lane.b32.xlu1 %v1641_v23, %s4891_s9 }
0x1e31   :  { %v1644_v26 = vpop.permute.xlu1 %1643 }
0x1e32   :  { %v1646_v27 = vadd.f32 %v1644_v26, %v1636_v25 }
0x1e34   :  { %4585 = vtanh.f32 %v1646_v27 }
0x1e3e   :  { %v4586_v28 = vpop.eup %4585 }
0x1e3f   :  { %1649 = vrot.lane.b32.xlu0 %v4586_v28, %s4890_s19 }
0x1e43   :  { %1659 = vrot.lane.b32.xlu0 %v1646_v27, %s4892_s4 }
0x1eb1   :  { %v1650_v29 = vpop.permute.xlu0 %1649 }
0x1eb2   :  { %v1652_v30 = vmul.f32 %v4584_v21, %v1650_v29 }
0x1eb4   :  { %1654 = vrot.lane.b32.xlu1 %v1652_v30, %s4891_s9 }
0x1eb5   :  { %v1660_v31 = vpop.permute.xlu0 %1659 }
0x1eb6   :  { %1662 = vst.msk [vmem:[#allocation8] sm:$0x3] %vm146_vm0, %v1660_v31 }
0x1ebd   :  { %v1664_v32 = vld [vmem:[#allocation8] sm:$0x3] }
0x1ebe   :  { %1752 = vrot.lane.b32.xlu0 %v1664_v32, %s4891_s9 }
0x1f26   :  { %v1655_v33 = vpop.permute.xlu1 %1654 }
0x1f27   :  { %1657 = vst.msk [vmem:[#allocation6] sm:$0x3] %vm146_vm0, %v1655_v33 }
0x1f2e   :  { %v1663_v34 = vld [vmem:[#allocation6] sm:$0x3] }
0x1f2f   :  { %4065 = vmatmul.mubr.msk.f32.vlgmr.msra.gmra.mrb[12].mxu1 %vm256_vm4, %v1663_v34 }
0x1f30   :  { %4371 = vmatpush3.bf16.msra.mxu1 %v5237_v15  ;;  %4086 = vmatprep.mubr.msk.f32.mxu1 %vm4888_vm1, %v4889_v1  ;;  %v1753_v46 = vpop.permute.xlu0 %1752 }
0x1f31   :  { %4372 = vmatprep.subr.bf16.mxu1 %v4887_v0 }
0x1f34   :  { %4374 = vmatpush3.bf16.msra.mxu1 %v5240_v18 }
0x1f35   :  { %4381 = vmatprep.subr.bf16.mxu1 %v4887_v0 }
0x2002   :  { %v1739_v36 = vpop.f32.mrb[12].mxu1 }
0x2003   :  { %v1743_v37 = vadd.f32 %v1739_v36, %v1665_v35  ;;  %v4066_v38 = vpop.f32.mrb[13].mxu1 }
0x2005   :  { %4587 = vtanh.f32 %v1743_v37  ;;  %v3706_v40 = vmul.f32 -1.442695, %v1743_v37 }
0x2007   :  { %4589 = vpow2.f32 %v3706_v40  ;;  %v2022_v40 = vld [vmem:[#allocation2 + $0xc] sm:$0x3] }
0x200f   :  { %v4588_v39 = vpop.eup %4587 }
0x2010   :  { %1757 = vrot.lane.b32.xlu1 %v4588_v39, %s4890_s19 }
0x2011   :  { %v4590_v41 = vpop.eup %4589 }
0x2012   :  { %v1747_v42 = vadd.f32 1.0, %v4590_v41 }
0x2014   :  { %4591 = vrcp.f32 %v1747_v42 }
0x201e   :  { %v4592_v43 = vpop.eup %4591 }
0x201f   :  { %v1755_v47 = vmul.f32 %v4592_v43, %v1753_v46 }
0x2082   :  { %v1758_v44 = vpop.permute.xlu1 %1757 }
0x2083   :  { %v1760_v45 = vmul.f32 %v4592_v43, %v1758_v44 }
0x2085   :  { %1762 = vrot.lane.b32.xlu1 %v1760_v45, %s4891_s9 }
0x20f7   :  { %v1763_v48 = vpop.permute.xlu1 %1762 }
0x20f8   :  { %v1765_v49 = vadd.f32 %v1763_v48, %v1755_v47 }
0x20fa   :  { %4593 = vtanh.f32 %v1765_v49 }
0x2104   :  { %v4594_v50 = vpop.eup %4593 }
0x2105   :  { %1768 = vrot.lane.b32.xlu0 %v4594_v50, %s4890_s19 }
0x2109   :  { %1778 = vrot.lane.b32.xlu0 %v1765_v49, %s4892_s4 }
0x2177   :  { %v1769_v51 = vpop.permute.xlu0 %1768 }
0x2178   :  { %v1771_v52 = vmul.f32 %v4592_v43, %v1769_v51  ;;  %v2270_v51 = vld [vmem:[#allocation16] sm:$0xff] }
0x217a   :  { %1773 = vrot.lane.b32.xlu1 %v1771_v52, %s4891_s9  ;;  %v2271_v52 = vld [vmem:[#allocation16 + $0x8] sm:$0xff] }
0x217b   :  { %v1779_v53 = vpop.permute.xlu0 %1778 }
0x217c   :  { %1781 = vst.msk [vmem:[#allocation8] sm:$0x3] %vm146_vm0, %v1779_v53  ;;  %v5351_v53 = vpack.c.bf16 %v2271_v52, %v2270_v51  ;;  %v2402_v51 = vld [vmem:[%s5690_s10 + $0x8] sm:$0xff]  ;;  %v2403_v52 = vld [vmem:[%s5690_s10 + $0x10] sm:$0xff] }
0x2183   :  { %v1783_v54 = vld [vmem:[#allocation8] sm:$0x3] }
0x2184   :  { %1871 = vrot.lane.b32.xlu0 %v1783_v54, %s4891_s9 }
0x21ec   :  { %v1774_v55 = vpop.permute.xlu1 %1773 }
0x21ed   :  { %1776 = vst.msk [vmem:[#allocation6] sm:$0x3] %vm146_vm0, %v1774_v55  ;;  %v2258_v55 = vld [vmem:[%s5681_s1] sm:$0x3] }
0x21ee   :  { %2260 = vst.msk [vmem:[#allocation4] sm:$0x3] %vm2259_vm5, %v2258_v55  ;;  %v2404_v55 = vld [vmem:[%s5690_s10 + $0x18] sm:$0xff] }
0x21f4   :  { %v1782_v56 = vld [vmem:[#allocation6] sm:$0x3] }
0x21f5   :  { %4076 = vmatmul.mubr.msk.f32.vlgmr.msra.gmra.mrb[14].mxu0 %vm256_vm4, %v1782_v56 }
0x21f6   :  { %4377 = vmatpush3.bf16.msra.mxu0 %v5237_v15  ;;  %4097 = vmatprep.mubr.msk.f32.mxu0 %vm4888_vm1, %v4889_v1  ;;  %v1872_v7 = vpop.permute.xlu0 %1871 }
0x21f7   :  { %4378 = vmatprep.subr.bf16.mxu0 %v4887_v0 }
0x21fa   :  { %4380 = vmatpush3.bf16.msra.mxu0 %v5240_v18 }
0x21fb   :  { %4387 = vmatprep.subr.bf16.mxu0 %v4887_v0 }
0x22c8   :  { %v1858_v58 = vpop.f32.mrb[14].mxu0 }
0x22c9   :  { %v1862_v59 = vadd.f32 %v1858_v58, %v1784_v57  ;;  %v4077_v60 = vpop.f32.mrb[15].mxu0  ;;  %v2272_v58 = vld [vmem:[#allocation16 + $0x10] sm:$0xff] }
0x22cb   :  { %4595 = vtanh.f32 %v1862_v59  ;;  %v3708_v62 = vmul.f32 -1.442695, %v1862_v59  ;;  %v2273_v59 = vld [vmem:[#allocation16 + $0x18] sm:$0xff] }
0x22cd   :  { %4597 = vpow2.f32 %v3708_v62  ;;  %v5363_v62 = vld [vmem:[#allocation16 + $0x20] sm:$0xff] }
0x22d5   :  { %v4596_v61 = vpop.eup %4595 }
0x22d6   :  { %1876 = vrot.lane.b32.xlu1 %v4596_v61, %s4890_s19  ;;  %v5359_v61 = vpack.c.bf16 %v2273_v59, %v2272_v58  ;;  %v2406_v58 = vld [vmem:[%s5690_s10 + $0x28] sm:$0xff] }
0x22d7   :  { %v4598_v63 = vpop.eup %4597 }
0x22d8   :  { %v1866_v2 = vadd.f32 1.0, %v4598_v63 }
0x22da   :  { %4599 = vrcp.f32 %v1866_v2  ;;  %v2262_v2 = vld [vmem:[#allocation5] sm:$0x3] }
0x22e4   :  { %v4600_v4 = vpop.eup %4599 }
0x22e5   :  { %v1874_v9 = vmul.f32 %v4600_v4, %v1872_v7 }
0x2348   :  { %v1877_v5 = vpop.permute.xlu1 %1876 }
0x2349   :  { %v1879_v6 = vmul.f32 %v4600_v4, %v1877_v5 }
0x234b   :  { %1881 = vrot.lane.b32.xlu1 %v1879_v6, %s4891_s9  ;;  %v5369_v6 = vld [vmem:[#allocation4] sm:$0x3] }
0x23bd   :  { %v1882_v11 = vpop.permute.xlu1 %1881 }
0x23be   :  { %v1884_v12 = vadd.f32 %v1882_v11, %v1874_v9 }
0x23c0   :  { %4601 = vtanh.f32 %v1884_v12 }
0x23ca   :  { %v4602_v13 = vpop.eup %4601 }
0x23cb   :  { %1887 = vrot.lane.b32.xlu0 %v4602_v13, %s4890_s19 }
0x23cf   :  { %1897 = vrot.lane.b32.xlu0 %v1884_v12, %s4892_s4 }
0x243d   :  { %v1888_v8 = vpop.permute.xlu0 %1887 }
0x243e   :  { %v1890_v14 = vmul.f32 %v4600_v4, %v1888_v8 }
0x2440   :  { %1892 = vrot.lane.b32.xlu1 %v1890_v14, %s4891_s9 }
0x2441   :  { %v1898_v16 = vpop.permute.xlu0 %1897 }
0x2442   :  { %1900 = vst.msk [vmem:[#allocation8] sm:$0x3] %vm146_vm0, %v1898_v16 }
0x2449   :  { %v1902_v17 = vld [vmem:[#allocation8] sm:$0x3] }
0x244a   :  { %1990 = vrot.lane.b32.xlu0 %v1902_v17, %s4891_s9  ;;  %v2141_v17 = vld [vmem:[#allocation2 + $0xe] sm:$0x3] }
0x24b2   :  { %v1893_v10 = vpop.permute.xlu1 %1892 }
0x24b3   :  { %1895 = vst.msk [vmem:[#allocation6] sm:$0x3] %vm146_vm0, %v1893_v10 }
0x24ba   :  { %v1901_v19 = vld [vmem:[#allocation6] sm:$0x3] }
0x24bb   :  { %4087 = vmatmul.mubr.msk.f32.vlgmr.msra.gmra.mrb[14].mxu1 %vm256_vm4, %v1901_v19 }
0x24bc   :  { %4383 = vmatpush3.bf16.msra.mxu1 %v5237_v15  ;;  %4108 = vmatprep.mubr.msk.f32.mxu1 %vm4888_vm1, %v4889_v1 }
0x24bd   :  { %4384 = vmatprep.subr.bf16.mxu1 %v4887_v0 }
0x24c0   :  { %4386 = vmatpush3.bf16.msra.mxu1 %v5240_v18  ;;  %v1991_v18 = vpop.permute.xlu0 %1990 }
0x24c1   :  { %4393 = vmatprep.subr.bf16.mxu1 %v4887_v0 }
0x258e   :  { %v1977_v21 = vpop.f32.mrb[14].mxu1 }
0x258f   :  { %v1981_v22 = vadd.f32 %v1977_v21, %v1903_v20  ;;  %v4088_v23 = vpop.f32.mrb[15].mxu1  ;;  %v5386_v20 = vld [vmem:[#allocation17] ss:$0 sm:$0xff] }
0x2591   :  { %4603 = vtanh.f32 %v1981_v22  ;;  %v3710_v25 = vmul.f32 -1.442695, %v1981_v22 }
0x2593   :  { %4605 = vpow2.f32 %v3710_v25 }
0x259b   :  { %v4604_v24 = vpop.eup %4603 }
0x259c   :  { %1995 = vrot.lane.b32.xlu1 %v4604_v24, %s4890_s19 }
0x259d   :  { %v4606_v15 = vpop.eup %4605 }
0x259e   :  { %v1985_v26 = vadd.f32 1.0, %v4606_v15 }
0x25a0   :  { %4607 = vrcp.f32 %v1985_v26 }
0x25aa   :  { %v4608_v27 = vpop.eup %4607 }
0x25ab   :  { %v1993_v30 = vmul.f32 %v4608_v27, %v1991_v18 }
0x260e   :  { %v1996_v28 = vpop.permute.xlu1 %1995 }
0x260f   :  { %v1998_v29 = vmul.f32 %v4608_v27, %v1996_v28 }
0x2611   :  { %2000 = vrot.lane.b32.xlu1 %v1998_v29, %s4891_s9 }
0x2683   :  { %v2001_v31 = vpop.permute.xlu1 %2000 }
0x2684   :  { %v2003_v32 = vadd.f32 %v2001_v31, %v1993_v30 }
0x2686   :  { %4609 = vtanh.f32 %v2003_v32 }
0x2690   :  { %v4610_v33 = vpop.eup %4609 }
0x2691   :  { %2006 = vrot.lane.b32.xlu0 %v4610_v33, %s4890_s19 }
0x2695   :  { %2016 = vrot.lane.b32.xlu0 %v2003_v32, %s4892_s4 }
0x2703   :  { %v2007_v34 = vpop.permute.xlu0 %2006 }
0x2704   :  { %v2009_v35 = vmul.f32 %v4608_v27, %v2007_v34 }
0x2706   :  { %2011 = vrot.lane.b32.xlu1 %v2009_v35, %s4891_s9 }
0x2707   :  { %v2017_v36 = vpop.permute.xlu0 %2016 }
0x2708   :  { %2019 = vst.msk [vmem:[#allocation8] sm:$0x3] %vm146_vm0, %v2017_v36 }
0x270f   :  { %v2021_v37 = vld [vmem:[#allocation8] sm:$0x3] }
0x2710   :  { %2109 = vrot.lane.b32.xlu0 %v2021_v37, %s4891_s9 }
0x2778   :  { %v2012_v38 = vpop.permute.xlu1 %2011 }
0x2779   :  { %2014 = vst.msk [vmem:[#allocation6] sm:$0x3] %vm146_vm0, %v2012_v38 }
0x2780   :  { %v2020_v39 = vld [vmem:[#allocation6] sm:$0x3] }
0x2781   :  { %4098 = vmatmul.mubr.msk.f32.vlgmr.msra.gmra.mrb[16].mxu0 %vm256_vm4, %v2020_v39 }
0x2782   :  { %4121 = vmatprep.mubr.msk.f32.mxu0 %vm4888_vm1, %v4889_v1  ;;  %4389 = vmatpush3.bf16.msra.mxu0 %v5351_v53  ;;  %v2110_v54 = vpop.permute.xlu0 %2109 }
0x2783   :  { %4390 = vmatprep.subr.bf16.mxu0 %v4887_v0 }
0x2786   :  { %4392 = vmatpush3.bf16.msra.mxu0 %v5359_v61 }
0x2787   :  { %4119 = vmatprep.subr.mxu0 %v4889_v1 }
0x278a   :  { %4120 = vmatpush3.msra.mxu0 %v5363_v62 }
0x278b   :  { %4405 = vmatprep.subr.bf16.mxu0 %v4887_v0 }
0x2854   :  { %v2096_v41 = vpop.f32.mrb[16].mxu0 }
0x2855   :  { %v2100_v42 = vadd.f32 %v2096_v41, %v2022_v40  ;;  %v4099_v43 = vpop.f32.mrb[17].mxu0 }
0x2857   :  { %4611 = vtanh.f32 %v2100_v42  ;;  %v3712_v45 = vmul.f32 -1.442695, %v2100_v42 }
0x2859   :  { %4613 = vpow2.f32 %v3712_v45 }
0x2861   :  { %v4612_v44 = vpop.eup %4611 }
0x2862   :  { %2114 = vrot.lane.b32.xlu1 %v4612_v44, %s4890_s19 }
0x2863   :  { %v4614_v46 = vpop.eup %4613 }
0x2864   :  { %v2104_v47 = vadd.f32 1.0, %v4614_v46 }
0x2866   :  { %4615 = vrcp.f32 %v2104_v47 }
0x2870   :  { %v4616_v48 = vpop.eup %4615 }
0x2871   :  { %v2112_v56 = vmul.f32 %v4616_v48, %v2110_v54 }
0x28d4   :  { %v2115_v49 = vpop.permute.xlu1 %2114 }
0x28d5   :  { %v2117_v50 = vmul.f32 %v4616_v48, %v2115_v49 }
0x28d7   :  { %2119 = vrot.lane.b32.xlu1 %v2117_v50, %s4891_s9  ;;  %v2401_v50 = vld [vmem:[%s5690_s10] sm:$0xff] }
0x28d8   :  { %v5411_v54 = vpack.c.bf16 %v2402_v51, %v2401_v50 }
0x2949   :  { %v2120_v57 = vpop.permute.xlu1 %2119 }
0x294a   :  { %v2122_v60 = vadd.f32 %v2120_v57, %v2112_v56  ;;  %v5417_v56 = vpack.c.bf16 %v2404_v55, %v2403_v52  ;;  %v2405_v57 = vld [vmem:[%s5690_s10 + $0x20] sm:$0xff] }
0x294b   :  { %v5428_v59 = vpack.c.bf16 %v2406_v58, %v2405_v57 }
0x294c   :  { %4617 = vtanh.f32 %v2122_v60 }
0x2956   :  { %v4618_v63 = vpop.eup %4617 }
0x2957   :  { %2125 = vrot.lane.b32.xlu0 %v4618_v63, %s4890_s19  ;;  %v2408_v63 = vld [vmem:[%s5690_s10 + $0x38] sm:$0xff] }
0x295b   :  { %2265 = vrot.lane.b32.xlu0 %v2262_v2, %s4879_s24 }
0x29c9   :  { %v2126_v4 = vpop.permute.xlu0 %2125 }
0x29ca   :  { %v2128_v5 = vmul.f32 %v4616_v48, %v2126_v4 }
0x29cc   :  { %2130 = vrot.lane.b32.xlu1 %v2128_v5, %s4891_s9 }
0x29cd   :  { %v2266_v7 = vpop.permute.xlu0 %2265 }
0x29ce   :  { %v2269_v9 = vsel %vm2268_vm6, %v5369_v6, %v2266_v7 }
0x29cf   :  { %4122 = vmatmul.mubr.msk.f32.vlgmr.msra.gmra.mrb[18].mxu0 %vm2282_vm7, %v2269_v9 }
0x29d0   :  { %2135 = vrot.lane.b32.xlu1 %v2122_v60, %s4892_s4  ;;  %4151 = vmatprep.mubr.msk.f32.mxu0 %vm4888_vm1, %v4889_v1  ;;  %v2407_v60 = vld [vmem:[%s5690_s10 + $0x30] sm:$0xff] }
0x29d1   :  { %v5438_v2 = vpack.c.bf16 %v2408_v63, %v2407_v60 }
0x29d4   :  { %1205 = vrot.lane.b32.xlu1 %v5220_v3, %s4892_s4 }
0x2a3e   :  { %v2131_v11 = vpop.permute.xlu1 %2130 }
0x2a3f   :  { %2133 = vst.msk [vmem:[#allocation6] sm:$0x3] %vm146_vm0, %v2131_v11 }
0x2a42   :  { %v2136_v12 = vpop.permute.xlu1 %2135 }
0x2a43   :  { %2138 = vst.msk [vmem:[#allocation8] sm:$0x3] %vm146_vm0, %v2136_v12 }
0x2a46   :  { %v1206_v13 = vpop.permute.xlu1 %1205  ;;  %v2139_v8 = vld [vmem:[#allocation6] sm:$0x3] }
0x2a47   :  { %1208 = vst.msk [vmem:[#allocation7] sm:$0x3] %vm146_vm0, %v1206_v13  ;;  %4109 = vmatmul.mubr.msk.f32.vlgmr.msra.gmra.mrb[16].mxu1 %vm256_vm4, %v2139_v8  ;;  %v5460_v8 = vld [vmem:[#allocation19] ss:$0 sm:$0xff] }
0x2a48   :  { %4140 = vmatprep.mubr.msk.f32.mxu1 %vm4888_vm1, %v4889_v1  ;;  %4395 = vmatpush3.bf16.msra.mxu1 %v5411_v54 }
0x2a49   :  { %4396 = vmatprep.subr.bf16.mxu1 %v4887_v0 }
0x2a4a   :  { %v2140_v23 = vld [vmem:[#allocation8] sm:$0x3] }
0x2a4c   :  { %4398 = vmatpush3.bf16.msra.mxu1 %v5417_v56 }
0x2a4d   :  { %4399 = vmatprep.subr.bf16.mxu1 %v4887_v0 }
0x2a4e   :  { %v2263_v33 = vld [vmem:[#allocation7] sm:$0x3] }
0x2a50   :  { %4401 = vmatpush3.bf16.msra.mxu1 %v5428_v59 }
0x2a51   :  { %4402 = vmatprep.subr.bf16.mxu1 %v4887_v0 }
0x2a54   :  { %4404 = vmatpush3.bf16.msra.mxu1 %v5438_v2 }
0x2a55   :  { %4417 = vmatprep.subr.bf16.mxu1 %v4887_v0 }
0x2aa2   :  { %v2352_v14 = vpop.f32.mrb[18].mxu0 }
0x2aa3   :  { %v4123_v16 = vpop.f32.mrb[19].mxu0  ;;  %v2353_v21 = vadd.f32 %v5386_v20, %v2352_v14 }
0x2aa5   :  { %v3717_v15 = vmul.f32 -1.442695, %v2353_v21 }
0x2b1a   :  { %v2215_v10 = vpop.f32.mrb[16].mxu1 }
0x2b1b   :  { %v2219_v3 = vadd.f32 %v2215_v10, %v2141_v17  ;;  %v4110_v19 = vpop.f32.mrb[17].mxu1 }
0x2b1d   :  { %4619 = vtanh.f32 %v2219_v3  ;;  %v3714_v25 = vmul.f32 -1.442695, %v2219_v3 }
0x2b1e   :  { %4621 = vtanh.f32 %v2353_v21 }
0x2b1f   :  { %4623 = vpow2.f32 %v3714_v25 }
0x2b20   :  { %4625 = vpow2.f32 %v3717_v15 }
0x2b27   :  { %v4620_v22 = vpop.eup %4619 }
0x2b28   :  { %2233 = vrot.lane.b32.xlu0 %v4620_v22, %s4890_s19  ;;  %v4622_v24 = vpop.eup %4621 }
0x2b29   :  { %v4624_v26 = vpop.eup %4623 }
0x2b2a   :  { %v2223_v27 = vadd.f32 1.0, %v4624_v26  ;;  %v4626_v28 = vpop.eup %4625 }
0x2b2b   :  { %v2359_v29 = vadd.f32 1.0, %v4626_v28  ;;  %v2528_v28 = vld [vmem:[%s5692_s12] sm:$0xff] }
0x2b2c   :  { %2228 = vrot.lane.b32.xlu0 %v2140_v23, %s4891_s9  ;;  %4627 = vrcp.f32 %v2223_v27 }
0x2b2d   :  { %4629 = vrcp.f32 %v2359_v29  ;;  %v2529_v29 = vld [vmem:[%s5692_s12 + $0x8] sm:$0xff] }
0x2b30   :  { %2369 = vrot.lane.b32.xlu0 %v4622_v24, %s4890_s19 }
0x2b36   :  { %v4628_v18 = vpop.eup %4627 }
0x2b37   :  { %v4630_v34 = vpop.eup %4629 }
0x2b9a   :  { %v2234_v30 = vpop.permute.xlu0 %2233 }
0x2b9b   :  { %v2236_v31 = vmul.f32 %v4628_v18, %v2234_v30  ;;  %v5477_v30 = vpack.c.bf16 %v2529_v29, %v2528_v28 }
0x2b9d   :  { %2238 = vrot.lane.b32.xlu1 %v2236_v31, %s4891_s9  ;;  %v2531_v31 = vld [vmem:[%s5692_s12 + $0x18] sm:$0xff]  ;;  %4407 = vmatpush3.bf16.msra.mxu0 %v5477_v30 }
0x2b9e   :  { %v2229_v32 = vpop.permute.xlu0 %2228  ;;  %4408 = vmatprep.subr.bf16.mxu0 %v4887_v0 }
0x2b9f   :  { %v2231_v37 = vmul.f32 %v4628_v18, %v2229_v32 }
0x2ba1   :  { %2364 = vrot.lane.b32.xlu1 %v2263_v33, %s4891_s9 }
0x2ba2   :  { %v2370_v35 = vpop.permute.xlu0 %2369 }
0x2ba3   :  { %v2372_v36 = vmul.f32 %v4630_v34, %v2370_v35 }
0x2ba5   :  { %2374 = vrot.lane.b32.xlu0 %v2372_v36, %s4891_s9 }
0x2c0f   :  { %v2239_v38 = vpop.permute.xlu1 %2238 }
0x2c10   :  { %v2241_v39 = vadd.f32 %v2239_v38, %v2231_v37 }
0x2c12   :  { %4631 = vtanh.f32 %v2241_v39 }
0x2c13   :  { %v2365_v40 = vpop.permute.xlu1 %2364 }
0x2c14   :  { %v2367_v41 = vmul.f32 %v4630_v34, %v2365_v40  ;;  %v5505_v40 = vld [vmem:[#allocation20] ss:$0 sm:$0xff] }
0x2c17   :  { %v2375_v42 = vpop.permute.xlu0 %2374 }
0x2c18   :  { %v5395_v43 = vadd.f32 %v2375_v42, %v2367_v41 }
0x2c1a   :  { %4633 = vtanh.f32 %v5395_v43 }
0x2c1c   :  { %v4632_v44 = vpop.eup %4631 }
0x2c1d   :  { %2244 = vrot.lane.b32.xlu1 %v4632_v44, %s4890_s19 }
0x2c24   :  { %v4634_v45 = vpop.eup %4633 }
0x2c25   :  { %2380 = vrot.lane.b32.xlu1 %v4634_v45, %s4890_s19 }
0x2c8f   :  { %v2245_v46 = vpop.permute.xlu1 %2244 }
0x2c90   :  { %v2247_v47 = vmul.f32 %v4628_v18, %v2245_v46  ;;  %v2530_v18 = vld [vmem:[%s5692_s12 + $0x10] sm:$0xff] }
0x2c91   :  { %v5483_v32 = vpack.c.bf16 %v2531_v31, %v2530_v18 }
0x2c92   :  { %2249 = vrot.lane.b32.xlu0 %v2247_v47, %s4891_s9 }
0x2c93   :  { %4410 = vmatpush3.bf16.msra.mxu0 %v5483_v32 }
0x2c94   :  { %4411 = vmatprep.subr.bf16.mxu0 %v4887_v0 }
0x2c97   :  { %v2381_v48 = vpop.permute.xlu1 %2380 }
0x2c98   :  { %v2383_v49 = vmul.f32 %v4630_v34, %v2381_v48 }
0x2c9a   :  { %2385 = vrot.lane.b32.xlu0 %v2383_v49, %s4891_s9 }
0x2c9e   :  { %2254 = vrot.lane.b32.xlu0 %v2241_v39, %s4892_s4 }
0x2d04   :  { %v2250_v4 = vpop.permute.xlu0 %2249 }
0x2d05   :  { %2252 = vst.msk [vmem:[#allocation6] sm:$0x3] %vm146_vm0, %v2250_v4 }
0x2d0c   :  { %v2386_v5 = vpop.permute.xlu0 %2385  ;;  %v2394_v7 = vld [vmem:[#allocation6] sm:$0x3] }
0x2d0d   :  { %2388 = vst.msk [vmem:[#allocation5] sm:$0x3] %vm146_vm0, %v2386_v5  ;;  %2397 = vrot.lane.b32.xlu1 %v2394_v7, %s4891_s9 }
0x2d10   :  { %v2255_v9 = vpop.permute.xlu0 %2254 }
0x2d11   :  { %2257 = vst.msk [vmem:[#allocation8] sm:$0x3] %vm146_vm0, %v2255_v9 }
0x2d14   :  { %v2615_v34 = vld [vmem:[#allocation5] sm:$0x3] }
0x2d18   :  { %v2395_v11 = vld [vmem:[#allocation8] sm:$0x3] }
0x2d19   :  { %2498 = vrot.lane.b32.xlu0 %v2395_v11, %s4891_s9 }
0x2d7f   :  { %v2398_v12 = vpop.permute.xlu1 %2397 }
0x2d80   :  { %v2400_v13 = vsel %vm256_vm4, %v2386_v5, %v2398_v12 }
0x2d81   :  { %4141 = vmatmul.mubr.msk.f32.vlgmr.msra.gmra.mrb[18].mxu1 %vm2416_vm8, %v2400_v13 }
0x2d82   :  { %4419 = vmatpush3.bf16.msra.mxu1 %v5411_v54  ;;  %4183 = vmatprep.mubr.msk.f32.mxu1 %vm4888_vm1, %v4889_v1 }
0x2d83   :  { %4420 = vmatprep.subr.bf16.mxu1 %v4887_v0 }
0x2d86   :  { %4422 = vmatpush3.bf16.msra.mxu1 %v5417_v56 }
0x2d87   :  { %4423 = vmatprep.subr.bf16.mxu1 %v4887_v0 }
0x2d8a   :  { %4425 = vmatpush3.bf16.msra.mxu1 %v5428_v59 }
0x2d8b   :  { %4426 = vmatprep.subr.bf16.mxu1 %v4887_v0  ;;  %v2499_v25 = vpop.permute.xlu0 %2498 }
0x2d8e   :  { %4428 = vmatpush3.bf16.msra.mxu1 %v5438_v2 }
0x2d8f   :  { %4441 = vmatprep.subr.bf16.mxu1 %v4887_v0 }
0x2e54   :  { %v2486_v14 = vpop.f32.mrb[18].mxu1 }
0x2e55   :  { %v2487_v16 = vadd.f32 %v5460_v8, %v2486_v14  ;;  %v4142_v17 = vpop.f32.mrb[19].mxu1 }
0x2e57   :  { %4635 = vtanh.f32 %v2487_v16  ;;  %v3720_v3 = vmul.f32 -1.442695, %v2487_v16 }
0x2e59   :  { %4637 = vpow2.f32 %v3720_v3 }
0x2e61   :  { %v4636_v10 = vpop.eup %4635 }
0x2e62   :  { %2503 = vrot.lane.b32.xlu1 %v4636_v10, %s4890_s19 }
0x2e63   :  { %v4638_v19 = vpop.eup %4637 }
0x2e64   :  { %v2493_v21 = vadd.f32 1.0, %v4638_v19 }
0x2e66   :  { %4639 = vrcp.f32 %v2493_v21 }
0x2e70   :  { %v4640_v22 = vpop.eup %4639 }
0x2e71   :  { %v2501_v15 = vmul.f32 %v4640_v22, %v2499_v25 }
0x2ed4   :  { %v2504_v23 = vpop.permute.xlu1 %2503 }
0x2ed5   :  { %v2506_v24 = vmul.f32 %v4640_v22, %v2504_v23 }
0x2ed7   :  { %2508 = vrot.lane.b32.xlu1 %v2506_v24, %s4891_s9 }
0x2f49   :  { %v2509_v26 = vpop.permute.xlu1 %2508 }
0x2f4a   :  { %v5465_v27 = vadd.f32 %v2509_v26, %v2501_v15 }
0x2f4c   :  { %4641 = vtanh.f32 %v5465_v27 }
0x2f56   :  { %v4642_v33 = vpop.eup %4641 }
0x2f57   :  { %2514 = vrot.lane.b32.xlu0 %v4642_v33, %s4890_s19 }
0x2f5b   :  { %2618 = vrot.lane.b32.xlu0 %v2615_v34, %s4879_s24 }
0x2fc9   :  { %v2515_v35 = vpop.permute.xlu0 %2514 }
0x2fca   :  { %v2517_v36 = vmul.f32 %v4640_v22, %v2515_v35 }
0x2fcc   :  { %2519 = vrot.lane.b32.xlu1 %v2517_v36, %s4891_s9 }
0x2fcd   :  { %v2619_v45 = vpop.permute.xlu0 %2618 }
0x2fd0   :  { %2390 = vrot.lane.b32.xlu1 %v5395_v43, %s4892_s4 }
0x303e   :  { %v2520_v37 = vpop.permute.xlu1 %2519 }
0x303f   :  { %2522 = vst.msk [vmem:[#allocation6] sm:$0x3] %vm146_vm0, %v2520_v37  ;;  %4152 = vmatmul.mubr.msk.f32.vlgmr.msra.gmra.mrb[20].mxu0 %vm256_vm4, %v2520_v37 }
0x3040   :  { %4413 = vmatpush3.bf16.msra.mxu0 %v5351_v53  ;;  %4164 = vmatprep.mubr.msk.f32.mxu0 %vm4888_vm1, %v4889_v1 }
0x3041   :  { %4414 = vmatprep.subr.bf16.mxu0 %v4887_v0 }
0x3042   :  { %v2391_v38 = vpop.permute.xlu1 %2390 }
0x3043   :  { %2393 = vst.msk [vmem:[#allocation7] sm:$0x3] %vm146_vm0, %v2391_v38 }
0x3044   :  { %4416 = vmatpush3.bf16.msra.mxu0 %v5359_v61 }
0x3045   :  { %4162 = vmatprep.subr.mxu0 %v4889_v1 }
0x3046   :  { %v2745_v11 = vld [vmem:[#allocation6] sm:$0x3] }
0x3048   :  { %4163 = vmatpush3.msra.mxu0 %v5363_v62 }
0x3049   :  { %4429 = vmatprep.subr.bf16.mxu0 %v4887_v0 }
0x304a   :  { %v2616_v39 = vld [vmem:[#allocation7] sm:$0x3] }
0x304b   :  { %2715 = vrot.lane.b32.xlu1 %v2616_v39, %s4891_s9 }
0x30bd   :  { %v2716_v63 = vpop.permute.xlu1 %2715 }
0x3112   :  { %v2607_v41 = vpop.f32.mrb[20].mxu0 }
0x3113   :  { %v2608_v42 = vadd.f32 %v5505_v40, %v2607_v41  ;;  %v4153_v43 = vpop.f32.mrb[21].mxu0 }
0x3115   :  { %v2611_v44 = vadd.f32 %v2608_v42, %v5369_v6 }
0x3117   :  { %2612 = vst.msk [vmem:[%s5694_s14] sm:$0x3] %vm2259_vm5, %v2611_v44  ;;  %2613 = vst.msk [vmem:[#allocation4] sm:$0x3] %vm2259_vm5, %v2611_v44 }
0x311e   :  { %v5514_v46 = vld [vmem:[#allocation4] sm:$0x3] }
0x311f   :  { %v2621_v47 = vsel %vm2268_vm6, %v5514_v46, %v2619_v45 }
0x3120   :  { %4165 = vmatmul.mubr.msk.f32.vlgmr.msra.gmra.mrb[22].mxu0 %vm2282_vm7, %v2621_v47 }
0x3121   :  { %4431 = vmatpush3.bf16.msra.mxu0 %v5477_v30  ;;  %4194 = vmatprep.mubr.msk.f32.mxu0 %vm4888_vm1, %v4889_v1 }
0x3122   :  { %4432 = vmatprep.subr.bf16.mxu0 %v4887_v0 }
0x3125   :  { %4434 = vmatpush3.bf16.msra.mxu0 %v5483_v32 }
0x3126   :  { %4435 = vmatprep.subr.bf16.mxu0 %v4887_v0 }
0x31f3   :  { %v2703_v6 = vpop.f32.mrb[22].mxu0 }
0x31f4   :  { %v2704_v48 = vadd.f32 %v5386_v20, %v2703_v6  ;;  %v4166_v49 = vpop.f32.mrb[23].mxu0 }
0x31f6   :  { %4643 = vtanh.f32 %v2704_v48  ;;  %v3725_v51 = vmul.f32 -1.442695, %v2704_v48 }
0x31f8   :  { %4645 = vpow2.f32 %v3725_v51 }
0x3200   :  { %v4644_v50 = vpop.eup %4643 }
0x3201   :  { %2720 = vrot.lane.b32.xlu0 %v4644_v50, %s4890_s19 }
0x3202   :  { %v4646_v52 = vpop.eup %4645 }
0x3203   :  { %v2710_v55 = vadd.f32 1.0, %v4646_v52 }
0x3205   :  { %4647 = vrcp.f32 %v2710_v55 }
0x320f   :  { %v4648_v57 = vpop.eup %4647 }
0x3210   :  { %v2718_v4 = vmul.f32 %v4648_v57, %v2716_v63 }
0x3273   :  { %v2721_v58 = vpop.permute.xlu0 %2720 }
0x3274   :  { %v2723_v60 = vmul.f32 %v4648_v57, %v2721_v58 }
0x3276   :  { %2725 = vrot.lane.b32.xlu0 %v2723_v60, %s4891_s9 }
0x32e8   :  { %v2726_v5 = vpop.permute.xlu0 %2725 }
0x32e9   :  { %v2728_v7 = vadd.f32 %v2726_v5, %v2718_v4 }
0x32eb   :  { %4649 = vtanh.f32 %v2728_v7 }
0x32f5   :  { %v4650_v9 = vpop.eup %4649 }
0x32f6   :  { %2731 = vrot.lane.b32.xlu1 %v4650_v9, %s4890_s19 }
0x32fa   :  { %2748 = vrot.lane.b32.xlu1 %v2745_v11, %s4891_s9 }
0x3368   :  { %v2732_v12 = vpop.permute.xlu1 %2731 }
0x3369   :  { %v2734_v13 = vmul.f32 %v4648_v57, %v2732_v12 }
0x336b   :  { %2736 = vrot.lane.b32.xlu0 %v2734_v13, %s4891_s9 }
0x336c   :  { %v2749_v14 = vpop.permute.xlu1 %2748 }
0x336f   :  { %2524 = vrot.lane.b32.xlu0 %v5465_v27, %s4892_s4 }
0x33dd   :  { %v2737_v16 = vpop.permute.xlu0 %2736 }
0x33de   :  { %v2751_v17 = vsel %vm256_vm4, %v2737_v16, %v2749_v14  ;;  %2739 = vst.msk [vmem:[#allocation5] sm:$0x3] %vm146_vm0, %v2737_v16 }
0x33df   :  { %4184 = vmatmul.mubr.msk.f32.vlgmr.msra.gmra.mrb[20].mxu1 %vm2416_vm8, %v2751_v17 }
0x33e0   :  { %4443 = vmatpush3.bf16.msra.mxu1 %v5411_v54  ;;  %4226 = vmatprep.mubr.msk.f32.mxu1 %vm4888_vm1, %v4889_v1 }
0x33e1   :  { %v2525_v10 = vpop.permute.xlu0 %2524  ;;  %4444 = vmatprep.subr.bf16.mxu1 %v4887_v0 }
0x33e2   :  { %2527 = vst.msk [vmem:[#allocation8] sm:$0x3] %vm146_vm0, %v2525_v10 }
0x33e4   :  { %4446 = vmatpush3.bf16.msra.mxu1 %v5417_v56 }
0x33e5   :  { %4447 = vmatprep.subr.bf16.mxu1 %v4887_v0  ;;  %v2966_v35 = vld [vmem:[#allocation5] sm:$0x3] }
0x33e8   :  { %4449 = vmatpush3.bf16.msra.mxu1 %v5428_v59 }
0x33e9   :  { %v2746_v3 = vld [vmem:[#allocation8] sm:$0x3]  ;;  %4450 = vmatprep.subr.bf16.mxu1 %v4887_v0 }
0x33ea   :  { %2848 = vrot.lane.b32.xlu0 %v2746_v3, %s4891_s9 }
0x33ec   :  { %4452 = vmatpush3.bf16.msra.mxu1 %v5438_v2 }
0x33ed   :  { %4465 = vmatprep.subr.bf16.mxu1 %v4887_v0 }
0x345c   :  { %v2849_v29 = vpop.permute.xlu0 %2848 }
0x34b2   :  { %v2836_v19 = vpop.f32.mrb[20].mxu1 }
0x34b3   :  { %v2837_v21 = vadd.f32 %v5460_v8, %v2836_v19  ;;  %v4185_v22 = vpop.f32.mrb[21].mxu1 }
0x34b5   :  { %4651 = vtanh.f32 %v2837_v21  ;;  %v3728_v24 = vmul.f32 -1.442695, %v2837_v21 }
0x34b7   :  { %4653 = vpow2.f32 %v3728_v24 }
0x34bf   :  { %v4652_v23 = vpop.eup %4651 }
0x34c0   :  { %2853 = vrot.lane.b32.xlu1 %v4652_v23, %s4890_s19 }
0x34c1   :  { %v4654_v25 = vpop.eup %4653 }
0x34c2   :  { %v2843_v15 = vadd.f32 1.0, %v4654_v25 }
0x34c4   :  { %4655 = vrcp.f32 %v2843_v15 }
0x34ce   :  { %v4656_v26 = vpop.eup %4655 }
0x34cf   :  { %v2851_v18 = vmul.f32 %v4656_v26, %v2849_v29 }
0x3532   :  { %v2854_v27 = vpop.permute.xlu1 %2853 }
0x3533   :  { %v2856_v28 = vmul.f32 %v4656_v26, %v2854_v27 }
0x3535   :  { %2858 = vrot.lane.b32.xlu1 %v2856_v28, %s4891_s9 }
0x35a7   :  { %v2859_v31 = vpop.permute.xlu1 %2858 }
0x35a8   :  { %v5551_v33 = vadd.f32 %v2859_v31, %v2851_v18 }
0x35aa   :  { %4657 = vtanh.f32 %v5551_v33 }
0x35b4   :  { %v4658_v34 = vpop.eup %4657 }
0x35b5   :  { %2864 = vrot.lane.b32.xlu0 %v4658_v34, %s4890_s19 }
0x35b9   :  { %2969 = vrot.lane.b32.xlu0 %v2966_v35, %s4879_s24 }
0x3627   :  { %v2865_v36 = vpop.permute.xlu0 %2864 }
0x3628   :  { %v2867_v37 = vmul.f32 %v4656_v26, %v2865_v36 }
0x362a   :  { %2869 = vrot.lane.b32.xlu1 %v2867_v37, %s4891_s9 }
0x362b   :  { %v2970_v47 = vpop.permute.xlu0 %2969 }
0x362e   :  { %2741 = vrot.lane.b32.xlu1 %v2728_v7, %s4892_s4 }
0x369c   :  { %v2870_v38 = vpop.permute.xlu1 %2869 }
0x369d   :  { %2872 = vst.msk [vmem:[#allocation6] sm:$0x3] %vm146_vm0, %v2870_v38  ;;  %4195 = vmatmul.mubr.msk.f32.vlgmr.msra.gmra.mrb[24].mxu0 %vm256_vm4, %v2870_v38 }
0x369e   :  { %4437 = vmatpush3.bf16.msra.mxu0 %v5351_v53  ;;  %4207 = vmatprep.mubr.msk.f32.mxu0 %vm4888_vm1, %v4889_v1 }
0x369f   :  { %4438 = vmatprep.subr.bf16.mxu0 %v4887_v0 }
0x36a0   :  { %v2742_v39 = vpop.permute.xlu1 %2741 }
0x36a1   :  { %2744 = vst.msk [vmem:[#allocation7] sm:$0x3] %vm146_vm0, %v2742_v39 }
0x36a2   :  { %4440 = vmatpush3.bf16.msra.mxu0 %v5359_v61 }
0x36a3   :  { %4205 = vmatprep.subr.mxu0 %v4889_v1 }
0x36a4   :  { %v3096_v12 = vld [vmem:[#allocation6] sm:$0x3] }
0x36a6   :  { %4206 = vmatpush3.msra.mxu0 %v5363_v62 }
0x36a7   :  { %4453 = vmatprep.subr.bf16.mxu0 %v4887_v0 }
0x36a8   :  { %v2967_v41 = vld [vmem:[#allocation7] sm:$0x3] }
0x36a9   :  { %3066 = vrot.lane.b32.xlu1 %v2967_v41, %s4891_s9 }
0x371b   :  { %v3067_v4 = vpop.permute.xlu1 %3066 }
0x3770   :  { %v2957_v42 = vpop.f32.mrb[24].mxu0 }
0x3771   :  { %v2958_v43 = vadd.f32 %v5505_v40, %v2957_v42  ;;  %v4196_v44 = vpop.f32.mrb[25].mxu0 }
0x3773   :  { %v2961_v45 = vadd.f32 %v2958_v43, %v5514_v46 }
0x3775   :  { %3731 = vst.msk [vmem:[%s5694_s14 + $0x2] sm:$0x3] %vm2259_vm5, %v2961_v45  ;;  %2964 = vst.msk [vmem:[#allocation4] sm:$0x3] %vm2259_vm5, %v2961_v45 }
0x377c   :  { %v5577_v6 = vld [vmem:[#allocation4] sm:$0x3] }
0x377d   :  { %v2972_v48 = vsel %vm2268_vm6, %v5577_v6, %v2970_v47 }
0x377e   :  { %4208 = vmatmul.mubr.msk.f32.vlgmr.msra.gmra.mrb[26].mxu0 %vm2282_vm7, %v2972_v48 }
0x377f   :  { %4455 = vmatpush3.bf16.msra.mxu0 %v5477_v30  ;;  %4237 = vmatprep.mubr.msk.f32.mxu0 %vm4888_vm1, %v4889_v1 }
0x3780   :  { %4456 = vmatprep.subr.bf16.mxu0 %v4887_v0 }
0x3783   :  { %4458 = vmatpush3.bf16.msra.mxu0 %v5483_v32 }
0x3784   :  { %4459 = vmatprep.subr.bf16.mxu0 %v4887_v0 }
0x3851   :  { %v3054_v46 = vpop.f32.mrb[26].mxu0 }
0x3852   :  { %v3055_v49 = vadd.f32 %v5386_v20, %v3054_v46  ;;  %v4209_v50 = vpop.f32.mrb[27].mxu0 }
0x3854   :  { %4659 = vtanh.f32 %v3055_v49  ;;  %v3734_v52 = vmul.f32 -1.442695, %v3055_v49 }
0x3856   :  { %4661 = vpow2.f32 %v3734_v52 }
0x385e   :  { %v4660_v51 = vpop.eup %4659 }
0x385f   :  { %3071 = vrot.lane.b32.xlu0 %v4660_v51, %s4890_s19 }
0x3860   :  { %v4662_v55 = vpop.eup %4661 }
0x3861   :  { %v3061_v57 = vadd.f32 1.0, %v4662_v55 }
0x3863   :  { %4663 = vrcp.f32 %v3061_v57 }
0x386d   :  { %v4664_v58 = vpop.eup %4663 }
0x386e   :  { %v3069_v5 = vmul.f32 %v4664_v58, %v3067_v4 }
0x38d1   :  { %v3072_v60 = vpop.permute.xlu0 %3071 }
0x38d2   :  { %v3074_v63 = vmul.f32 %v4664_v58, %v3072_v60 }
0x38d4   :  { %3076 = vrot.lane.b32.xlu0 %v3074_v63, %s4891_s9 }
0x3946   :  { %v3077_v7 = vpop.permute.xlu0 %3076 }
0x3947   :  { %v3079_v9 = vadd.f32 %v3077_v7, %v3069_v5 }
0x3949   :  { %4665 = vtanh.f32 %v3079_v9 }
0x3953   :  { %v4666_v11 = vpop.eup %4665 }
0x3954   :  { %3082 = vrot.lane.b32.xlu1 %v4666_v11, %s4890_s19 }
0x3958   :  { %3099 = vrot.lane.b32.xlu1 %v3096_v12, %s4891_s9 }
0x39c6   :  { %v3083_v13 = vpop.permute.xlu1 %3082 }
0x39c7   :  { %v3085_v14 = vmul.f32 %v4664_v58, %v3083_v13 }
0x39c9   :  { %3087 = vrot.lane.b32.xlu0 %v3085_v14, %s4891_s9 }
0x39ca   :  { %v3100_v16 = vpop.permute.xlu1 %3099 }
0x39cd   :  { %2874 = vrot.lane.b32.xlu0 %v5551_v33, %s4892_s4 }
0x3a3b   :  { %v3088_v17 = vpop.permute.xlu0 %3087 }
0x3a3c   :  { %v3102_v10 = vsel %vm256_vm4, %v3088_v17, %v3100_v16  ;;  %3090 = vst.msk [vmem:[#allocation5] sm:$0x3] %vm146_vm0, %v3088_v17 }
0x3a3d   :  { %4227 = vmatmul.mubr.msk.f32.vlgmr.msra.gmra.mrb[22].mxu1 %vm2416_vm8, %v3102_v10 }
0x3a3e   :  { %4467 = vmatpush3.bf16.msra.mxu1 %v5411_v54  ;;  %4269 = vmatprep.mubr.msk.f32.mxu1 %vm4888_vm1, %v4889_v1 }
0x3a3f   :  { %v2875_v3 = vpop.permute.xlu0 %2874  ;;  %4468 = vmatprep.subr.bf16.mxu1 %v4887_v0 }
0x3a40   :  { %2877 = vst.msk [vmem:[#allocation8] sm:$0x3] %vm146_vm0, %v2875_v3 }
0x3a42   :  { %4470 = vmatpush3.bf16.msra.mxu1 %v5417_v56 }
0x3a43   :  { %4471 = vmatprep.subr.bf16.mxu1 %v4887_v0  ;;  %v3317_v31 = vld [vmem:[#allocation5] sm:$0x3] }
0x3a46   :  { %4473 = vmatpush3.bf16.msra.mxu1 %v5428_v59 }
0x3a47   :  { %v3097_v19 = vld [vmem:[#allocation8] sm:$0x3]  ;;  %4474 = vmatprep.subr.bf16.mxu1 %v4887_v0 }
0x3a48   :  { %3199 = vrot.lane.b32.xlu0 %v3097_v19, %s4891_s9 }
0x3a4a   :  { %4476 = vmatpush3.bf16.msra.mxu1 %v5438_v2 }
0x3aba   :  { %v3200_v27 = vpop.permute.xlu0 %3199 }
0x3b10   :  { %v3187_v54 = vpop.f32.mrb[22].mxu1 }
0x3b11   :  { %v3188_v21 = vadd.f32 %v5460_v8, %v3187_v54  ;;  %v4228_v22 = vpop.f32.mrb[23].mxu1 }
0x3b13   :  { %4667 = vtanh.f32 %v3188_v21  ;;  %v3737_v56 = vmul.f32 -1.442695, %v3188_v21 }
0x3b15   :  { %4669 = vpow2.f32 %v3737_v56 }
0x3b1d   :  { %v4668_v23 = vpop.eup %4667 }
0x3b1e   :  { %3204 = vrot.lane.b32.xlu1 %v4668_v23, %s4890_s19 }
0x3b1f   :  { %v4670_v24 = vpop.eup %4669 }
0x3b20   :  { %v3194_v25 = vadd.f32 1.0, %v4670_v24 }
0x3b22   :  { %4671 = vrcp.f32 %v3194_v25 }
0x3b2c   :  { %v4672_v59 = vpop.eup %4671 }
0x3b2d   :  { %v3202_v2 = vmul.f32 %v4672_v59, %v3200_v27 }
0x3b90   :  { %v3205_v15 = vpop.permute.xlu1 %3204 }
0x3b91   :  { %v3207_v26 = vmul.f32 %v4672_v59, %v3205_v15 }
0x3b93   :  { %3209 = vrot.lane.b32.xlu1 %v3207_v26, %s4891_s9 }
0x3c05   :  { %v3210_v28 = vpop.permute.xlu1 %3209 }
0x3c06   :  { %v5613_v29 = vadd.f32 %v3210_v28, %v3202_v2 }
0x3c08   :  { %4673 = vtanh.f32 %v5613_v29 }
0x3c12   :  { %v4674_v18 = vpop.eup %4673 }
0x3c13   :  { %3215 = vrot.lane.b32.xlu0 %v4674_v18, %s4890_s19 }
0x3c17   :  { %3320 = vrot.lane.b32.xlu0 %v3317_v31, %s4879_s24 }
0x3c85   :  { %v3216_v33 = vpop.permute.xlu0 %3215 }
0x3c86   :  { %v3218_v34 = vmul.f32 %v4672_v59, %v3216_v33 }
0x3c88   :  { %3220 = vrot.lane.b32.xlu1 %v3218_v34, %s4891_s9 }
0x3c8c   :  { %3092 = vrot.lane.b32.xlu1 %v3079_v9, %s4892_s4 }
0x3cfa   :  { %v3221_v35 = vpop.permute.xlu1 %3220 }
0x3cfb   :  { %3223 = vst.msk [vmem:[#allocation6] sm:$0x3] %vm146_vm0, %v3221_v35  ;;  %4238 = vmatmul.mubr.msk.f32.vlgmr.msra.gmra.mrb[28].mxu0 %vm256_vm4, %v3221_v35 }
0x3cfc   :  { %4461 = vmatpush3.bf16.msra.mxu0 %v5351_v53  ;;  %4250 = vmatprep.mubr.msk.f32.mxu0 %vm4888_vm1, %v4889_v1 }
0x3cfd   :  { %4462 = vmatprep.subr.bf16.mxu0 %v4887_v0 }
0x3cfe   :  { %v3093_v36 = vpop.permute.xlu1 %3092 }
0x3cff   :  { %3095 = vst.msk [vmem:[#allocation7] sm:$0x3] %vm146_vm0, %v3093_v36 }
0x3d00   :  { %4464 = vmatpush3.bf16.msra.mxu0 %v5359_v61  ;;  %v3321_v61 = vpop.permute.xlu0 %3320 }
0x3d01   :  { %4248 = vmatprep.subr.mxu0 %v4889_v1 }
0x3d02   :  { %v3447_v52 = vld [vmem:[#allocation6] sm:$0x3] }
0x3d04   :  { %4249 = vmatpush3.msra.mxu0 %v5363_v62 }
0x3d05   :  { %4477 = vmatprep.subr.bf16.mxu0 %v4887_v0 }
0x3d06   :  { %v3318_v37 = vld [vmem:[#allocation7] sm:$0x3] }
0x3d07   :  { %3417 = vrot.lane.b32.xlu1 %v3318_v37, %s4891_s9 }
0x3dce   :  { %v3308_v53 = vpop.f32.mrb[28].mxu0 }
0x3dcf   :  { %v3309_v38 = vadd.f32 %v5505_v40, %v3308_v53  ;;  %v4239_v39 = vpop.f32.mrb[29].mxu0 }
0x3dd1   :  { %v3312_v41 = vadd.f32 %v3309_v38, %v5577_v6 }
0x3dd3   :  { %3740 = vst.msk [vmem:[%s5694_s14 + $0x4] sm:$0x3] %vm2259_vm5, %v3312_v41  ;;  %3315 = vst.msk [vmem:[#allocation4] sm:$0x3] %vm2259_vm5, %v3312_v41 }
0x3dda   :  { %v5639_v62 = vld [vmem:[#allocation4] sm:$0x3] }
0x3ddb   :  { %v3323_v42 = vsel %vm2268_vm6, %v5639_v62, %v3321_v61 }
0x3ddc   :  { %4251 = vmatmul.mubr.msk.f32.vlgmr.msra.gmra.mrb[30].mxu0 %vm2282_vm7, %v3323_v42 }
0x3ddd   :  { %4479 = vmatpush3.bf16.msra.mxu0 %v5477_v30  ;;  %4280 = vmatprep.mubr.msk.f32.mxu0 %vm4888_vm1, %v4889_v1 }
0x3dde   :  { %4480 = vmatprep.subr.bf16.mxu0 %v4887_v0  ;;  %v3418_v0 = vpop.permute.xlu1 %3417 }
0x3de1   :  { %4482 = vmatpush3.bf16.msra.mxu0 %v5483_v32 }
0x3eaf   :  { %v3405_v43 = vpop.f32.mrb[30].mxu0 }
0x3eb0   :  { %v3406_v44 = vadd.f32 %v5386_v20, %v3405_v43  ;;  %v4252_v45 = vpop.f32.mrb[31].mxu0 }
0x3eb2   :  { %4675 = vtanh.f32 %v3406_v44  ;;  %v3743_v6 = vmul.f32 -1.442695, %v3406_v44 }
0x3eb4   :  { %4677 = vpow2.f32 %v3743_v6 }
0x3ebc   :  { %v4676_v47 = vpop.eup %4675 }
0x3ebd   :  { %3422 = vrot.lane.b32.xlu0 %v4676_v47, %s4890_s19 }
0x3ebe   :  { %v4678_v48 = vpop.eup %4677 }
0x3ebf   :  { %v3412_v46 = vadd.f32 1.0, %v4678_v48 }
0x3ec1   :  { %4679 = vrcp.f32 %v3412_v46 }
0x3ecb   :  { %v4680_v30 = vpop.eup %4679 }
0x3ecc   :  { %v3420_v32 = vmul.f32 %v4680_v30, %v3418_v0 }
0x3f2f   :  { %v3423_v49 = vpop.permute.xlu0 %3422 }
0x3f30   :  { %v3425_v1 = vmul.f32 %v4680_v30, %v3423_v49 }
0x3f32   :  { %3427 = vrot.lane.b32.xlu0 %v3425_v1, %s4891_s9 }
0x3fa4   :  { %v3428_v50 = vpop.permute.xlu0 %3427 }
0x3fa5   :  { %v3430_v51 = vadd.f32 %v3428_v50, %v3420_v32 }
0x3fa7   :  { %4681 = vtanh.f32 %v3430_v51 }
0x3fb1   :  { %v4682_v20 = vpop.eup %4681 }
0x3fb2   :  { %3433 = vrot.lane.b32.xlu1 %v4682_v20, %s4890_s19 }
0x3fb6   :  { %3450 = vrot.lane.b32.xlu1 %v3447_v52, %s4891_s9 }
0x4024   :  { %v3434_v55 = vpop.permute.xlu1 %3433 }
0x4025   :  { %v3436_v57 = vmul.f32 %v4680_v30, %v3434_v55 }
0x4027   :  { %3438 = vrot.lane.b32.xlu0 %v3436_v57, %s4891_s9 }
0x4028   :  { %v3451_v58 = vpop.permute.xlu1 %3450 }
0x402b   :  { %3225 = vrot.lane.b32.xlu0 %v5613_v29, %s4892_s4 }
0x4099   :  { %v3439_v60 = vpop.permute.xlu0 %3438 }
0x409a   :  { %3441 = vst.msk [vmem:[#allocation5] sm:$0x3] %vm146_vm0, %v3439_v60  ;;  %v3453_v63 = vsel %vm256_vm4, %v3439_v60, %v3451_v58 }
0x409b   :  { %4270 = vmatmul.mubr.msk.f32.vlgmr.msra.gmra.mrb[24].mxu1 %vm2416_vm8, %v3453_v63 }
0x409d   :  { %v3226_v4 = vpop.permute.xlu0 %3225 }
0x409e   :  { %3228 = vst.msk [vmem:[#allocation8] sm:$0x3] %vm146_vm0, %v3226_v4 }
0x40a5   :  { %v3448_v5 = vld [vmem:[#allocation8] sm:$0x3] }
0x40a6   :  { %3550 = vrot.lane.b32.xlu0 %v3448_v5, %s4891_s9 }
0x4118   :  { %v3551_v19 = vpop.permute.xlu0 %3550 }
0x416e   :  { %v3538_v7 = vpop.f32.mrb[24].mxu1 }
0x416f   :  { %v3539_v9 = vadd.f32 %v5460_v8, %v3538_v7  ;;  %v4271_v11 = vpop.f32.mrb[25].mxu1 }
0x4171   :  { %4683 = vtanh.f32 %v3539_v9  ;;  %v3746_v13 = vmul.f32 -1.442695, %v3539_v9 }
0x4173   :  { %4685 = vpow2.f32 %v3746_v13 }
0x417b   :  { %v4684_v12 = vpop.eup %4683 }
0x417c   :  { %3555 = vrot.lane.b32.xlu1 %v4684_v12, %s4890_s19 }
0x417d   :  { %v4686_v14 = vpop.eup %4685 }
0x417e   :  { %v3545_v16 = vadd.f32 1.0, %v4686_v14 }
0x4180   :  { %4687 = vrcp.f32 %v3545_v16 }
0x418a   :  { %v4688_v17 = vpop.eup %4687 }
0x418b   :  { %v3553_v54 = vmul.f32 %v4688_v17, %v3551_v19 }
0x41ee   :  { %v3556_v10 = vpop.permute.xlu1 %3555 }
0x41ef   :  { %v3558_v3 = vmul.f32 %v4688_v17, %v3556_v10 }
0x41f1   :  { %3560 = vrot.lane.b32.xlu1 %v3558_v3, %s4891_s9 }
0x4263   :  { %v3561_v21 = vpop.permute.xlu1 %3560 }
0x4264   :  { %v3563_v22 = vadd.f32 %v3561_v21, %v3553_v54 }
0x4266   :  { %4689 = vtanh.f32 %v3563_v22 }
0x4270   :  { %v4690_v8 = vpop.eup %4689 }
0x4271   :  { %3566 = vrot.lane.b32.xlu0 %v4690_v8, %s4890_s19 }
0x4275   :  { %3443 = vrot.lane.b32.xlu0 %v3430_v51, %s4892_s4 }
0x42e3   :  { %v3567_v23 = vpop.permute.xlu0 %3566 }
0x42e4   :  { %v3569_v56 = vmul.f32 %v4688_v17, %v3567_v23 }
0x42e6   :  { %3571 = vrot.lane.b32.xlu1 %v3569_v56, %s4891_s9 }
0x42e7   :  { %v3444_v24 = vpop.permute.xlu0 %3443 }
0x42e8   :  { %3446 = vst.msk [vmem:[#allocation7] sm:$0x3] %vm146_vm0, %v3444_v24 }
0x42ea   :  { %3576 = vrot.lane.b32.xlu1 %v3563_v22, %s4892_s4 }
0x4358   :  { %v3572_v25 = vpop.permute.xlu1 %3571 }
0x4359   :  { %3574 = vst.msk [vmem:[#allocation6] sm:$0x3] %vm146_vm0, %v3572_v25  ;;  %4281 = vmatmul.mubr.msk.f32.vlgmr.msra.gmra.mrb[32].mxu0 %vm256_vm4, %v3572_v25 }
0x435c   :  { %v3577_v59 = vpop.permute.xlu1 %3576 }
0x435d   :  { %3579 = vst.msk [vmem:[#allocation8] sm:$0x3] %vm146_vm0, %v3577_v59 }
0x442c   :  { %v3659_v15 = vpop.f32.mrb[32].mxu0 }
0x442d   :  { %v3660_v26 = vadd.f32 %v5505_v40, %v3659_v15  ;;  %v4282_v27 = vpop.f32.mrb[33].mxu0 }
0x442f   :  { %v3663_v2 = vadd.f32 %v3660_v26, %v5639_v62 }
0x4431   :  { %3749 = vst.msk [vmem:[%s5694_s14 + $0x6] sm:$0x3] %vm2259_vm5, %v3663_v2  ;;  %3666 = vst.msk [vmem:[#allocation4] sm:$0x3] %vm2259_vm5, %v3663_v2 }
0x4432   :  { %3671 = vsyncpa [#allocation10], 1 }
0x4433   :  { %3672 = vsyncpa [#allocation12], 1 }
0x4434   :  { %3673 = vsyncpa [#allocation15], 1 }
0x4435   :  { %3674 = vsyncpa [#allocation18], 1 }
0x4436   :  { %3675 = vsyncpa [#allocation21], 1 }

</bundles_post_ra>
